<compile_context>
chip_gen: v7x
topology: tpu7x:2x2x1
jax: 0.10.0
libtpu: 0.0.40
codegen_flags: <defaults>
</compile_context>

<pallas_src>
import math

import numpy as np
import jax
import jax.numpy as jnp
from jax.experimental import pallas as pl
from jax.experimental.pallas import tpu as pltpu


# ----------------------------------------------------------------------------
# Per-generation VMEM budget (v5e/v6e: 128 MiB, v7x: 64 MiB)
# ----------------------------------------------------------------------------

def _vmem_capacity_bytes():
    try:
        cap = int(pltpu.get_tpu_info().vmem_capacity_bytes)
    except Exception:
        cap = 64 * 1024 * 1024          # conservative (v7x-sized) fallback
    return max(cap, 32 * 1024 * 1024)


_VMEM_CAP = _vmem_capacity_bytes()
# Target bytes for a single pipelined input buffer (leaves room for double
# buffering of several operands + compiler scratch).
_PER_BUF = max(_VMEM_CAP // 8, 1 << 18)


def _compiler_params(grid_rank):
    return pltpu.CompilerParams(
        dimension_semantics=("parallel",) * grid_rank,
        vmem_limit_bytes=int(_VMEM_CAP * 3 // 4),
    )


def _round_up(a, b):
    return (a + b - 1) // b * b


# ----------------------------------------------------------------------------
# Pallas kernels
# ----------------------------------------------------------------------------

def _mm_bias_relu_kernel(x_ref, w_ref, b_ref, o_ref):
    # x: (1, tm, K) bf16   w: (K, Cout) bf16   b: (1, Cout) f32
    acc = jnp.dot(x_ref[0], w_ref[...], preferred_element_type=jnp.float32)
    acc = jnp.maximum(acc + b_ref[...], 0.0)
    o_ref[0] = acc.astype(o_ref.dtype)


def _mm_bias_relu_add_kernel(x_ref, y_ref, w_ref, b_ref, o_ref):
    # Fused ConvBnRelu(1x1) + add of the (already replicated) coarser level:
    #   o = relu(x @ w + b) + y
    acc = jnp.dot(x_ref[0], w_ref[...], preferred_element_type=jnp.float32)
    acc = jnp.maximum(acc + b_ref[...], 0.0) + y_ref[0].astype(jnp.float32)
    o_ref[0] = acc.astype(o_ref.dtype)


def _conv3x3_bias_relu_kernel(x_ref, w_ref, b_ref, o_ref):
    # In-kernel im2col 3x3 conv, stride 1, pad 1 (padding applied in wrapper):
    #   x: (1, 1, th+2, W+2, C) bf16   w: (3, 3, C, Cout) bf16
    #   b: (1, Cout) f32               o: (1, th, W, Cout) f32
    th, W, Cout = o_ref.shape[1], o_ref.shape[2], o_ref.shape[3]
    C = x_ref.shape[-1]
    x = x_ref[0, 0]                                     # (th+2, W+2, C)
    acc = jnp.zeros((th * W, Cout), jnp.float32)
    for ky in range(3):                                 # static, fully unrolled
        for kx in range(3):
            slab = x[ky:ky + th, kx:kx + W, :].reshape(th * W, C)
            acc = acc + jnp.dot(slab, w_ref[ky, kx],
                                preferred_element_type=jnp.float32)
    acc = jnp.maximum(acc + b_ref[...], 0.0)
    o_ref[0] = acc.reshape(th, W, Cout).astype(o_ref.dtype)


# ----------------------------------------------------------------------------
# pallas_call wrappers
# ----------------------------------------------------------------------------

def _choose_tile_m(M, Cin, Cout):
    m_full = _round_up(M, 16)
    row_bytes = 2 * Cin + 4 * Cout            # bf16 x row + (y + out) rows
    t = _PER_BUF // max(row_bytes, 1)
    t = max(16, (t // 16) * 16)
    return min(m_full, t, 4096)


def conv1x1_bn_relu(x, p, add=None):
    """out = relu(x @ w + b) [+ add]; x, add are NHWC.  bf16 matmul, f32 acc."""
    N, H, W, Cin = x.shape
    Cout = p["w"].shape[1]
    M = H * W
    tm = _choose_tile_m(M, Cin, Cout)
    Mp = _round_up(M, tm)

    xf = x.reshape(N, M, Cin)
    if Mp != M:
        xf = jnp.pad(xf, ((0, 0), (0, Mp - M), (0, 0)))

    grid = (N, Mp // tm)
    x_spec = pl.BlockSpec((1, tm, Cin), lambda n, m: (n, m, 0))
    w_spec = pl.BlockSpec((Cin, Cout), lambda n, m: (0, 0))
    b_spec = pl.BlockSpec((1, Cout), lambda n, m: (0, 0))
    o_spec = pl.BlockSpec((1, tm, Cout), lambda n, m: (n, m, 0))
    out_shape = jax.ShapeDtypeStruct((N, Mp, Cout), jnp.bfloat16)

    if add is None:
        out = pl.pallas_call(
            _mm_bias_relu_kernel, out_shape=out_shape, grid=grid,
            in_specs=[x_spec, w_spec, b_spec], out_specs=o_spec,
            compiler_params=_compiler_params(2),
        )(xf, p["w"], p["b"])
    else:
        yf = add.astype(jnp.bfloat16).reshape(N, M, Cout)
        if Mp != M:
            yf = jnp.pad(yf, ((0, 0), (0, Mp - M), (0, 0)))
        y_spec = pl.BlockSpec((1, tm, Cout), lambda n, m: (n, m, 0))
        out = pl.pallas_call(
            _mm_bias_relu_add_kernel, out_shape=out_shape, grid=grid,
            in_specs=[x_spec, y_spec, w_spec, b_spec], out_specs=o_spec,
            compiler_params=_compiler_params(2),
        )(xf, yf, p["w"], p["b"])

    if Mp != M:
        out = out[:, :M]
    return out.reshape(N, H, W, Cout)


def _choose_tile_h(H, W, C, Cout):
    row_bytes = (W + 2) * C * 2 + W * Cout * 4   # bf16 input row + f32 out row
    t = _PER_BUF // max(row_bytes, 1)
    return H if t >= H else max(8, int(t))


def conv3x3_bn_relu(x, p):
    """3x3 stride-1 pad-1 ConvBnRelu with in-kernel im2col.  x: NHWC bf16."""
    N, H, W, C = x.shape
    Cout = p["w"].shape[-1]
    th = _choose_tile_h(H, W, C, Cout)
    Hp = _round_up(H, th)
    nT = Hp // th

    # Spatial zero padding (+ bottom fill so the H tiles divide evenly).
    xp = jnp.pad(x, ((0, 0), (1, 1 + Hp - H), (1, 1), (0, 0)))
    if nT == 1:
        x_tiles = xp[:, None]                               # (N,1,H+2,W+2,C)
    else:
        # Overlapping row tiles with a 1-row halo each side (~2/th redundancy).
        idx = np.arange(nT)[:, None] * th + np.arange(th + 2)[None, :]
        x_tiles = xp[:, idx]                                # (N,nT,th+2,W+2,C)

    out = pl.pallas_call(
        _conv3x3_bias_relu_kernel,
        out_shape=jax.ShapeDtypeStruct((N, Hp, W, Cout), jnp.float32),
        grid=(N, nT),
        in_specs=[
            pl.BlockSpec((1, 1, th + 2, W + 2, C), lambda n, t: (n, t, 0, 0, 0)),
            pl.BlockSpec((3, 3, C, Cout), lambda n, t: (0, 0, 0, 0)),
            pl.BlockSpec((1, Cout), lambda n, t: (0, 0)),
        ],
        out_specs=pl.BlockSpec((1, th, W, Cout), lambda n, t: (n, t, 0, 0)),
        compiler_params=_compiler_params(2),
    )(x_tiles, p["w"], p["b"])

    return out[:, :H] if Hp != H else out


# ----------------------------------------------------------------------------
# Nearest-neighbour upsample (pure data movement, wrapper side)
# ----------------------------------------------------------------------------

def nearest_upsample(x, H, W):
    """PyTorch F.interpolate(mode='nearest') to (H, W).  x: NHWC."""
    n, h, w, c = x.shape
    if (h, w) == (H, W):
        return x
    if H % h == 0 and W % w == 0:          # exact integer factor: replicate
        x = jnp.repeat(x, H // h, axis=1)
        return jnp.repeat(x, W // w, axis=2)
    ih = (np.arange(H) * h) // H           # src = floor(dst * in / out)
    iw = (np.arange(W) * w) // W
    return x[:, ih][:, :, iw]


# ----------------------------------------------------------------------------
# Parameters (ConvBnRelu fused exactly as fuse_modules with fresh BN would)
# ----------------------------------------------------------------------------

def _kaiming_conv(key, cout, cin, k):
    fan_in = cin * k * k
    std = math.sqrt(2.0 / fan_in)
    return jax.random.normal(key, (cout, cin, k, k), jnp.float32) * std


def make_params(in_channels, inner_channels, seed=42):
    """Deterministic synthetic parameters matching DB_Head.__init__ shapes."""
    keys = jax.random.split(jax.random.PRNGKey(seed), 8)
    bn_scale = 1.0 / math.sqrt(1.0 + 1e-5)   # gamma=1, var=1, eps=1e-5
    bn_bias = 1e-4                            # beta=1e-4, mean=0
    params = {}
    specs_1x1 = [("in5", in_channels[-1]), ("in4", in_channels[-2]),
                 ("in3", in_channels[-3]), ("in2", in_channels[-4])]
    for i, (name, cin) in enumerate(specs_1x1):
        w = _kaiming_conv(keys[i], inner_channels, cin, 1) * bn_scale
        params[name] = {
            "w": jnp.transpose(w[:, :, 0, 0], (1, 0)).astype(jnp.bfloat16),  # (Cin, inner)
            "b": jnp.full((1, inner_channels), bn_bias, jnp.float32),
        }
    quarter = inner_channels // 4
    for i, name in enumerate(["out5", "out4", "out3", "out2"]):
        w = _kaiming_conv(keys[4 + i], quarter, inner_channels, 3) * bn_scale
        # (Cout, Cin, 3, 3) -> (ky, kx, Cin, Cout): one channel-major,
        # lane-contiguous (C, Cout) tap per (ky, kx) for the in-kernel im2col.
        params[name] = {
            "w": jnp.transpose(w, (2, 3, 1, 0)).astype(jnp.bfloat16),
            "b": jnp.full((1, quarter), bn_bias, jnp.float32),
        }
    return params


# ----------------------------------------------------------------------------
# DB_Head forward (NCHW in / NCHW out, like the PyTorch module)
# ----------------------------------------------------------------------------

def db_head_forward(params, x1, x2, x3, x4):
    to_nhwc = lambda t: jnp.transpose(t, (0, 2, 3, 1)).astype(jnp.bfloat16)
    f1, f2, f3, f4 = map(to_nhwc, (x1, x2, x3, x4))

    # Lateral 1x1 ConvBnRelu; the top-down upsample_add is fused into the
    # conv kernel epilogue (the replication itself is wrapper data movement).
    in5 = conv1x1_bn_relu(f1, params["in5"])
    out4 = conv1x1_bn_relu(f2, params["in4"],
                           add=nearest_upsample(in5, f2.shape[1], f2.shape[2]))
    out3 = conv1x1_bn_relu(f3, params["in3"],
                           add=nearest_upsample(out4, f3.shape[1], f3.shape[2]))
    out2 = conv1x1_bn_relu(f4, params["in2"],
                           add=nearest_upsample(out3, f4.shape[1], f4.shape[2]))

    # 3x3 ConvBnRelu heads at native resolution (in-kernel im2col), then
    # nearest replication up to out2's resolution and channel concat.
    q5 = conv3x3_bn_relu(in5, params["out5"])
    q4 = conv3x3_bn_relu(out4, params["out4"])
    q3 = conv3x3_bn_relu(out3, params["out3"])
    p2 = conv3x3_bn_relu(out2, params["out2"])

    H, W = out2.shape[1], out2.shape[2]
    p5 = nearest_upsample(q5, H, W)
    p4 = nearest_upsample(q4, H, W)
    p3 = nearest_upsample(q3, H, W)

    fuse = jnp.concatenate([p5, p4, p3, p2], axis=-1)    # (N, H, W, inner)
    return jnp.transpose(fuse, (0, 3, 1, 2)).astype(jnp.float32)


# ----------------------------------------------------------------------------
# Demo
# ----------------------------------------------------------------------------

if __name__ == "__main__":
    N = 2
    inner_channels = 32
    in_channels = [8, 16, 24, 32]   # [C2, C3, C4, C5] as in ResNet-style FPN

    key = jax.random.PRNGKey(0)
    k1, k2, k3, k4 = jax.random.split(key, 4)
    # x1 is the deepest / smallest feature map, x4 the shallowest / largest.
    x1 = jax.random.normal(k1, (N, in_channels[-1], 2, 2), jnp.float32)
    x2 = jax.random.normal(k2, (N, in_channels[-2], 4, 4), jnp.float32)
    x3 = jax.random.normal(k3, (N, in_channels[-3], 8, 8), jnp.float32)
    x4 = jax.random.normal(k4, (N, in_channels[-4], 16, 16), jnp.float32)

    params = make_params(in_channels, inner_channels)

    out = jax.jit(db_head_forward)(params, x1, x2, x3, x4)
    out = jax.block_until_ready(out)

    assert out.shape == (N, inner_channels, 16, 16), out.shape
    assert out.dtype == jnp.float32
    assert bool(jnp.all(jnp.isfinite(out)))
    print("KERNEL_OK")
</pallas_src>

<mosaic_0001>
module attributes {stable_mosaic.version = 11 : i64} {
  func.func @_mm_bias_relu_kernel(%arg0: i32, %arg1: i32, %arg2: memref<1x16x32xbf16, #tpu.memory_space<vmem>>, %arg3: memref<32x32xbf16, #tpu.memory_space<vmem>>, %arg4: memref<1x32xf32, #tpu.memory_space<vmem>>, %arg5: memref<1x16x32xbf16, #tpu.memory_space<vmem>>) attributes {dimension_semantics = [#tpu.dimension_semantics<parallel>, #tpu.dimension_semantics<parallel>], iteration_bounds = array<i64: 2, 1>, scalar_prefetch = 0 : i64, scratch_operands = 0 : i64, tpu.core_type = #tpu.core_type<tc>, window_params = [{transform_indices = @transform_0, window_bounds = array<i64: 1, 16, 32>}, {pipeline_mode = #tpu.pipeline_mode<synchronous>, transform_indices = @transform_1, window_bounds = array<i64: 32, 32>}, {pipeline_mode = #tpu.pipeline_mode<synchronous>, transform_indices = @transform_2, window_bounds = array<i64: 1, 32>}, {transform_indices = @transform_3, window_bounds = array<i64: 1, 16, 32>}]} {
    %c0 = arith.constant 0 : index
    %c0_0 = arith.constant 0 : index
    %c0_1 = arith.constant 0 : index
    %0 = vector.load %arg2[%c0, %c0_0, %c0_1] : memref<1x16x32xbf16, #tpu.memory_space<vmem>>, vector<1x16x32xbf16>
    %1 = vector.shape_cast %0 : vector<1x16x32xbf16> to vector<16x32xbf16>
    %c0_2 = arith.constant 0 : index
    %c0_3 = arith.constant 0 : index
    %2 = vector.load %arg3[%c0_2, %c0_3] : memref<32x32xbf16, #tpu.memory_space<vmem>>, vector<32x32xbf16>
    %cst = arith.constant dense<0.000000e+00> : vector<16x32xf32>
    %3 = tpu.matmul %1, %2, %cst {dimension_numbers = #tpu.dot_dimension_numbers<[1], [0], [0], [1], [0, 0, 1, 1], [], []>} : vector<16x32xbf16>, vector<32x32xbf16>, vector<16x32xf32> -> vector<16x32xf32>
    %c0_4 = arith.constant 0 : index
    %c0_5 = arith.constant 0 : index
    %4 = vector.load %arg4[%c0_4, %c0_5] : memref<1x32xf32, #tpu.memory_space<vmem>>, vector<1x32xf32>
    %5 = vector.broadcast %4 : vector<1x32xf32> to vector<16x32xf32>
    %6 = arith.addf %3, %5 : vector<16x32xf32>
    %cst_6 = arith.constant 0.000000e+00 : f32
    %7 = vector.broadcast %cst_6 : f32 to vector<16x32xf32>
    %8 = arith.maximumf %6, %7 : vector<16x32xf32>
    %9 = arith.truncf %8 : vector<16x32xf32> to vector<16x32xbf16>
    %c0_7 = arith.constant 0 : index
    %c0_8 = arith.constant 0 : index
    %c0_9 = arith.constant 0 : index
    %10 = vector.load %arg5[%c0_7, %c0_8, %c0_9] : memref<1x16x32xbf16, #tpu.memory_space<vmem>>, vector<1x16x32xbf16>
    %11 = vector.shape_cast %10 : vector<1x16x32xbf16> to vector<16x32xbf16>
    %12 = vector.shape_cast %9 : vector<16x32xbf16> to vector<1x16x32xbf16>
    tpu.vector_store %arg5[%c0_7, %c0_8, %c0_9], %12 {strides = array<i32>} : memref<1x16x32xbf16, #tpu.memory_space<vmem>>, vector<1x16x32xbf16>,
    return
  }
  func.func @transform_0(%arg0: i32, %arg1: i32) -> (i32, i32, i32) {
    %c0_i32 = arith.constant 0 : i32
    %c0_i32_0 = arith.constant 0 : i32
    return %arg0, %arg1, %c0_i32 : i32, i32, i32
  }
  func.func @transform_1(%arg0: i32, %arg1: i32) -> (i32, i32) {
    %c0_i32 = arith.constant 0 : i32
    %c0_i32_0 = arith.constant 0 : i32
    %c0_i32_1 = arith.constant 0 : i32
    return %c0_i32, %c0_i32_0 : i32, i32
  }
  func.func @transform_2(%arg0: i32, %arg1: i32) -> (i32, i32) {
    %c0_i32 = arith.constant 0 : i32
    %c0_i32_0 = arith.constant 0 : i32
    %c0_i32_1 = arith.constant 0 : i32
    return %c0_i32, %c0_i32_0 : i32, i32
  }
  func.func @transform_3(%arg0: i32, %arg1: i32) -> (i32, i32, i32) {
    %c0_i32 = arith.constant 0 : i32
    %c0_i32_0 = arith.constant 0 : i32
    return %arg0, %arg1, %c0_i32 : i32, i32, i32
  }
}

module attributes {stable_mosaic.version = 11 : i64} {
  func.func @_mm_bias_relu_add_kernel(%arg0: i32, %arg1: i32, %arg2: memref<1x16x24xbf16, #tpu.memory_space<vmem>>, %arg3: memref<1x16x32xbf16, #tpu.memory_space<vmem>>, %arg4: memref<24x32xbf16, #tpu.memory_space<vmem>>, %arg5: memref<1x32xf32, #tpu.memory_space<vmem>>, %arg6: memref<1x16x32xbf16, #tpu.memory_space<vmem>>) attributes {dimension_semantics = [#tpu.dimension_semantics<parallel>, #tpu.dimension_semantics<parallel>], iteration_bounds = array<i64: 2, 1>, scalar_prefetch = 0 : i64, scratch_operands = 0 : i64, tpu.core_type = #tpu.core_type<tc>, window_params = [{transform_indices = @transform_0, window_bounds = array<i64: 1, 16, 24>}, {transform_indices = @transform_1, window_bounds = array<i64: 1, 16, 32>}, {pipeline_mode = #tpu.pipeline_mode<synchronous>, transform_indices = @transform_2, window_bounds = array<i64: 24, 32>}, {pipeline_mode = #tpu.pipeline_mode<synchronous>, transform_indices = @transform_3, window_bounds = array<i64: 1, 32>}, {transform_indices = @transform_4, window_bounds = array<i64: 1, 16, 32>}]} {
    %c0 = arith.constant 0 : index
    %c0_0 = arith.constant 0 : index
    %c0_1 = arith.constant 0 : index
    %0 = vector.load %arg2[%c0, %c0_0, %c0_1] : memref<1x16x24xbf16, #tpu.memory_space<vmem>>, vector<1x16x24xbf16>
    %1 = vector.shape_cast %0 : vector<1x16x24xbf16> to vector<16x24xbf16>
    %c0_2 = arith.constant 0 : index
    %c0_3 = arith.constant 0 : index
    %2 = vector.load %arg4[%c0_2, %c0_3] : memref<24x32xbf16, #tpu.memory_space<vmem>>, vector<24x32xbf16>
    %cst = arith.constant dense<0.000000e+00> : vector<16x32xf32>
    %3 = tpu.matmul %1, %2, %cst {dimension_numbers = #tpu.dot_dimension_numbers<[1], [0], [0], [1], [0, 0, 1, 1], [], []>} : vector<16x24xbf16>, vector<24x32xbf16>, vector<16x32xf32> -> vector<16x32xf32>
    %c0_4 = arith.constant 0 : index
    %c0_5 = arith.constant 0 : index
    %4 = vector.load %arg5[%c0_4, %c0_5] : memref<1x32xf32, #tpu.memory_space<vmem>>, vector<1x32xf32>
    %5 = vector.broadcast %4 : vector<1x32xf32> to vector<16x32xf32>
    %6 = arith.addf %3, %5 : vector<16x32xf32>
    %cst_6 = arith.constant 0.000000e+00 : f32
    %7 = vector.broadcast %cst_6 : f32 to vector<16x32xf32>
    %8 = arith.maximumf %6, %7 : vector<16x32xf32>
    %c0_7 = arith.constant 0 : index
    %c0_8 = arith.constant 0 : index
    %c0_9 = arith.constant 0 : index
    %9 = vector.load %arg3[%c0_7, %c0_8, %c0_9] : memref<1x16x32xbf16, #tpu.memory_space<vmem>>, vector<1x16x32xbf16>
    %10 = vector.shape_cast %9 : vector<1x16x32xbf16> to vector<16x32xbf16>
    %11 = arith.extf %10 : vector<16x32xbf16> to vector<16x32xf32>
    %12 = arith.addf %8, %11 : vector<16x32xf32>
    %13 = arith.truncf %12 : vector<16x32xf32> to vector<16x32xbf16>
    %c0_10 = arith.constant 0 : index
    %c0_11 = arith.constant 0 : index
    %c0_12 = arith.constant 0 : index
    %14 = vector.load %arg6[%c0_10, %c0_11, %c0_12] : memref<1x16x32xbf16, #tpu.memory_space<vmem>>, vector<1x16x32xbf16>
    %15 = vector.shape_cast %14 : vector<1x16x32xbf16> to vector<16x32xbf16>
    %16 = vector.shape_cast %13 : vector<16x32xbf16> to vector<1x16x32xbf16>
    tpu.vector_store %arg6[%c0_10, %c0_11, %c0_12], %16 {strides = array<i32>} : memref<1x16x32xbf16, #tpu.memory_space<vmem>>, vector<1x16x32xbf16>,
    return
  }
  func.func @transform_0(%arg0: i32, %arg1: i32) -> (i32, i32, i32) {
    %c0_i32 = arith.constant 0 : i32
    %c0_i32_0 = arith.constant 0 : i32
    return %arg0, %arg1, %c0_i32 : i32, i32, i32
  }
  func.func @transform_1(%arg0: i32, %arg1: i32) -> (i32, i32, i32) {
    %c0_i32 = arith.constant 0 : i32
    %c0_i32_0 = arith.constant 0 : i32
    return %arg0, %arg1, %c0_i32 : i32, i32, i32
  }
  func.func @transform_2(%arg0: i32, %arg1: i32) -> (i32, i32) {
    %c0_i32 = arith.constant 0 : i32
    %c0_i32_0 = arith.constant 0 : i32
    %c0_i32_1 = arith.constant 0 : i32
    return %c0_i32, %c0_i32_0 : i32, i32
  }
  func.func @transform_3(%arg0: i32, %arg1: i32) -> (i32, i32) {
    %c0_i32 = arith.constant 0 : i32
    %c0_i32_0 = arith.constant 0 : i32
    %c0_i32_1 = arith.constant 0 : i32
    return %c0_i32, %c0_i32_0 : i32, i32
  }
  func.func @transform_4(%arg0: i32, %arg1: i32) -> (i32, i32, i32) {
    %c0_i32 = arith.constant 0 : i32
    %c0_i32_0 = arith.constant 0 : i32
    return %arg0, %arg1, %c0_i32 : i32, i32, i32
  }
}

module attributes {stable_mosaic.version = 11 : i64} {
  func.func @_mm_bias_relu_add_kernel(%arg0: i32, %arg1: i32, %arg2: memref<1x64x16xbf16, #tpu.memory_space<vmem>>, %arg3: memref<1x64x32xbf16, #tpu.memory_space<vmem>>, %arg4: memref<16x32xbf16, #tpu.memory_space<vmem>>, %arg5: memref<1x32xf32, #tpu.memory_space<vmem>>, %arg6: memref<1x64x32xbf16, #tpu.memory_space<vmem>>) attributes {dimension_semantics = [#tpu.dimension_semantics<parallel>, #tpu.dimension_semantics<parallel>], iteration_bounds = array<i64: 2, 1>, scalar_prefetch = 0 : i64, scratch_operands = 0 : i64, tpu.core_type = #tpu.core_type<tc>, window_params = [{transform_indices = @transform_0, window_bounds = array<i64: 1, 64, 16>}, {transform_indices = @transform_1, window_bounds = array<i64: 1, 64, 32>}, {pipeline_mode = #tpu.pipeline_mode<synchronous>, transform_indices = @transform_2, window_bounds = array<i64: 16, 32>}, {pipeline_mode = #tpu.pipeline_mode<synchronous>, transform_indices = @transform_3, window_bounds = array<i64: 1, 32>}, {transform_indices = @transform_4, window_bounds = array<i64: 1, 64, 32>}]} {
    %c0 = arith.constant 0 : index
    %c0_0 = arith.constant 0 : index
    %c0_1 = arith.constant 0 : index
    %0 = vector.load %arg2[%c0, %c0_0, %c0_1] : memref<1x64x16xbf16, #tpu.memory_space<vmem>>, vector<1x64x16xbf16>
    %1 = vector.shape_cast %0 : vector<1x64x16xbf16> to vector<64x16xbf16>
    %c0_2 = arith.constant 0 : index
    %c0_3 = arith.constant 0 : index
    %2 = vector.load %arg4[%c0_2, %c0_3] : memref<16x32xbf16, #tpu.memory_space<vmem>>, vector<16x32xbf16>
    %cst = arith.constant dense<0.000000e+00> : vector<64x32xf32>
    %3 = tpu.matmul %1, %2, %cst {dimension_numbers = #tpu.dot_dimension_numbers<[1], [0], [0], [1], [0, 0, 1, 1], [], []>} : vector<64x16xbf16>, vector<16x32xbf16>, vector<64x32xf32> -> vector<64x32xf32>
    %c0_4 = arith.constant 0 : index
    %c0_5 = arith.constant 0 : index
    %4 = vector.load %arg5[%c0_4, %c0_5] : memref<1x32xf32, #tpu.memory_space<vmem>>, vector<1x32xf32>
    %5 = vector.broadcast %4 : vector<1x32xf32> to vector<64x32xf32>
    %6 = arith.addf %3, %5 : vector<64x32xf32>
    %cst_6 = arith.constant 0.000000e+00 : f32
    %7 = vector.broadcast %cst_6 : f32 to vector<64x32xf32>
    %8 = arith.maximumf %6, %7 : vector<64x32xf32>
    %c0_7 = arith.constant 0 : index
    %c0_8 = arith.constant 0 : index
    %c0_9 = arith.constant 0 : index
    %9 = vector.load %arg3[%c0_7, %c0_8, %c0_9] : memref<1x64x32xbf16, #tpu.memory_space<vmem>>, vector<1x64x32xbf16>
    %10 = vector.shape_cast %9 : vector<1x64x32xbf16> to vector<64x32xbf16>
    %11 = arith.extf %10 : vector<64x32xbf16> to vector<64x32xf32>
    %12 = arith.addf %8, %11 : vector<64x32xf32>
    %13 = arith.truncf %12 : vector<64x32xf32> to vector<64x32xbf16>
    %c0_10 = arith.constant 0 : index
    %c0_11 = arith.constant 0 : index
    %c0_12 = arith.constant 0 : index
    %14 = vector.load %arg6[%c0_10, %c0_11, %c0_12] : memref<1x64x32xbf16, #tpu.memory_space<vmem>>, vector<1x64x32xbf16>
    %15 = vector.shape_cast %14 : vector<1x64x32xbf16> to vector<64x32xbf16>
    %16 = vector.shape_cast %13 : vector<64x32xbf16> to vector<1x64x32xbf16>
    tpu.vector_store %arg6[%c0_10, %c0_11, %c0_12], %16 {strides = array<i32>} : memref<1x64x32xbf16, #tpu.memory_space<vmem>>, vector<1x64x32xbf16>,
    return
  }
  func.func @transform_0(%arg0: i32, %arg1: i32) -> (i32, i32, i32) {
    %c0_i32 = arith.constant 0 : i32
    %c0_i32_0 = arith.constant 0 : i32
    return %arg0, %arg1, %c0_i32 : i32, i32, i32
  }
  func.func @transform_1(%arg0: i32, %arg1: i32) -> (i32, i32, i32) {
    %c0_i32 = arith.constant 0 : i32
    %c0_i32_0 = arith.constant 0 : i32
    return %arg0, %arg1, %c0_i32 : i32, i32, i32
  }
  func.func @transform_2(%arg0: i32, %arg1: i32) -> (i32, i32) {
    %c0_i32 = arith.constant 0 : i32
    %c0_i32_0 = arith.constant 0 : i32
    %c0_i32_1 = arith.constant 0 : i32
    return %c0_i32, %c0_i32_0 : i32, i32
  }
  func.func @transform_3(%arg0: i32, %arg1: i32) -> (i32, i32) {
    %c0_i32 = arith.constant 0 : i32
    %c0_i32_0 = arith.constant 0 : i32
    %c0_i32_1 = arith.constant 0 : i32
    return %c0_i32, %c0_i32_0 : i32, i32
  }
  func.func @transform_4(%arg0: i32, %arg1: i32) -> (i32, i32, i32) {
    %c0_i32 = arith.constant 0 : i32
    %c0_i32_0 = arith.constant 0 : i32
    return %arg0, %arg1, %c0_i32 : i32, i32, i32
  }
}

module attributes {stable_mosaic.version = 11 : i64} {
  func.func @_mm_bias_relu_add_kernel(%arg0: i32, %arg1: i32, %arg2: memref<1x256x8xbf16, #tpu.memory_space<vmem>>, %arg3: memref<1x256x32xbf16, #tpu.memory_space<vmem>>, %arg4: memref<8x32xbf16, #tpu.memory_space<vmem>>, %arg5: memref<1x32xf32, #tpu.memory_space<vmem>>, %arg6: memref<1x256x32xbf16, #tpu.memory_space<vmem>>) attributes {dimension_semantics = [#tpu.dimension_semantics<parallel>, #tpu.dimension_semantics<parallel>], iteration_bounds = array<i64: 2, 1>, scalar_prefetch = 0 : i64, scratch_operands = 0 : i64, tpu.core_type = #tpu.core_type<tc>, window_params = [{transform_indices = @transform_0, window_bounds = array<i64: 1, 256, 8>}, {transform_indices = @transform_1, window_bounds = array<i64: 1, 256, 32>}, {pipeline_mode = #tpu.pipeline_mode<synchronous>, transform_indices = @transform_2, window_bounds = array<i64: 8, 32>}, {pipeline_mode = #tpu.pipeline_mode<synchronous>, transform_indices = @transform_3, window_bounds = array<i64: 1, 32>}, {transform_indices = @transform_4, window_bounds = array<i64: 1, 256, 32>}]} {
    %c0 = arith.constant 0 : index
    %c0_0 = arith.constant 0 : index
    %c0_1 = arith.constant 0 : index
    %0 = vector.load %arg2[%c0, %c0_0, %c0_1] : memref<1x256x8xbf16, #tpu.memory_space<vmem>>, vector<1x256x8xbf16>
    %1 = vector.shape_cast %0 : vector<1x256x8xbf16> to vector<256x8xbf16>
    %c0_2 = arith.constant 0 : index
    %c0_3 = arith.constant 0 : index
    %2 = vector.load %arg4[%c0_2, %c0_3] : memref<8x32xbf16, #tpu.memory_space<vmem>>, vector<8x32xbf16>
    %cst = arith.constant dense<0.000000e+00> : vector<256x32xf32>
    %3 = tpu.matmul %1, %2, %cst {dimension_numbers = #tpu.dot_dimension_numbers<[1], [0], [0], [1], [0, 0, 1, 1], [], []>} : vector<256x8xbf16>, vector<8x32xbf16>, vector<256x32xf32> -> vector<256x32xf32>
    %c0_4 = arith.constant 0 : index
    %c0_5 = arith.constant 0 : index
    %4 = vector.load %arg5[%c0_4, %c0_5] : memref<1x32xf32, #tpu.memory_space<vmem>>, vector<1x32xf32>
    %5 = vector.broadcast %4 : vector<1x32xf32> to vector<256x32xf32>
    %6 = arith.addf %3, %5 : vector<256x32xf32>
    %cst_6 = arith.constant 0.000000e+00 : f32
    %7 = vector.broadcast %cst_6 : f32 to vector<256x32xf32>
    %8 = arith.maximumf %6, %7 : vector<256x32xf32>
    %c0_7 = arith.constant 0 : index
    %c0_8 = arith.constant 0 : index
    %c0_9 = arith.constant 0 : index
    %9 = vector.load %arg3[%c0_7, %c0_8, %c0_9] : memref<1x256x32xbf16, #tpu.memory_space<vmem>>, vector<1x256x32xbf16>
    %10 = vector.shape_cast %9 : vector<1x256x32xbf16> to vector<256x32xbf16>
    %11 = arith.extf %10 : vector<256x32xbf16> to vector<256x32xf32>
    %12 = arith.addf %8, %11 : vector<256x32xf32>
    %13 = arith.truncf %12 : vector<256x32xf32> to vector<256x32xbf16>
    %c0_10 = arith.constant 0 : index
    %c0_11 = arith.constant 0 : index
    %c0_12 = arith.constant 0 : index
    %14 = vector.load %arg6[%c0_10, %c0_11, %c0_12] : memref<1x256x32xbf16, #tpu.memory_space<vmem>>, vector<1x256x32xbf16>
    %15 = vector.shape_cast %14 : vector<1x256x32xbf16> to vector<256x32xbf16>
    %16 = vector.shape_cast %13 : vector<256x32xbf16> to vector<1x256x32xbf16>
    tpu.vector_store %arg6[%c0_10, %c0_11, %c0_12], %16 {strides = array<i32>} : memref<1x256x32xbf16, #tpu.memory_space<vmem>>, vector<1x256x32xbf16>,
    return
  }
  func.func @transform_0(%arg0: i32, %arg1: i32) -> (i32, i32, i32) {
    %c0_i32 = arith.constant 0 : i32
    %c0_i32_0 = arith.constant 0 : i32
    return %arg0, %arg1, %c0_i32 : i32, i32, i32
  }
  func.func @transform_1(%arg0: i32, %arg1: i32) -> (i32, i32, i32) {
    %c0_i32 = arith.constant 0 : i32
    %c0_i32_0 = arith.constant 0 : i32
    return %arg0, %arg1, %c0_i32 : i32, i32, i32
  }
  func.func @transform_2(%arg0: i32, %arg1: i32) -> (i32, i32) {
    %c0_i32 = arith.constant 0 : i32
    %c0_i32_0 = arith.constant 0 : i32
    %c0_i32_1 = arith.constant 0 : i32
    return %c0_i32, %c0_i32_0 : i32, i32
  }
  func.func @transform_3(%arg0: i32, %arg1: i32) -> (i32, i32) {
    %c0_i32 = arith.constant 0 : i32
    %c0_i32_0 = arith.constant 0 : i32
    %c0_i32_1 = arith.constant 0 : i32
    return %c0_i32, %c0_i32_0 : i32, i32
  }
  func.func @transform_4(%arg0: i32, %arg1: i32) -> (i32, i32, i32) {
    %c0_i32 = arith.constant 0 : i32
    %c0_i32_0 = arith.constant 0 : i32
    return %arg0, %arg1, %c0_i32 : i32, i32, i32
  }
}

module attributes {stable_mosaic.version = 11 : i64} {
  func.func @_conv3x3_bias_relu_kernel(%arg0: i32, %arg1: i32, %arg2: memref<1x1x10x10x32xbf16, #tpu.memory_space<vmem>>, %arg3: memref<3x3x32x8xbf16, #tpu.memory_space<vmem>>, %arg4: memref<1x8xf32, #tpu.memory_space<vmem>>, %arg5: memref<1x8x8x8xf32, #tpu.memory_space<vmem>>) attributes {dimension_semantics = [#tpu.dimension_semantics<parallel>, #tpu.dimension_semantics<parallel>], iteration_bounds = array<i64: 2, 1>, scalar_prefetch = 0 : i64, scratch_operands = 0 : i64, tpu.core_type = #tpu.core_type<tc>, window_params = [{transform_indices = @transform_0, window_bounds = array<i64: 1, 1, 10, 10, 32>}, {pipeline_mode = #tpu.pipeline_mode<synchronous>, transform_indices = @transform_1, window_bounds = array<i64: 3, 3, 32, 8>}, {pipeline_mode = #tpu.pipeline_mode<synchronous>, transform_indices = @transform_2, window_bounds = array<i64: 1, 8>}, {transform_indices = @transform_3, window_bounds = array<i64: 1, 8, 8, 8>}]} {
    %c0 = arith.constant 0 : index
    %c0_0 = arith.constant 0 : index
    %c0_1 = arith.constant 0 : index
    %c0_2 = arith.constant 0 : index
    %c0_3 = arith.constant 0 : index
    %0 = vector.load %arg2[%c0, %c0_0, %c0_1, %c0_2, %c0_3] : memref<1x1x10x10x32xbf16, #tpu.memory_space<vmem>>, vector<1x1x10x10x32xbf16>
    %1 = vector.shape_cast %0 : vector<1x1x10x10x32xbf16> to vector<10x10x32xbf16>
    %cst = arith.constant 0.000000e+00 : f32
    %2 = vector.broadcast %cst : f32 to vector<64x8xf32>
    %3 = vector.extract_strided_slice %1 {offsets = [0, 0, 0], sizes = [8, 8, 32], strides = [1, 1, 1]} : vector<10x10x32xbf16> to vector<8x8x32xbf16>
    %4 = vector.shape_cast %3 : vector<8x8x32xbf16> to vector<64x32xbf16>
    %c0_4 = arith.constant 0 : index
    %c0_5 = arith.constant 0 : index
    %c0_6 = arith.constant 0 : index
    %c0_7 = arith.constant 0 : index
    %5 = vector.load %arg3[%c0_4, %c0_5, %c0_6, %c0_7] : memref<3x3x32x8xbf16, #tpu.memory_space<vmem>>, vector<1x1x32x8xbf16>
    %6 = vector.shape_cast %5 : vector<1x1x32x8xbf16> to vector<32x8xbf16>
    %cst_8 = arith.constant dense<0.000000e+00> : vector<64x8xf32>
    %7 = tpu.matmul %4, %6, %cst_8 {dimension_numbers = #tpu.dot_dimension_numbers<[1], [0], [0], [1], [0, 0, 1, 1], [], []>} : vector<64x32xbf16>, vector<32x8xbf16>, vector<64x8xf32> -> vector<64x8xf32>
    %8 = arith.addf %2, %7 : vector<64x8xf32>
    %9 = vector.extract_strided_slice %1 {offsets = [0, 1, 0], sizes = [8, 8, 32], strides = [1, 1, 1]} : vector<10x10x32xbf16> to vector<8x8x32xbf16>
    %10 = vector.shape_cast %9 : vector<8x8x32xbf16> to vector<64x32xbf16>
    %c0_9 = arith.constant 0 : index
    %c1 = arith.constant 1 : index
    %c0_10 = arith.constant 0 : index
    %c0_11 = arith.constant 0 : index
    %11 = vector.load %arg3[%c0_9, %c1, %c0_10, %c0_11] : memref<3x3x32x8xbf16, #tpu.memory_space<vmem>>, vector<1x1x32x8xbf16>
    %12 = vector.shape_cast %11 : vector<1x1x32x8xbf16> to vector<32x8xbf16>
    %cst_12 = arith.constant dense<0.000000e+00> : vector<64x8xf32>
    %13 = tpu.matmul %10, %12, %cst_12 {dimension_numbers = #tpu.dot_dimension_numbers<[1], [0], [0], [1], [0, 0, 1, 1], [], []>} : vector<64x32xbf16>, vector<32x8xbf16>, vector<64x8xf32> -> vector<64x8xf32>
    %14 = arith.addf %8, %13 : vector<64x8xf32>
    %15 = vector.extract_strided_slice %1 {offsets = [0, 2, 0], sizes = [8, 8, 32], strides = [1, 1, 1]} : vector<10x10x32xbf16> to vector<8x8x32xbf16>
    %16 = vector.shape_cast %15 : vector<8x8x32xbf16> to vector<64x32xbf16>
    %c0_13 = arith.constant 0 : index
    %c2 = arith.constant 2 : index
    %c0_14 = arith.constant 0 : index
    %c0_15 = arith.constant 0 : index
    %17 = vector.load %arg3[%c0_13, %c2, %c0_14, %c0_15] : memref<3x3x32x8xbf16, #tpu.memory_space<vmem>>, vector<1x1x32x8xbf16>
    %18 = vector.shape_cast %17 : vector<1x1x32x8xbf16> to vector<32x8xbf16>
    %cst_16 = arith.constant dense<0.000000e+00> : vector<64x8xf32>
    %19 = tpu.matmul %16, %18, %cst_16 {dimension_numbers = #tpu.dot_dimension_numbers<[1], [0], [0], [1], [0, 0, 1, 1], [], []>} : vector<64x32xbf16>, vector<32x8xbf16>, vector<64x8xf32> -> vector<64x8xf32>
    %20 = arith.addf %14, %19 : vector<64x8xf32>
    %21 = vector.extract_strided_slice %1 {offsets = [1, 0, 0], sizes = [8, 8, 32], strides = [1, 1, 1]} : vector<10x10x32xbf16> to vector<8x8x32xbf16>
    %22 = vector.shape_cast %21 : vector<8x8x32xbf16> to vector<64x32xbf16>
    %c1_17 = arith.constant 1 : index
    %c0_18 = arith.constant 0 : index
    %c0_19 = arith.constant 0 : index
    %c0_20 = arith.constant 0 : index
    %23 = vector.load %arg3[%c1_17, %c0_18, %c0_19, %c0_20] : memref<3x3x32x8xbf16, #tpu.memory_space<vmem>>, vector<1x1x32x8xbf16>
    %24 = vector.shape_cast %23 : vector<1x1x32x8xbf16> to vector<32x8xbf16>
    %cst_21 = arith.constant dense<0.000000e+00> : vector<64x8xf32>
    %25 = tpu.matmul %22, %24, %cst_21 {dimension_numbers = #tpu.dot_dimension_numbers<[1], [0], [0], [1], [0, 0, 1, 1], [], []>} : vector<64x32xbf16>, vector<32x8xbf16>, vector<64x8xf32> -> vector<64x8xf32>
    %26 = arith.addf %20, %25 : vector<64x8xf32>
    %27 = vector.extract_strided_slice %1 {offsets = [1, 1, 0], sizes = [8, 8, 32], strides = [1, 1, 1]} : vector<10x10x32xbf16> to vector<8x8x32xbf16>
    %28 = vector.shape_cast %27 : vector<8x8x32xbf16> to vector<64x32xbf16>
    %c1_22 = arith.constant 1 : index
    %c1_23 = arith.constant 1 : index
    %c0_24 = arith.constant 0 : index
    %c0_25 = arith.constant 0 : index
    %29 = vector.load %arg3[%c1_22, %c1_23, %c0_24, %c0_25] : memref<3x3x32x8xbf16, #tpu.memory_space<vmem>>, vector<1x1x32x8xbf16>
    %30 = vector.shape_cast %29 : vector<1x1x32x8xbf16> to vector<32x8xbf16>
    %cst_26 = arith.constant dense<0.000000e+00> : vector<64x8xf32>
    %31 = tpu.matmul %28, %30, %cst_26 {dimension_numbers = #tpu.dot_dimension_numbers<[1], [0], [0], [1], [0, 0, 1, 1], [], []>} : vector<64x32xbf16>, vector<32x8xbf16>, vector<64x8xf32> -> vector<64x8xf32>
    %32 = arith.addf %26, %31 : vector<64x8xf32>
    %33 = vector.extract_strided_slice %1 {offsets = [1, 2, 0], sizes = [8, 8, 32], strides = [1, 1, 1]} : vector<10x10x32xbf16> to vector<8x8x32xbf16>
    %34 = vector.shape_cast %33 : vector<8x8x32xbf16> to vector<64x32xbf16>
    %c1_27 = arith.constant 1 : index
    %c2_28 = arith.constant 2 : index
    %c0_29 = arith.constant 0 : index
    %c0_30 = arith.constant 0 : index
    %35 = vector.load %arg3[%c1_27, %c2_28, %c0_29, %c0_30] : memref<3x3x32x8xbf16, #tpu.memory_space<vmem>>, vector<1x1x32x8xbf16>
    %36 = vector.shape_cast %35 : vector<1x1x32x8xbf16> to vector<32x8xbf16>
    %cst_31 = arith.constant dense<0.000000e+00> : vector<64x8xf32>
    %37 = tpu.matmul %34, %36, %cst_31 {dimension_numbers = #tpu.dot_dimension_numbers<[1], [0], [0], [1], [0, 0, 1, 1], [], []>} : vector<64x32xbf16>, vector<32x8xbf16>, vector<64x8xf32> -> vector<64x8xf32>
    %38 = arith.addf %32, %37 : vector<64x8xf32>
    %39 = vector.extract_strided_slice %1 {offsets = [2, 0, 0], sizes = [8, 8, 32], strides = [1, 1, 1]} : vector<10x10x32xbf16> to vector<8x8x32xbf16>
    %40 = vector.shape_cast %39 : vector<8x8x32xbf16> to vector<64x32xbf16>
    %c2_32 = arith.constant 2 : index
    %c0_33 = arith.constant 0 : index
    %c0_34 = arith.constant 0 : index
    %c0_35 = arith.constant 0 : index
    %41 = vector.load %arg3[%c2_32, %c0_33, %c0_34, %c0_35] : memref<3x3x32x8xbf16, #tpu.memory_space<vmem>>, vector<1x1x32x8xbf16>
    %42 = vector.shape_cast %41 : vector<1x1x32x8xbf16> to vector<32x8xbf16>
    %cst_36 = arith.constant dense<0.000000e+00> : vector<64x8xf32>
    %43 = tpu.matmul %40, %42, %cst_36 {dimension_numbers = #tpu.dot_dimension_numbers<[1], [0], [0], [1], [0, 0, 1, 1], [], []>} : vector<64x32xbf16>, vector<32x8xbf16>, vector<64x8xf32> -> vector<64x8xf32>
    %44 = arith.addf %38, %43 : vector<64x8xf32>
    %45 = vector.extract_strided_slice %1 {offsets = [2, 1, 0], sizes = [8, 8, 32], strides = [1, 1, 1]} : vector<10x10x32xbf16> to vector<8x8x32xbf16>
    %46 = vector.shape_cast %45 : vector<8x8x32xbf16> to vector<64x32xbf16>
    %c2_37 = arith.constant 2 : index
    %c1_38 = arith.constant 1 : index
    %c0_39 = arith.constant 0 : index
    %c0_40 = arith.constant 0 : index
    %47 = vector.load %arg3[%c2_37, %c1_38, %c0_39, %c0_40] : memref<3x3x32x8xbf16, #tpu.memory_space<vmem>>, vector<1x1x32x8xbf16>
    %48 = vector.shape_cast %47 : vector<1x1x32x8xbf16> to vector<32x8xbf16>
    %cst_41 = arith.constant dense<0.000000e+00> : vector<64x8xf32>
    %49 = tpu.matmul %46, %48, %cst_41 {dimension_numbers = #tpu.dot_dimension_numbers<[1], [0], [0], [1], [0, 0, 1, 1], [], []>} : vector<64x32xbf16>, vector<32x8xbf16>, vector<64x8xf32> -> vector<64x8xf32>
    %50 = arith.addf %44, %49 : vector<64x8xf32>
    %51 = vector.extract_strided_slice %1 {offsets = [2, 2, 0], sizes = [8, 8, 32], strides = [1, 1, 1]} : vector<10x10x32xbf16> to vector<8x8x32xbf16>
    %52 = vector.shape_cast %51 : vector<8x8x32xbf16> to vector<64x32xbf16>
    %c2_42 = arith.constant 2 : index
    %c2_43 = arith.constant 2 : index
    %c0_44 = arith.constant 0 : index
    %c0_45 = arith.constant 0 : index
    %53 = vector.load %arg3[%c2_42, %c2_43, %c0_44, %c0_45] : memref<3x3x32x8xbf16, #tpu.memory_space<vmem>>, vector<1x1x32x8xbf16>
    %54 = vector.shape_cast %53 : vector<1x1x32x8xbf16> to vector<32x8xbf16>
    %cst_46 = arith.constant dense<0.000000e+00> : vector<64x8xf32>
    %55 = tpu.matmul %52, %54, %cst_46 {dimension_numbers = #tpu.dot_dimension_numbers<[1], [0], [0], [1], [0, 0, 1, 1], [], []>} : vector<64x32xbf16>, vector<32x8xbf16>, vector<64x8xf32> -> vector<64x8xf32>
    %56 = arith.addf %50, %55 : vector<64x8xf32>
    %c0_47 = arith.constant 0 : index
    %c0_48 = arith.constant 0 : index
    %57 = vector.load %arg4[%c0_47, %c0_48] : memref<1x8xf32, #tpu.memory_space<vmem>>, vector<1x8xf32>
    %58 = vector.broadcast %57 : vector<1x8xf32> to vector<64x8xf32>
    %59 = arith.addf %56, %58 : vector<64x8xf32>
    %cst_49 = arith.constant 0.000000e+00 : f32
    %60 = vector.broadcast %cst_49 : f32 to vector<64x8xf32>
    %61 = arith.maximumf %59, %60 : vector<64x8xf32>
    %62 = vector.shape_cast %61 : vector<64x8xf32> to vector<8x8x8xf32>
    %c0_50 = arith.constant 0 : index
    %c0_51 = arith.constant 0 : index
    %c0_52 = arith.constant 0 : index
    %c0_53 = arith.constant 0 : index
    %63 = vector.load %arg5[%c0_50, %c0_51, %c0_52, %c0_53] : memref<1x8x8x8xf32, #tpu.memory_space<vmem>>, vector<1x8x8x8xf32>
    %64 = vector.shape_cast %63 : vector<1x8x8x8xf32> to vector<8x8x8xf32>
    %65 = vector.shape_cast %62 : vector<8x8x8xf32> to vector<1x8x8x8xf32>
    tpu.vector_store %arg5[%c0_50, %c0_51, %c0_52, %c0_53], %65 {strides = array<i32>} : memref<1x8x8x8xf32, #tpu.memory_space<vmem>>, vector<1x8x8x8xf32>,
    return
  }
  func.func @transform_0(%arg0: i32, %arg1: i32) -> (i32, i32, i32, i32, i32) {
    %c0_i32 = arith.constant 0 : i32
    %c0_i32_0 = arith.constant 0 : i32
    %c0_i32_1 = arith.constant 0 : i32
    %c0_i32_2 = arith.constant 0 : i32
    return %arg0, %arg1, %c0_i32, %c0_i32_0, %c0_i32_1 : i32, i32, i32, i32, i32
  }
  func.func @transform_1(%arg0: i32, %arg1: i32) -> (i32, i32, i32, i32) {
    %c0_i32 = arith.constant 0 : i32
    %c0_i32_0 = arith.constant 0 : i32
    %c0_i32_1 = arith.constant 0 : i32
    %c0_i32_2 = arith.constant 0 : i32
    %c0_i32_3 = arith.constant 0 : i32
    return %c0_i32, %c0_i32_0, %c0_i32_1, %c0_i32_2 : i32, i32, i32, i32
  }
  func.func @transform_2(%arg0: i32, %arg1: i32) -> (i32, i32) {
    %c0_i32 = arith.constant 0 : i32
    %c0_i32_0 = arith.constant 0 : i32
    %c0_i32_1 = arith.constant 0 : i32
    return %c0_i32, %c0_i32_0 : i32, i32
  }
  func.func @transform_3(%arg0: i32, %arg1: i32) -> (i32, i32, i32, i32) {
    %c0_i32 = arith.constant 0 : i32
    %c0_i32_0 = arith.constant 0 : i32
    %c0_i32_1 = arith.constant 0 : i32
    return %arg0, %arg1, %c0_i32, %c0_i32_0 : i32, i32, i32, i32
  }
}

module attributes {stable_mosaic.version = 11 : i64} {
  func.func @_conv3x3_bias_relu_kernel(%arg0: i32, %arg1: i32, %arg2: memref<1x1x6x6x32xbf16, #tpu.memory_space<vmem>>, %arg3: memref<3x3x32x8xbf16, #tpu.memory_space<vmem>>, %arg4: memref<1x8xf32, #tpu.memory_space<vmem>>, %arg5: memref<1x4x4x8xf32, #tpu.memory_space<vmem>>) attributes {dimension_semantics = [#tpu.dimension_semantics<parallel>, #tpu.dimension_semantics<parallel>], iteration_bounds = array<i64: 2, 1>, scalar_prefetch = 0 : i64, scratch_operands = 0 : i64, tpu.core_type = #tpu.core_type<tc>, window_params = [{transform_indices = @transform_0, window_bounds = array<i64: 1, 1, 6, 6, 32>}, {pipeline_mode = #tpu.pipeline_mode<synchronous>, transform_indices = @transform_1, window_bounds = array<i64: 3, 3, 32, 8>}, {pipeline_mode = #tpu.pipeline_mode<synchronous>, transform_indices = @transform_2, window_bounds = array<i64: 1, 8>}, {transform_indices = @transform_3, window_bounds = array<i64: 1, 4, 4, 8>}]} {
    %c0 = arith.constant 0 : index
    %c0_0 = arith.constant 0 : index
    %c0_1 = arith.constant 0 : index
    %c0_2 = arith.constant 0 : index
    %c0_3 = arith.constant 0 : index
    %0 = vector.load %arg2[%c0, %c0_0, %c0_1, %c0_2, %c0_3] : memref<1x1x6x6x32xbf16, #tpu.memory_space<vmem>>, vector<1x1x6x6x32xbf16>
    %1 = vector.shape_cast %0 : vector<1x1x6x6x32xbf16> to vector<6x6x32xbf16>
    %cst = arith.constant 0.000000e+00 : f32
    %2 = vector.broadcast %cst : f32 to vector<16x8xf32>
    %3 = vector.extract_strided_slice %1 {offsets = [0, 0, 0], sizes = [4, 4, 32], strides = [1, 1, 1]} : vector<6x6x32xbf16> to vector<4x4x32xbf16>
    %4 = vector.shape_cast %3 : vector<4x4x32xbf16> to vector<16x32xbf16>
    %c0_4 = arith.constant 0 : index
    %c0_5 = arith.constant 0 : index
    %c0_6 = arith.constant 0 : index
    %c0_7 = arith.constant 0 : index
    %5 = vector.load %arg3[%c0_4, %c0_5, %c0_6, %c0_7] : memref<3x3x32x8xbf16, #tpu.memory_space<vmem>>, vector<1x1x32x8xbf16>
    %6 = vector.shape_cast %5 : vector<1x1x32x8xbf16> to vector<32x8xbf16>
    %cst_8 = arith.constant dense<0.000000e+00> : vector<16x8xf32>
    %7 = tpu.matmul %4, %6, %cst_8 {dimension_numbers = #tpu.dot_dimension_numbers<[1], [0], [0], [1], [0, 0, 1, 1], [], []>} : vector<16x32xbf16>, vector<32x8xbf16>, vector<16x8xf32> -> vector<16x8xf32>
    %8 = arith.addf %2, %7 : vector<16x8xf32>
    %9 = vector.extract_strided_slice %1 {offsets = [0, 1, 0], sizes = [4, 4, 32], strides = [1, 1, 1]} : vector<6x6x32xbf16> to vector<4x4x32xbf16>
    %10 = vector.shape_cast %9 : vector<4x4x32xbf16> to vector<16x32xbf16>
    %c0_9 = arith.constant 0 : index
    %c1 = arith.constant 1 : index
    %c0_10 = arith.constant 0 : index
    %c0_11 = arith.constant 0 : index
    %11 = vector.load %arg3[%c0_9, %c1, %c0_10, %c0_11] : memref<3x3x32x8xbf16, #tpu.memory_space<vmem>>, vector<1x1x32x8xbf16>
    %12 = vector.shape_cast %11 : vector<1x1x32x8xbf16> to vector<32x8xbf16>
    %cst_12 = arith.constant dense<0.000000e+00> : vector<16x8xf32>
    %13 = tpu.matmul %10, %12, %cst_12 {dimension_numbers = #tpu.dot_dimension_numbers<[1], [0], [0], [1], [0, 0, 1, 1], [], []>} : vector<16x32xbf16>, vector<32x8xbf16>, vector<16x8xf32> -> vector<16x8xf32>
    %14 = arith.addf %8, %13 : vector<16x8xf32>
    %15 = vector.extract_strided_slice %1 {offsets = [0, 2, 0], sizes = [4, 4, 32], strides = [1, 1, 1]} : vector<6x6x32xbf16> to vector<4x4x32xbf16>
    %16 = vector.shape_cast %15 : vector<4x4x32xbf16> to vector<16x32xbf16>
    %c0_13 = arith.constant 0 : index
    %c2 = arith.constant 2 : index
    %c0_14 = arith.constant 0 : index
    %c0_15 = arith.constant 0 : index
    %17 = vector.load %arg3[%c0_13, %c2, %c0_14, %c0_15] : memref<3x3x32x8xbf16, #tpu.memory_space<vmem>>, vector<1x1x32x8xbf16>
    %18 = vector.shape_cast %17 : vector<1x1x32x8xbf16> to vector<32x8xbf16>
    %cst_16 = arith.constant dense<0.000000e+00> : vector<16x8xf32>
    %19 = tpu.matmul %16, %18, %cst_16 {dimension_numbers = #tpu.dot_dimension_numbers<[1], [0], [0], [1], [0, 0, 1, 1], [], []>} : vector<16x32xbf16>, vector<32x8xbf16>, vector<16x8xf32> -> vector<16x8xf32>
    %20 = arith.addf %14, %19 : vector<16x8xf32>
    %21 = vector.extract_strided_slice %1 {offsets = [1, 0, 0], sizes = [4, 4, 32], strides = [1, 1, 1]} : vector<6x6x32xbf16> to vector<4x4x32xbf16>
    %22 = vector.shape_cast %21 : vector<4x4x32xbf16> to vector<16x32xbf16>
    %c1_17 = arith.constant 1 : index
    %c0_18 = arith.constant 0 : index
    %c0_19 = arith.constant 0 : index
    %c0_20 = arith.constant 0 : index
    %23 = vector.load %arg3[%c1_17, %c0_18, %c0_19, %c0_20] : memref<3x3x32x8xbf16, #tpu.memory_space<vmem>>, vector<1x1x32x8xbf16>
    %24 = vector.shape_cast %23 : vector<1x1x32x8xbf16> to vector<32x8xbf16>
    %cst_21 = arith.constant dense<0.000000e+00> : vector<16x8xf32>
    %25 = tpu.matmul %22, %24, %cst_21 {dimension_numbers = #tpu.dot_dimension_numbers<[1], [0], [0], [1], [0, 0, 1, 1], [], []>} : vector<16x32xbf16>, vector<32x8xbf16>, vector<16x8xf32> -> vector<16x8xf32>
    %26 = arith.addf %20, %25 : vector<16x8xf32>
    %27 = vector.extract_strided_slice %1 {offsets = [1, 1, 0], sizes = [4, 4, 32], strides = [1, 1, 1]} : vector<6x6x32xbf16> to vector<4x4x32xbf16>
    %28 = vector.shape_cast %27 : vector<4x4x32xbf16> to vector<16x32xbf16>
    %c1_22 = arith.constant 1 : index
    %c1_23 = arith.constant 1 : index
    %c0_24 = arith.constant 0 : index
    %c0_25 = arith.constant 0 : index
    %29 = vector.load %arg3[%c1_22, %c1_23, %c0_24, %c0_25] : memref<3x3x32x8xbf16, #tpu.memory_space<vmem>>, vector<1x1x32x8xbf16>
    %30 = vector.shape_cast %29 : vector<1x1x32x8xbf16> to vector<32x8xbf16>
    %cst_26 = arith.constant dense<0.000000e+00> : vector<16x8xf32>
    %31 = tpu.matmul %28, %30, %cst_26 {dimension_numbers = #tpu.dot_dimension_numbers<[1], [0], [0], [1], [0, 0, 1, 1], [], []>} : vector<16x32xbf16>, vector<32x8xbf16>, vector<16x8xf32> -> vector<16x8xf32>
    %32 = arith.addf %26, %31 : vector<16x8xf32>
    %33 = vector.extract_strided_slice %1 {offsets = [1, 2, 0], sizes = [4, 4, 32], strides = [1, 1, 1]} : vector<6x6x32xbf16> to vector<4x4x32xbf16>
    %34 = vector.shape_cast %33 : vector<4x4x32xbf16> to vector<16x32xbf16>
    %c1_27 = arith.constant 1 : index
    %c2_28 = arith.constant 2 : index
    %c0_29 = arith.constant 0 : index
    %c0_30 = arith.constant 0 : index
    %35 = vector.load %arg3[%c1_27, %c2_28, %c0_29, %c0_30] : memref<3x3x32x8xbf16, #tpu.memory_space<vmem>>, vector<1x1x32x8xbf16>
    %36 = vector.shape_cast %35 : vector<1x1x32x8xbf16> to vector<32x8xbf16>
    %cst_31 = arith.constant dense<0.000000e+00> : vector<16x8xf32>
    %37 = tpu.matmul %34, %36, %cst_31 {dimension_numbers = #tpu.dot_dimension_numbers<[1], [0], [0], [1], [0, 0, 1, 1], [], []>} : vector<16x32xbf16>, vector<32x8xbf16>, vector<16x8xf32> -> vector<16x8xf32>
    %38 = arith.addf %32, %37 : vector<16x8xf32>
    %39 = vector.extract_strided_slice %1 {offsets = [2, 0, 0], sizes = [4, 4, 32], strides = [1, 1, 1]} : vector<6x6x32xbf16> to vector<4x4x32xbf16>
    %40 = vector.shape_cast %39 : vector<4x4x32xbf16> to vector<16x32xbf16>
    %c2_32 = arith.constant 2 : index
    %c0_33 = arith.constant 0 : index
    %c0_34 = arith.constant 0 : index
    %c0_35 = arith.constant 0 : index
    %41 = vector.load %arg3[%c2_32, %c0_33, %c0_34, %c0_35] : memref<3x3x32x8xbf16, #tpu.memory_space<vmem>>, vector<1x1x32x8xbf16>
    %42 = vector.shape_cast %41 : vector<1x1x32x8xbf16> to vector<32x8xbf16>
    %cst_36 = arith.constant dense<0.000000e+00> : vector<16x8xf32>
    %43 = tpu.matmul %40, %42, %cst_36 {dimension_numbers = #tpu.dot_dimension_numbers<[1], [0], [0], [1], [0, 0, 1, 1], [], []>} : vector<16x32xbf16>, vector<32x8xbf16>, vector<16x8xf32> -> vector<16x8xf32>
    %44 = arith.addf %38, %43 : vector<16x8xf32>
    %45 = vector.extract_strided_slice %1 {offsets = [2, 1, 0], sizes = [4, 4, 32], strides = [1, 1, 1]} : vector<6x6x32xbf16> to vector<4x4x32xbf16>
    %46 = vector.shape_cast %45 : vector<4x4x32xbf16> to vector<16x32xbf16>
    %c2_37 = arith.constant 2 : index
    %c1_38 = arith.constant 1 : index
    %c0_39 = arith.constant 0 : index
    %c0_40 = arith.constant 0 : index
    %47 = vector.load %arg3[%c2_37, %c1_38, %c0_39, %c0_40] : memref<3x3x32x8xbf16, #tpu.memory_space<vmem>>, vector<1x1x32x8xbf16>
    %48 = vector.shape_cast %47 : vector<1x1x32x8xbf16> to vector<32x8xbf16>
    %cst_41 = arith.constant dense<0.000000e+00> : vector<16x8xf32>
    %49 = tpu.matmul %46, %48, %cst_41 {dimension_numbers = #tpu.dot_dimension_numbers<[1], [0], [0], [1], [0, 0, 1, 1], [], []>} : vector<16x32xbf16>, vector<32x8xbf16>, vector<16x8xf32> -> vector<16x8xf32>
    %50 = arith.addf %44, %49 : vector<16x8xf32>
    %51 = vector.extract_strided_slice %1 {offsets = [2, 2, 0], sizes = [4, 4, 32], strides = [1, 1, 1]} : vector<6x6x32xbf16> to vector<4x4x32xbf16>
    %52 = vector.shape_cast %51 : vector<4x4x32xbf16> to vector<16x32xbf16>
    %c2_42 = arith.constant 2 : index
    %c2_43 = arith.constant 2 : index
    %c0_44 = arith.constant 0 : index
    %c0_45 = arith.constant 0 : index
    %53 = vector.load %arg3[%c2_42, %c2_43, %c0_44, %c0_45] : memref<3x3x32x8xbf16, #tpu.memory_space<vmem>>, vector<1x1x32x8xbf16>
    %54 = vector.shape_cast %53 : vector<1x1x32x8xbf16> to vector<32x8xbf16>
    %cst_46 = arith.constant dense<0.000000e+00> : vector<16x8xf32>
    %55 = tpu.matmul %52, %54, %cst_46 {dimension_numbers = #tpu.dot_dimension_numbers<[1], [0], [0], [1], [0, 0, 1, 1], [], []>} : vector<16x32xbf16>, vector<32x8xbf16>, vector<16x8xf32> -> vector<16x8xf32>
    %56 = arith.addf %50, %55 : vector<16x8xf32>
    %c0_47 = arith.constant 0 : index
    %c0_48 = arith.constant 0 : index
    %57 = vector.load %arg4[%c0_47, %c0_48] : memref<1x8xf32, #tpu.memory_space<vmem>>, vector<1x8xf32>
    %58 = vector.broadcast %57 : vector<1x8xf32> to vector<16x8xf32>
    %59 = arith.addf %56, %58 : vector<16x8xf32>
    %cst_49 = arith.constant 0.000000e+00 : f32
    %60 = vector.broadcast %cst_49 : f32 to vector<16x8xf32>
    %61 = arith.maximumf %59, %60 : vector<16x8xf32>
    %62 = vector.shape_cast %61 : vector<16x8xf32> to vector<4x4x8xf32>
    %c0_50 = arith.constant 0 : index
    %c0_51 = arith.constant 0 : index
    %c0_52 = arith.constant 0 : index
    %c0_53 = arith.constant 0 : index
    %63 = vector.load %arg5[%c0_50, %c0_51, %c0_52, %c0_53] : memref<1x4x4x8xf32, #tpu.memory_space<vmem>>, vector<1x4x4x8xf32>
    %64 = vector.shape_cast %63 : vector<1x4x4x8xf32> to vector<4x4x8xf32>
    %65 = vector.shape_cast %62 : vector<4x4x8xf32> to vector<1x4x4x8xf32>
    tpu.vector_store %arg5[%c0_50, %c0_51, %c0_52, %c0_53], %65 {strides = array<i32>} : memref<1x4x4x8xf32, #tpu.memory_space<vmem>>, vector<1x4x4x8xf32>,
    return
  }
  func.func @transform_0(%arg0: i32, %arg1: i32) -> (i32, i32, i32, i32, i32) {
    %c0_i32 = arith.constant 0 : i32
    %c0_i32_0 = arith.constant 0 : i32
    %c0_i32_1 = arith.constant 0 : i32
    %c0_i32_2 = arith.constant 0 : i32
    return %arg0, %arg1, %c0_i32, %c0_i32_0, %c0_i32_1 : i32, i32, i32, i32, i32
  }
  func.func @transform_1(%arg0: i32, %arg1: i32) -> (i32, i32, i32, i32) {
    %c0_i32 = arith.constant 0 : i32
    %c0_i32_0 = arith.constant 0 : i32
    %c0_i32_1 = arith.constant 0 : i32
    %c0_i32_2 = arith.constant 0 : i32
    %c0_i32_3 = arith.constant 0 : i32
    return %c0_i32, %c0_i32_0, %c0_i32_1, %c0_i32_2 : i32, i32, i32, i32
  }
  func.func @transform_2(%arg0: i32, %arg1: i32) -> (i32, i32) {
    %c0_i32 = arith.constant 0 : i32
    %c0_i32_0 = arith.constant 0 : i32
    %c0_i32_1 = arith.constant 0 : i32
    return %c0_i32, %c0_i32_0 : i32, i32
  }
  func.func @transform_3(%arg0: i32, %arg1: i32) -> (i32, i32, i32, i32) {
    %c0_i32 = arith.constant 0 : i32
    %c0_i32_0 = arith.constant 0 : i32
    %c0_i32_1 = arith.constant 0 : i32
    return %arg0, %arg1, %c0_i32, %c0_i32_0 : i32, i32, i32, i32
  }
}

module attributes {stable_mosaic.version = 11 : i64} {
  func.func @_conv3x3_bias_relu_kernel(%arg0: i32, %arg1: i32, %arg2: memref<1x1x4x4x32xbf16, #tpu.memory_space<vmem>>, %arg3: memref<3x3x32x8xbf16, #tpu.memory_space<vmem>>, %arg4: memref<1x8xf32, #tpu.memory_space<vmem>>, %arg5: memref<1x2x2x8xf32, #tpu.memory_space<vmem>>) attributes {dimension_semantics = [#tpu.dimension_semantics<parallel>, #tpu.dimension_semantics<parallel>], iteration_bounds = array<i64: 2, 1>, scalar_prefetch = 0 : i64, scratch_operands = 0 : i64, tpu.core_type = #tpu.core_type<tc>, window_params = [{transform_indices = @transform_0, window_bounds = array<i64: 1, 1, 4, 4, 32>}, {pipeline_mode = #tpu.pipeline_mode<synchronous>, transform_indices = @transform_1, window_bounds = array<i64: 3, 3, 32, 8>}, {pipeline_mode = #tpu.pipeline_mode<synchronous>, transform_indices = @transform_2, window_bounds = array<i64: 1, 8>}, {transform_indices = @transform_3, window_bounds = array<i64: 1, 2, 2, 8>}]} {
    %c0 = arith.constant 0 : index
    %c0_0 = arith.constant 0 : index
    %c0_1 = arith.constant 0 : index
    %c0_2 = arith.constant 0 : index
    %c0_3 = arith.constant 0 : index
    %0 = vector.load %arg2[%c0, %c0_0, %c0_1, %c0_2, %c0_3] : memref<1x1x4x4x32xbf16, #tpu.memory_space<vmem>>, vector<1x1x4x4x32xbf16>
    %1 = vector.shape_cast %0 : vector<1x1x4x4x32xbf16> to vector<4x4x32xbf16>
    %cst = arith.constant 0.000000e+00 : f32
    %2 = vector.broadcast %cst : f32 to vector<4x8xf32>
    %3 = vector.extract_strided_slice %1 {offsets = [0, 0, 0], sizes = [2, 2, 32], strides = [1, 1, 1]} : vector<4x4x32xbf16> to vector<2x2x32xbf16>
    %4 = vector.shape_cast %3 : vector<2x2x32xbf16> to vector<4x32xbf16>
    %c0_4 = arith.constant 0 : index
    %c0_5 = arith.constant 0 : index
    %c0_6 = arith.constant 0 : index
    %c0_7 = arith.constant 0 : index
    %5 = vector.load %arg3[%c0_4, %c0_5, %c0_6, %c0_7] : memref<3x3x32x8xbf16, #tpu.memory_space<vmem>>, vector<1x1x32x8xbf16>
    %6 = vector.shape_cast %5 : vector<1x1x32x8xbf16> to vector<32x8xbf16>
    %cst_8 = arith.constant dense<0.000000e+00> : vector<4x8xf32>
    %7 = tpu.matmul %4, %6, %cst_8 {dimension_numbers = #tpu.dot_dimension_numbers<[1], [0], [0], [1], [0, 0, 1, 1], [], []>} : vector<4x32xbf16>, vector<32x8xbf16>, vector<4x8xf32> -> vector<4x8xf32>
    %8 = arith.addf %2, %7 : vector<4x8xf32>
    %9 = vector.extract_strided_slice %1 {offsets = [0, 1, 0], sizes = [2, 2, 32], strides = [1, 1, 1]} : vector<4x4x32xbf16> to vector<2x2x32xbf16>
    %10 = vector.shape_cast %9 : vector<2x2x32xbf16> to vector<4x32xbf16>
    %c0_9 = arith.constant 0 : index
    %c1 = arith.constant 1 : index
    %c0_10 = arith.constant 0 : index
    %c0_11 = arith.constant 0 : index
    %11 = vector.load %arg3[%c0_9, %c1, %c0_10, %c0_11] : memref<3x3x32x8xbf16, #tpu.memory_space<vmem>>, vector<1x1x32x8xbf16>
    %12 = vector.shape_cast %11 : vector<1x1x32x8xbf16> to vector<32x8xbf16>
    %cst_12 = arith.constant dense<0.000000e+00> : vector<4x8xf32>
    %13 = tpu.matmul %10, %12, %cst_12 {dimension_numbers = #tpu.dot_dimension_numbers<[1], [0], [0], [1], [0, 0, 1, 1], [], []>} : vector<4x32xbf16>, vector<32x8xbf16>, vector<4x8xf32> -> vector<4x8xf32>
    %14 = arith.addf %8, %13 : vector<4x8xf32>
    %15 = vector.extract_strided_slice %1 {offsets = [0, 2, 0], sizes = [2, 2, 32], strides = [1, 1, 1]} : vector<4x4x32xbf16> to vector<2x2x32xbf16>
    %16 = vector.shape_cast %15 : vector<2x2x32xbf16> to vector<4x32xbf16>
    %c0_13 = arith.constant 0 : index
    %c2 = arith.constant 2 : index
    %c0_14 = arith.constant 0 : index
    %c0_15 = arith.constant 0 : index
    %17 = vector.load %arg3[%c0_13, %c2, %c0_14, %c0_15] : memref<3x3x32x8xbf16, #tpu.memory_space<vmem>>, vector<1x1x32x8xbf16>
    %18 = vector.shape_cast %17 : vector<1x1x32x8xbf16> to vector<32x8xbf16>
    %cst_16 = arith.constant dense<0.000000e+00> : vector<4x8xf32>
    %19 = tpu.matmul %16, %18, %cst_16 {dimension_numbers = #tpu.dot_dimension_numbers<[1], [0], [0], [1], [0, 0, 1, 1], [], []>} : vector<4x32xbf16>, vector<32x8xbf16>, vector<4x8xf32> -> vector<4x8xf32>
    %20 = arith.addf %14, %19 : vector<4x8xf32>
    %21 = vector.extract_strided_slice %1 {offsets = [1, 0, 0], sizes = [2, 2, 32], strides = [1, 1, 1]} : vector<4x4x32xbf16> to vector<2x2x32xbf16>
    %22 = vector.shape_cast %21 : vector<2x2x32xbf16> to vector<4x32xbf16>
    %c1_17 = arith.constant 1 : index
    %c0_18 = arith.constant 0 : index
    %c0_19 = arith.constant 0 : index
    %c0_20 = arith.constant 0 : index
    %23 = vector.load %arg3[%c1_17, %c0_18, %c0_19, %c0_20] : memref<3x3x32x8xbf16, #tpu.memory_space<vmem>>, vector<1x1x32x8xbf16>
    %24 = vector.shape_cast %23 : vector<1x1x32x8xbf16> to vector<32x8xbf16>
    %cst_21 = arith.constant dense<0.000000e+00> : vector<4x8xf32>
    %25 = tpu.matmul %22, %24, %cst_21 {dimension_numbers = #tpu.dot_dimension_numbers<[1], [0], [0], [1], [0, 0, 1, 1], [], []>} : vector<4x32xbf16>, vector<32x8xbf16>, vector<4x8xf32> -> vector<4x8xf32>
    %26 = arith.addf %20, %25 : vector<4x8xf32>
    %27 = vector.extract_strided_slice %1 {offsets = [1, 1, 0], sizes = [2, 2, 32], strides = [1, 1, 1]} : vector<4x4x32xbf16> to vector<2x2x32xbf16>
    %28 = vector.shape_cast %27 : vector<2x2x32xbf16> to vector<4x32xbf16>
    %c1_22 = arith.constant 1 : index
    %c1_23 = arith.constant 1 : index
    %c0_24 = arith.constant 0 : index
    %c0_25 = arith.constant 0 : index
    %29 = vector.load %arg3[%c1_22, %c1_23, %c0_24, %c0_25] : memref<3x3x32x8xbf16, #tpu.memory_space<vmem>>, vector<1x1x32x8xbf16>
    %30 = vector.shape_cast %29 : vector<1x1x32x8xbf16> to vector<32x8xbf16>
    %cst_26 = arith.constant dense<0.000000e+00> : vector<4x8xf32>
    %31 = tpu.matmul %28, %30, %cst_26 {dimension_numbers = #tpu.dot_dimension_numbers<[1], [0], [0], [1], [0, 0, 1, 1], [], []>} : vector<4x32xbf16>, vector<32x8xbf16>, vector<4x8xf32> -> vector<4x8xf32>
    %32 = arith.addf %26, %31 : vector<4x8xf32>
    %33 = vector.extract_strided_slice %1 {offsets = [1, 2, 0], sizes = [2, 2, 32], strides = [1, 1, 1]} : vector<4x4x32xbf16> to vector<2x2x32xbf16>
    %34 = vector.shape_cast %33 : vector<2x2x32xbf16> to vector<4x32xbf16>
    %c1_27 = arith.constant 1 : index
    %c2_28 = arith.constant 2 : index
    %c0_29 = arith.constant 0 : index
    %c0_30 = arith.constant 0 : index
    %35 = vector.load %arg3[%c1_27, %c2_28, %c0_29, %c0_30] : memref<3x3x32x8xbf16, #tpu.memory_space<vmem>>, vector<1x1x32x8xbf16>
    %36 = vector.shape_cast %35 : vector<1x1x32x8xbf16> to vector<32x8xbf16>
    %cst_31 = arith.constant dense<0.000000e+00> : vector<4x8xf32>
    %37 = tpu.matmul %34, %36, %cst_31 {dimension_numbers = #tpu.dot_dimension_numbers<[1], [0], [0], [1], [0, 0, 1, 1], [], []>} : vector<4x32xbf16>, vector<32x8xbf16>, vector<4x8xf32> -> vector<4x8xf32>
    %38 = arith.addf %32, %37 : vector<4x8xf32>
    %39 = vector.extract_strided_slice %1 {offsets = [2, 0, 0], sizes = [2, 2, 32], strides = [1, 1, 1]} : vector<4x4x32xbf16> to vector<2x2x32xbf16>
    %40 = vector.shape_cast %39 : vector<2x2x32xbf16> to vector<4x32xbf16>
    %c2_32 = arith.constant 2 : index
    %c0_33 = arith.constant 0 : index
    %c0_34 = arith.constant 0 : index
    %c0_35 = arith.constant 0 : index
    %41 = vector.load %arg3[%c2_32, %c0_33, %c0_34, %c0_35] : memref<3x3x32x8xbf16, #tpu.memory_space<vmem>>, vector<1x1x32x8xbf16>
    %42 = vector.shape_cast %41 : vector<1x1x32x8xbf16> to vector<32x8xbf16>
    %cst_36 = arith.constant dense<0.000000e+00> : vector<4x8xf32>
    %43 = tpu.matmul %40, %42, %cst_36 {dimension_numbers = #tpu.dot_dimension_numbers<[1], [0], [0], [1], [0, 0, 1, 1], [], []>} : vector<4x32xbf16>, vector<32x8xbf16>, vector<4x8xf32> -> vector<4x8xf32>
    %44 = arith.addf %38, %43 : vector<4x8xf32>
    %45 = vector.extract_strided_slice %1 {offsets = [2, 1, 0], sizes = [2, 2, 32], strides = [1, 1, 1]} : vector<4x4x32xbf16> to vector<2x2x32xbf16>
    %46 = vector.shape_cast %45 : vector<2x2x32xbf16> to vector<4x32xbf16>
    %c2_37 = arith.constant 2 : index
    %c1_38 = arith.constant 1 : index
    %c0_39 = arith.constant 0 : index
    %c0_40 = arith.constant 0 : index
    %47 = vector.load %arg3[%c2_37, %c1_38, %c0_39, %c0_40] : memref<3x3x32x8xbf16, #tpu.memory_space<vmem>>, vector<1x1x32x8xbf16>
    %48 = vector.shape_cast %47 : vector<1x1x32x8xbf16> to vector<32x8xbf16>
    %cst_41 = arith.constant dense<0.000000e+00> : vector<4x8xf32>
    %49 = tpu.matmul %46, %48, %cst_41 {dimension_numbers = #tpu.dot_dimension_numbers<[1], [0], [0], [1], [0, 0, 1, 1], [], []>} : vector<4x32xbf16>, vector<32x8xbf16>, vector<4x8xf32> -> vector<4x8xf32>
    %50 = arith.addf %44, %49 : vector<4x8xf32>
    %51 = vector.extract_strided_slice %1 {offsets = [2, 2, 0], sizes = [2, 2, 32], strides = [1, 1, 1]} : vector<4x4x32xbf16> to vector<2x2x32xbf16>
    %52 = vector.shape_cast %51 : vector<2x2x32xbf16> to vector<4x32xbf16>
    %c2_42 = arith.constant 2 : index
    %c2_43 = arith.constant 2 : index
    %c0_44 = arith.constant 0 : index
    %c0_45 = arith.constant 0 : index
    %53 = vector.load %arg3[%c2_42, %c2_43, %c0_44, %c0_45] : memref<3x3x32x8xbf16, #tpu.memory_space<vmem>>, vector<1x1x32x8xbf16>
    %54 = vector.shape_cast %53 : vector<1x1x32x8xbf16> to vector<32x8xbf16>
    %cst_46 = arith.constant dense<0.000000e+00> : vector<4x8xf32>
    %55 = tpu.matmul %52, %54, %cst_46 {dimension_numbers = #tpu.dot_dimension_numbers<[1], [0], [0], [1], [0, 0, 1, 1], [], []>} : vector<4x32xbf16>, vector<32x8xbf16>, vector<4x8xf32> -> vector<4x8xf32>
    %56 = arith.addf %50, %55 : vector<4x8xf32>
    %c0_47 = arith.constant 0 : index
    %c0_48 = arith.constant 0 : index
    %57 = vector.load %arg4[%c0_47, %c0_48] : memref<1x8xf32, #tpu.memory_space<vmem>>, vector<1x8xf32>
    %58 = vector.broadcast %57 : vector<1x8xf32> to vector<4x8xf32>
    %59 = arith.addf %56, %58 : vector<4x8xf32>
    %cst_49 = arith.constant 0.000000e+00 : f32
    %60 = vector.broadcast %cst_49 : f32 to vector<4x8xf32>
    %61 = arith.maximumf %59, %60 : vector<4x8xf32>
    %62 = vector.shape_cast %61 : vector<4x8xf32> to vector<2x2x8xf32>
    %c0_50 = arith.constant 0 : index
    %c0_51 = arith.constant 0 : index
    %c0_52 = arith.constant 0 : index
    %c0_53 = arith.constant 0 : index
    %63 = vector.load %arg5[%c0_50, %c0_51, %c0_52, %c0_53] : memref<1x2x2x8xf32, #tpu.memory_space<vmem>>, vector<1x2x2x8xf32>
    %64 = vector.shape_cast %63 : vector<1x2x2x8xf32> to vector<2x2x8xf32>
    %65 = vector.shape_cast %62 : vector<2x2x8xf32> to vector<1x2x2x8xf32>
    tpu.vector_store %arg5[%c0_50, %c0_51, %c0_52, %c0_53], %65 {strides = array<i32>} : memref<1x2x2x8xf32, #tpu.memory_space<vmem>>, vector<1x2x2x8xf32>,
    return
  }
  func.func @transform_0(%arg0: i32, %arg1: i32) -> (i32, i32, i32, i32, i32) {
    %c0_i32 = arith.constant 0 : i32
    %c0_i32_0 = arith.constant 0 : i32
    %c0_i32_1 = arith.constant 0 : i32
    %c0_i32_2 = arith.constant 0 : i32
    return %arg0, %arg1, %c0_i32, %c0_i32_0, %c0_i32_1 : i32, i32, i32, i32, i32
  }
  func.func @transform_1(%arg0: i32, %arg1: i32) -> (i32, i32, i32, i32) {
    %c0_i32 = arith.constant 0 : i32
    %c0_i32_0 = arith.constant 0 : i32
    %c0_i32_1 = arith.constant 0 : i32
    %c0_i32_2 = arith.constant 0 : i32
    %c0_i32_3 = arith.constant 0 : i32
    return %c0_i32, %c0_i32_0, %c0_i32_1, %c0_i32_2 : i32, i32, i32, i32
  }
  func.func @transform_2(%arg0: i32, %arg1: i32) -> (i32, i32) {
    %c0_i32 = arith.constant 0 : i32
    %c0_i32_0 = arith.constant 0 : i32
    %c0_i32_1 = arith.constant 0 : i32
    return %c0_i32, %c0_i32_0 : i32, i32
  }
  func.func @transform_3(%arg0: i32, %arg1: i32) -> (i32, i32, i32, i32) {
    %c0_i32 = arith.constant 0 : i32
    %c0_i32_0 = arith.constant 0 : i32
    %c0_i32_1 = arith.constant 0 : i32
    return %arg0, %arg1, %c0_i32, %c0_i32_0 : i32, i32, i32, i32
  }
}

module attributes {stable_mosaic.version = 11 : i64} {
  func.func @_conv3x3_bias_relu_kernel(%arg0: i32, %arg1: i32, %arg2: memref<1x1x18x18x32xbf16, #tpu.memory_space<vmem>>, %arg3: memref<3x3x32x8xbf16, #tpu.memory_space<vmem>>, %arg4: memref<1x8xf32, #tpu.memory_space<vmem>>, %arg5: memref<1x16x16x8xf32, #tpu.memory_space<vmem>>) attributes {dimension_semantics = [#tpu.dimension_semantics<parallel>, #tpu.dimension_semantics<parallel>], iteration_bounds = array<i64: 2, 1>, scalar_prefetch = 0 : i64, scratch_operands = 0 : i64, tpu.core_type = #tpu.core_type<tc>, window_params = [{transform_indices = @transform_0, window_bounds = array<i64: 1, 1, 18, 18, 32>}, {pipeline_mode = #tpu.pipeline_mode<synchronous>, transform_indices = @transform_1, window_bounds = array<i64: 3, 3, 32, 8>}, {pipeline_mode = #tpu.pipeline_mode<synchronous>, transform_indices = @transform_2, window_bounds = array<i64: 1, 8>}, {transform_indices = @transform_3, window_bounds = array<i64: 1, 16, 16, 8>}]} {
    %c0 = arith.constant 0 : index
    %c0_0 = arith.constant 0 : index
    %c0_1 = arith.constant 0 : index
    %c0_2 = arith.constant 0 : index
    %c0_3 = arith.constant 0 : index
    %0 = vector.load %arg2[%c0, %c0_0, %c0_1, %c0_2, %c0_3] : memref<1x1x18x18x32xbf16, #tpu.memory_space<vmem>>, vector<1x1x18x18x32xbf16>
    %1 = vector.shape_cast %0 : vector<1x1x18x18x32xbf16> to vector<18x18x32xbf16>
    %cst = arith.constant 0.000000e+00 : f32
    %2 = vector.broadcast %cst : f32 to vector<256x8xf32>
    %3 = vector.extract_strided_slice %1 {offsets = [0, 0, 0], sizes = [16, 16, 32], strides = [1, 1, 1]} : vector<18x18x32xbf16> to vector<16x16x32xbf16>
    %4 = vector.shape_cast %3 : vector<16x16x32xbf16> to vector<256x32xbf16>
    %c0_4 = arith.constant 0 : index
    %c0_5 = arith.constant 0 : index
    %c0_6 = arith.constant 0 : index
    %c0_7 = arith.constant 0 : index
    %5 = vector.load %arg3[%c0_4, %c0_5, %c0_6, %c0_7] : memref<3x3x32x8xbf16, #tpu.memory_space<vmem>>, vector<1x1x32x8xbf16>
    %6 = vector.shape_cast %5 : vector<1x1x32x8xbf16> to vector<32x8xbf16>
    %cst_8 = arith.constant dense<0.000000e+00> : vector<256x8xf32>
    %7 = tpu.matmul %4, %6, %cst_8 {dimension_numbers = #tpu.dot_dimension_numbers<[1], [0], [0], [1], [0, 0, 1, 1], [], []>} : vector<256x32xbf16>, vector<32x8xbf16>, vector<256x8xf32> -> vector<256x8xf32>
    %8 = arith.addf %2, %7 : vector<256x8xf32>
    %9 = vector.extract_strided_slice %1 {offsets = [0, 1, 0], sizes = [16, 16, 32], strides = [1, 1, 1]} : vector<18x18x32xbf16> to vector<16x16x32xbf16>
    %10 = vector.shape_cast %9 : vector<16x16x32xbf16> to vector<256x32xbf16>
    %c0_9 = arith.constant 0 : index
    %c1 = arith.constant 1 : index
    %c0_10 = arith.constant 0 : index
    %c0_11 = arith.constant 0 : index
    %11 = vector.load %arg3[%c0_9, %c1, %c0_10, %c0_11] : memref<3x3x32x8xbf16, #tpu.memory_space<vmem>>, vector<1x1x32x8xbf16>
    %12 = vector.shape_cast %11 : vector<1x1x32x8xbf16> to vector<32x8xbf16>
    %cst_12 = arith.constant dense<0.000000e+00> : vector<256x8xf32>
    %13 = tpu.matmul %10, %12, %cst_12 {dimension_numbers = #tpu.dot_dimension_numbers<[1], [0], [0], [1], [0, 0, 1, 1], [], []>} : vector<256x32xbf16>, vector<32x8xbf16>, vector<256x8xf32> -> vector<256x8xf32>
    %14 = arith.addf %8, %13 : vector<256x8xf32>
    %15 = vector.extract_strided_slice %1 {offsets = [0, 2, 0], sizes = [16, 16, 32], strides = [1, 1, 1]} : vector<18x18x32xbf16> to vector<16x16x32xbf16>
    %16 = vector.shape_cast %15 : vector<16x16x32xbf16> to vector<256x32xbf16>
    %c0_13 = arith.constant 0 : index
    %c2 = arith.constant 2 : index
    %c0_14 = arith.constant 0 : index
    %c0_15 = arith.constant 0 : index
    %17 = vector.load %arg3[%c0_13, %c2, %c0_14, %c0_15] : memref<3x3x32x8xbf16, #tpu.memory_space<vmem>>, vector<1x1x32x8xbf16>
    %18 = vector.shape_cast %17 : vector<1x1x32x8xbf16> to vector<32x8xbf16>
    %cst_16 = arith.constant dense<0.000000e+00> : vector<256x8xf32>
    %19 = tpu.matmul %16, %18, %cst_16 {dimension_numbers = #tpu.dot_dimension_numbers<[1], [0], [0], [1], [0, 0, 1, 1], [], []>} : vector<256x32xbf16>, vector<32x8xbf16>, vector<256x8xf32> -> vector<256x8xf32>
    %20 = arith.addf %14, %19 : vector<256x8xf32>
    %21 = vector.extract_strided_slice %1 {offsets = [1, 0, 0], sizes = [16, 16, 32], strides = [1, 1, 1]} : vector<18x18x32xbf16> to vector<16x16x32xbf16>
    %22 = vector.shape_cast %21 : vector<16x16x32xbf16> to vector<256x32xbf16>
    %c1_17 = arith.constant 1 : index
    %c0_18 = arith.constant 0 : index
    %c0_19 = arith.constant 0 : index
    %c0_20 = arith.constant 0 : index
    %23 = vector.load %arg3[%c1_17, %c0_18, %c0_19, %c0_20] : memref<3x3x32x8xbf16, #tpu.memory_space<vmem>>, vector<1x1x32x8xbf16>
    %24 = vector.shape_cast %23 : vector<1x1x32x8xbf16> to vector<32x8xbf16>
    %cst_21 = arith.constant dense<0.000000e+00> : vector<256x8xf32>
    %25 = tpu.matmul %22, %24, %cst_21 {dimension_numbers = #tpu.dot_dimension_numbers<[1], [0], [0], [1], [0, 0, 1, 1], [], []>} : vector<256x32xbf16>, vector<32x8xbf16>, vector<256x8xf32> -> vector<256x8xf32>
    %26 = arith.addf %20, %25 : vector<256x8xf32>
    %27 = vector.extract_strided_slice %1 {offsets = [1, 1, 0], sizes = [16, 16, 32], strides = [1, 1, 1]} : vector<18x18x32xbf16> to vector<16x16x32xbf16>
    %28 = vector.shape_cast %27 : vector<16x16x32xbf16> to vector<256x32xbf16>
    %c1_22 = arith.constant 1 : index
    %c1_23 = arith.constant 1 : index
    %c0_24 = arith.constant 0 : index
    %c0_25 = arith.constant 0 : index
    %29 = vector.load %arg3[%c1_22, %c1_23, %c0_24, %c0_25] : memref<3x3x32x8xbf16, #tpu.memory_space<vmem>>, vector<1x1x32x8xbf16>
    %30 = vector.shape_cast %29 : vector<1x1x32x8xbf16> to vector<32x8xbf16>
    %cst_26 = arith.constant dense<0.000000e+00> : vector<256x8xf32>
    %31 = tpu.matmul %28, %30, %cst_26 {dimension_numbers = #tpu.dot_dimension_numbers<[1], [0], [0], [1], [0, 0, 1, 1], [], []>} : vector<256x32xbf16>, vector<32x8xbf16>, vector<256x8xf32> -> vector<256x8xf32>
    %32 = arith.addf %26, %31 : vector<256x8xf32>
    %33 = vector.extract_strided_slice %1 {offsets = [1, 2, 0], sizes = [16, 16, 32], strides = [1, 1, 1]} : vector<18x18x32xbf16> to vector<16x16x32xbf16>
    %34 = vector.shape_cast %33 : vector<16x16x32xbf16> to vector<256x32xbf16>
    %c1_27 = arith.constant 1 : index
    %c2_28 = arith.constant 2 : index
    %c0_29 = arith.constant 0 : index
    %c0_30 = arith.constant 0 : index
    %35 = vector.load %arg3[%c1_27, %c2_28, %c0_29, %c0_30] : memref<3x3x32x8xbf16, #tpu.memory_space<vmem>>, vector<1x1x32x8xbf16>
    %36 = vector.shape_cast %35 : vector<1x1x32x8xbf16> to vector<32x8xbf16>
    %cst_31 = arith.constant dense<0.000000e+00> : vector<256x8xf32>
    %37 = tpu.matmul %34, %36, %cst_31 {dimension_numbers = #tpu.dot_dimension_numbers<[1], [0], [0], [1], [0, 0, 1, 1], [], []>} : vector<256x32xbf16>, vector<32x8xbf16>, vector<256x8xf32> -> vector<256x8xf32>
    %38 = arith.addf %32, %37 : vector<256x8xf32>
    %39 = vector.extract_strided_slice %1 {offsets = [2, 0, 0], sizes = [16, 16, 32], strides = [1, 1, 1]} : vector<18x18x32xbf16> to vector<16x16x32xbf16>
    %40 = vector.shape_cast %39 : vector<16x16x32xbf16> to vector<256x32xbf16>
    %c2_32 = arith.constant 2 : index
    %c0_33 = arith.constant 0 : index
    %c0_34 = arith.constant 0 : index
    %c0_35 = arith.constant 0 : index
    %41 = vector.load %arg3[%c2_32, %c0_33, %c0_34, %c0_35] : memref<3x3x32x8xbf16, #tpu.memory_space<vmem>>, vector<1x1x32x8xbf16>
    %42 = vector.shape_cast %41 : vector<1x1x32x8xbf16> to vector<32x8xbf16>
    %cst_36 = arith.constant dense<0.000000e+00> : vector<256x8xf32>
    %43 = tpu.matmul %40, %42, %cst_36 {dimension_numbers = #tpu.dot_dimension_numbers<[1], [0], [0], [1], [0, 0, 1, 1], [], []>} : vector<256x32xbf16>, vector<32x8xbf16>, vector<256x8xf32> -> vector<256x8xf32>
    %44 = arith.addf %38, %43 : vector<256x8xf32>
    %45 = vector.extract_strided_slice %1 {offsets = [2, 1, 0], sizes = [16, 16, 32], strides = [1, 1, 1]} : vector<18x18x32xbf16> to vector<16x16x32xbf16>
    %46 = vector.shape_cast %45 : vector<16x16x32xbf16> to vector<256x32xbf16>
    %c2_37 = arith.constant 2 : index
    %c1_38 = arith.constant 1 : index
    %c0_39 = arith.constant 0 : index
    %c0_40 = arith.constant 0 : index
    %47 = vector.load %arg3[%c2_37, %c1_38, %c0_39, %c0_40] : memref<3x3x32x8xbf16, #tpu.memory_space<vmem>>, vector<1x1x32x8xbf16>
    %48 = vector.shape_cast %47 : vector<1x1x32x8xbf16> to vector<32x8xbf16>
    %cst_41 = arith.constant dense<0.000000e+00> : vector<256x8xf32>
    %49 = tpu.matmul %46, %48, %cst_41 {dimension_numbers = #tpu.dot_dimension_numbers<[1], [0], [0], [1], [0, 0, 1, 1], [], []>} : vector<256x32xbf16>, vector<32x8xbf16>, vector<256x8xf32> -> vector<256x8xf32>
    %50 = arith.addf %44, %49 : vector<256x8xf32>
    %51 = vector.extract_strided_slice %1 {offsets = [2, 2, 0], sizes = [16, 16, 32], strides = [1, 1, 1]} : vector<18x18x32xbf16> to vector<16x16x32xbf16>
    %52 = vector.shape_cast %51 : vector<16x16x32xbf16> to vector<256x32xbf16>
    %c2_42 = arith.constant 2 : index
    %c2_43 = arith.constant 2 : index
    %c0_44 = arith.constant 0 : index
    %c0_45 = arith.constant 0 : index
    %53 = vector.load %arg3[%c2_42, %c2_43, %c0_44, %c0_45] : memref<3x3x32x8xbf16, #tpu.memory_space<vmem>>, vector<1x1x32x8xbf16>
    %54 = vector.shape_cast %53 : vector<1x1x32x8xbf16> to vector<32x8xbf16>
    %cst_46 = arith.constant dense<0.000000e+00> : vector<256x8xf32>
    %55 = tpu.matmul %52, %54, %cst_46 {dimension_numbers = #tpu.dot_dimension_numbers<[1], [0], [0], [1], [0, 0, 1, 1], [], []>} : vector<256x32xbf16>, vector<32x8xbf16>, vector<256x8xf32> -> vector<256x8xf32>
    %56 = arith.addf %50, %55 : vector<256x8xf32>
    %c0_47 = arith.constant 0 : index
    %c0_48 = arith.constant 0 : index
    %57 = vector.load %arg4[%c0_47, %c0_48] : memref<1x8xf32, #tpu.memory_space<vmem>>, vector<1x8xf32>
    %58 = vector.broadcast %57 : vector<1x8xf32> to vector<256x8xf32>
    %59 = arith.addf %56, %58 : vector<256x8xf32>
    %cst_49 = arith.constant 0.000000e+00 : f32
    %60 = vector.broadcast %cst_49 : f32 to vector<256x8xf32>
    %61 = arith.maximumf %59, %60 : vector<256x8xf32>
    %62 = vector.shape_cast %61 : vector<256x8xf32> to vector<16x16x8xf32>
    %c0_50 = arith.constant 0 : index
    %c0_51 = arith.constant 0 : index
    %c0_52 = arith.constant 0 : index
    %c0_53 = arith.constant 0 : index
    %63 = vector.load %arg5[%c0_50, %c0_51, %c0_52, %c0_53] : memref<1x16x16x8xf32, #tpu.memory_space<vmem>>, vector<1x16x16x8xf32>
    %64 = vector.shape_cast %63 : vector<1x16x16x8xf32> to vector<16x16x8xf32>
    %65 = vector.shape_cast %62 : vector<16x16x8xf32> to vector<1x16x16x8xf32>
    tpu.vector_store %arg5[%c0_50, %c0_51, %c0_52, %c0_53], %65 {strides = array<i32>} : memref<1x16x16x8xf32, #tpu.memory_space<vmem>>, vector<1x16x16x8xf32>,
    return
  }
  func.func @transform_0(%arg0: i32, %arg1: i32) -> (i32, i32, i32, i32, i32) {
    %c0_i32 = arith.constant 0 : i32
    %c0_i32_0 = arith.constant 0 : i32
    %c0_i32_1 = arith.constant 0 : i32
    %c0_i32_2 = arith.constant 0 : i32
    return %arg0, %arg1, %c0_i32, %c0_i32_0, %c0_i32_1 : i32, i32, i32, i32, i32
  }
  func.func @transform_1(%arg0: i32, %arg1: i32) -> (i32, i32, i32, i32) {
    %c0_i32 = arith.constant 0 : i32
    %c0_i32_0 = arith.constant 0 : i32
    %c0_i32_1 = arith.constant 0 : i32
    %c0_i32_2 = arith.constant 0 : i32
    %c0_i32_3 = arith.constant 0 : i32
    return %c0_i32, %c0_i32_0, %c0_i32_1, %c0_i32_2 : i32, i32, i32, i32
  }
  func.func @transform_2(%arg0: i32, %arg1: i32) -> (i32, i32) {
    %c0_i32 = arith.constant 0 : i32
    %c0_i32_0 = arith.constant 0 : i32
    %c0_i32_1 = arith.constant 0 : i32
    return %c0_i32, %c0_i32_0 : i32, i32
  }
  func.func @transform_3(%arg0: i32, %arg1: i32) -> (i32, i32, i32, i32) {
    %c0_i32 = arith.constant 0 : i32
    %c0_i32_0 = arith.constant 0 : i32
    %c0_i32_1 = arith.constant 0 : i32
    return %arg0, %arg1, %c0_i32, %c0_i32_0 : i32, i32, i32, i32
  }
}

</mosaic_0001>

<bundles_post_ra>
// kernel: db_head_forward.8
= control target key start
LH: loop header
LB: loop body
LE: loop exit
PB: predicated region body
PF: predicated region fallthrough
CT: control target
= control target key end

     0   :  { %s494_s12 = smov 0   ;;  %s496_s13 = smov 0   ;;  %s536_s0 = inlined_call_operand.vmem [shape: bf16[2,16,32], index: 0, kind: input, shape index: {}]   ;;  %s537_s1 = inlined_call_operand.vmem [shape: bf16[32,32], index: 1, kind: input, shape index: {}]   ;;  %s538_s2 = inlined_call_operand.vmem [shape: f32[1,32], index: 2, kind: input, shape index: {}]   ;;  %s539_s3 = inlined_call_operand.vmem [shape: bf16[2,16,32], index: 3, kind: output, shape index: {}]  }
   0x1   :  { %s498_s14 = smov 0  }
   0x2 LB: > { %s25_s15 = sadd.s32 1, %s466_s13  ;;  %p390_p0 = scmp.ge.s32.totalorder %s470_s14, 1  ;;  %s470_s14 = sphi %s498_s14, %s13_s14   ;;  %s466_s13 = sphi %s496_s13, %s541_s13   ;;  %s462_s12 = sphi %s494_s12, %s540_s12  }
   0x3   : > { %p27_p1 = scmp.ge.s32.totalorder %s25_s15, 2  ;;  %p158_p2 = scmp.lt.s32.totalorder %s470_s14, 3 }
   0x5   : > { %s543_s15 = smov (%p27_p1, %s25_s15), 0  ;;  %p159_p3 = pnand %p390_p0, %p158_p2 }
   0x6   : > { %v445_v0 = vld [vmem:[%s537_s1] sm:$0xff] (!%p159_p3)   ;;  %v472_v1 = vmov (!%p159_p3), 0.0   ;;  %v446_v2 = vld [vmem:[%s537_s1 + $0x8] sm:$0xff] (!%p159_p3)   ;;  %vm473_vm0 = vmmov (!%p159_p3), 0   ;;  %p191_p4 = scmp.lt.s32.totalorder (!%p159_p3), %s462_s12, 1  ;;  %vm241_vm1 = vcmask (!%p159_p3), 261120  }
   0x7   : > { %162 = sbr.rel (%p159_p3) target bundleno = 239 (0xef), region = 32  ;;  %411 = vmatprep.subr.bf16.mxu0 (!%p159_p3), %v472_v1  ;;  %415 = vmatprep.mubr.msk.bf16.mxu0 (!%p159_p3), %vm473_vm0, %v472_v1  ;;  %v395_v4 = vld [vmem:[%s538_s2] ss:$0 sm:$0xff] (!%p159_p3)  ;;  %vm296_vm2 = vcmask (!%p159_p3), 257024  }
   0x8   : > { %412 = vmatpush3.bf16.msra.mxu0 (!%p159_p3), %v445_v0 }
   0x9   : > { %413 = vmatprep.subr.bf16.mxu0 (!%p159_p3), %v472_v1 }
   0xc   : > { %414 = vmatpush3.bf16.msra.mxu0 (!%p159_p3), %v446_v2 }
   0xe   : > { %s545_s12 = smov (!%p191_p4, %s462_s12), 1 }
   0xf   : > { %s404_s20 = sshll.u32 %s545_s12, 3 }
  0x10   : > { %s198_s23 = scalar_lea.vmem %s536_s0, %s404_s20  ;;  %s208_s28 = scalar_lea.vmem %s539_s3, %s404_s20 }
  0x11   : > { %v447_v3 = vld [vmem:[%s198_s23] sm:$0xff]  }
  0x12   : > { %416 = vmatmul.mubr.msk.bf16.vlgmr.msra.gmra.mrb[0].mxu0 %vm241_vm1, %v447_v3 }
  0xe5   : > { %v279_v5 = vpop.f32.mrb[0].mxu0 }
  0xe6   : > { %v280_v6 = vadd.f32 %v395_v4, %v279_v5  ;;  %v417_v7 = vpop.f32.mrb[1].mxu0 }
  0xe7   : > { %v282_v8 = vpop.f32.mrb[2].mxu0 }
  0xe8   : > { %v286_v9 = vmax.f32 %v280_v6, 0.0  ;;  %v283_v10 = vadd.f32 %v395_v4, %v282_v8  ;;  %v418_v11 = vpop.f32.mrb[3].mxu0 }
  0xea   : > { %v406_v12 = vpack.c.bf16 %v286_v9, %v286_v9  ;;  %v287_v13 = vmax.f32 %v283_v10, 0.0 }
  0xec   : > { %297 = vst.msk [vmem:[%s208_s28] sm:$0xf] %vm296_vm2, %v406_v12  ;;  %v407_v14 = vpack.c.bf16 %v287_v13, %v287_v13 }
  0xee   : > { %298 = vst.msk [vmem:[%s208_s28 + $0x4] sm:$0xf] %vm296_vm2, %v407_v14 }
  0xef PF: > { %s13_s14 = sadd.s32 1, %s470_s14   ;;  %s540_s12 = smov %s466_s13 }
  0xf0   : > { %p10_p5 = scmp.ge.s32.totalorder %s13_s14, 4   ;;  %s541_s13 = smov %s543_s15 }
  0xf2   :  { %12 = sbr.rel (!%p10_p5) target bundleno = 2 (0x2), region = 62 }

// kernel: db_head_forward.9
= control target key start
LH: loop header
LB: loop body
LE: loop exit
PB: predicated region body
PF: predicated region fallthrough
CT: control target
= control target key end

     0   :  { %s593_s15 = smov 0   ;;  %s595_s16 = smov 0   ;;  %s638_s0 = inlined_call_operand.vmem [shape: bf16[2,16,24], index: 0, kind: input, shape index: {}]   ;;  %s639_s1 = inlined_call_operand.vmem [shape: bf16[2,16,32], index: 1, kind: input, shape index: {}]   ;;  %s640_s2 = inlined_call_operand.vmem [shape: bf16[24,32], index: 2, kind: input, shape index: {}]   ;;  %s641_s3 = inlined_call_operand.vmem [shape: f32[1,32], index: 3, kind: input, shape index: {}]   ;;  %s642_s4 = inlined_call_operand.vmem [shape: bf16[2,16,32], index: 4, kind: output, shape index: {}]  }
   0x1   :  { %s597_s17 = smov 0  }
   0x2 LB: > { %s26_s18 = sadd.s32 1, %s560_s16  ;;  %p477_p0 = scmp.ge.s32.totalorder %s564_s17, 1  ;;  %s564_s17 = sphi %s597_s17, %s14_s17   ;;  %s560_s16 = sphi %s595_s16, %s644_s16   ;;  %s556_s15 = sphi %s593_s15, %s643_s15  }
   0x3   : > { %p28_p1 = scmp.ge.s32.totalorder %s26_s18, 2  ;;  %p200_p2 = scmp.lt.s32.totalorder %s564_s17, 3 }
   0x5   : > { %s646_s18 = smov (%p28_p1, %s26_s18), 0  ;;  %p201_p3 = pnand %p477_p0, %p200_p2 }
   0x6   : > { %v539_v0 = vld [vmem:[%s640_s2] sm:$0xff] (!%p201_p3)   ;;  %v566_v1 = vmov (!%p201_p3), 0.0   ;;  %v540_v2 = vld [vmem:[%s640_s2 + $0x8] ss:$0 sps:$4 sm:$0xff] (!%p201_p3)   ;;  %vm304_vm0 = vcmask (!%p201_p3), 1043456   ;;  %vm567_vm1 = vmmov (!%p201_p3), 0  }
   0x7   : > { %204 = sbr.rel (%p201_p3) target bundleno = 241 (0xf1), region = 36  ;;  %505 = vmatprep.subr.bf16.mxu0 (!%p201_p3), %v566_v1  ;;  %509 = vmatprep.mubr.msk.bf16.mxu0 (!%p201_p3), %vm567_vm1, %v566_v1  ;;  %p244_p4 = scmp.lt.s32.totalorder (!%p201_p3), %s556_s15, 1  ;;  %v306_v3 = vsel (!%p201_p3), %vm304_vm0, %v540_v2, 0  ;;  %vm300_vm2 = vcmask (!%p201_p3), 195584   ;;  %v484_v5 = vld [vmem:[%s641_s3] ss:$0 sm:$0xff] (!%p201_p3) }
   0x8   : > { %506 = vmatpush3.bf16.msra.mxu0 (!%p201_p3), %v539_v0  ;;  %vm365_vm3 = vcmask (!%p201_p3), 257024  }
   0x9   : > { %507 = vmatprep.subr.bf16.mxu0 (!%p201_p3), %v566_v1 }
   0xc   : > { %508 = vmatpush3.bf16.msra.mxu0 (!%p201_p3), %v306_v3 }
   0xe   : > { %s648_s15 = smov (!%p244_p4, %s556_s15), 1 }
   0xf   : > { %s493_s23 = sshll.u32 %s648_s15, 3 }
  0x10   : > { %s251_s26 = scalar_lea.vmem %s638_s0, %s493_s23  ;;  %s261_s29 = scalar_lea.vmem %s639_s1, %s493_s23 }
  0x11   : > { %v541_v4 = vld [vmem:[%s251_s26] sm:$0xff]   ;;  %s271_s8 = scalar_lea.vmem %s642_s4, %s493_s23 }
  0x12   : > { %510 = vmatmul.mubr.msk.bf16.vlgmr.msra.gmra.mrb[0].mxu0 %vm300_vm2, %v541_v4  ;;  %v499_v6 = vld [vmem:[%s261_s29] sm:$0xff]  }
  0x13   : > { %v500_v9 = vunpack.c.l.bf16 %v499_v6  ;;  %v501_v14 = vunpack.c.h.bf16 %v499_v6 }
  0xe5   : > { %v342_v7 = vpop.f32.mrb[0].mxu0 }
  0xe6   : > { %v343_v8 = vadd.f32 %v484_v5, %v342_v7  ;;  %v511_v10 = vpop.f32.mrb[1].mxu0 }
  0xe7   : > { %v345_v11 = vpop.f32.mrb[2].mxu0 }
  0xe8   : > { %v349_v12 = vmax.f32 %v343_v8, 0.0  ;;  %v346_v13 = vadd.f32 %v484_v5, %v345_v11  ;;  %v512_v15 = vpop.f32.mrb[3].mxu0 }
  0xea   : > { %v355_v16 = vadd.f32 %v500_v9, %v349_v12  ;;  %v350_v17 = vmax.f32 %v346_v13, 0.0 }
  0xec   : > { %v496_v18 = vpack.c.bf16 %v355_v16, %v355_v16  ;;  %v356_v19 = vadd.f32 %v501_v14, %v350_v17 }
  0xee   : > { %366 = vst.msk [vmem:[%s271_s8] sm:$0xf] %vm365_vm3, %v496_v18  ;;  %v497_v20 = vpack.c.bf16 %v356_v19, %v356_v19 }
  0xf0   : > { %367 = vst.msk [vmem:[%s271_s8 + $0x4] sm:$0xf] %vm365_vm3, %v497_v20 }
  0xf1 PF: > { %s14_s17 = sadd.s32 1, %s564_s17   ;;  %s643_s15 = smov %s560_s16 }
  0xf2   : > { %p11_p5 = scmp.ge.s32.totalorder %s14_s17, 4   ;;  %s644_s16 = smov %s646_s18 }
  0xf4   :  { %13 = sbr.rel (!%p11_p5) target bundleno = 2 (0x2), region = 69 }

// kernel: db_head_forward.10
= control target key start
LH: loop header
LB: loop body
LE: loop exit
PB: predicated region body
PF: predicated region fallthrough
CT: control target
= control target key end

     0   :  { %s729_s15 = smov 0   ;;  %s731_s16 = smov 0   ;;  %s784_s0 = inlined_call_operand.vmem [shape: bf16[2,64,16], index: 0, kind: input, shape index: {}]   ;;  %s785_s1 = inlined_call_operand.vmem [shape: bf16[2,64,32], index: 1, kind: input, shape index: {}]   ;;  %s786_s2 = inlined_call_operand.vmem [shape: bf16[16,32], index: 2, kind: input, shape index: {}]   ;;  %s787_s3 = inlined_call_operand.vmem [shape: f32[1,32], index: 3, kind: input, shape index: {}]   ;;  %s788_s4 = inlined_call_operand.vmem [shape: bf16[2,64,32], index: 4, kind: output, shape index: {}]  }
   0x1   :  { %s733_s17 = smov 0  }
   0x2 LB: > { %s26_s18 = sadd.s32 1, %s698_s16  ;;  %p577_p0 = scmp.ge.s32.totalorder %s702_s17, 1  ;;  %s702_s17 = sphi %s733_s17, %s14_s17   ;;  %s698_s16 = sphi %s731_s16, %s790_s16   ;;  %s694_s15 = sphi %s729_s15, %s789_s15  }
   0x3   : > { %p28_p1 = scmp.ge.s32.totalorder %s26_s18, 2  ;;  %p200_p2 = scmp.lt.s32.totalorder %s702_s17, 3 }
   0x5   : > { %s792_s18 = smov (%p28_p1, %s26_s18), 0  ;;  %p201_p3 = pnand %p577_p0, %p200_p2 }
   0x6   : > { %v675_v0 = vld [vmem:[%s786_s2] sm:$0xff] (!%p201_p3)   ;;  %p244_p4 = scmp.lt.s32.totalorder (!%p201_p3), %s694_s15, 1  ;;  %vm317_vm0 = vcmask (!%p201_p3), 130048   ;;  %vm459_vm1 = vcmask (!%p201_p3), 257024  }
   0x7   : > { %204 = sbr.rel (%p201_p3) target bundleno = 243 (0xf3), region = 36  ;;  %639 = vmatprep.subr.bf16.mxu0 (!%p201_p3), %v675_v0  ;;  %649 = vmatprep.subr.bf16.mxu1 (!%p201_p3), %v675_v0  ;;  %v584_v8 = vld [vmem:[%s787_s3] ss:$0 sm:$0xff] (!%p201_p3) }
   0x8   : > { %640 = vmatpush3.bf16.msra.mxu0 (!%p201_p3), %v675_v0  ;;  %650 = vmatpush3.bf16.msra.mxu1 (!%p201_p3), %v675_v0 }
   0xe   : > { %s794_s15 = smov (!%p244_p4, %s694_s15), 1 }
   0xf   : > { %s750_s21 = sshll.u32 %s794_s15, 5 }
  0x10   : > { %s251_s24 = scalar_lea.vmem %s784_s0, %s750_s21  ;;  %s261_s27 = scalar_lea.vmem %s785_s1, %s750_s21 }
  0x11   : > { %v676_v1 = vld [vmem:[%s251_s24] sm:$0xff]   ;;  %v677_v2 = vld [vmem:[%s251_s24 + $0x10] sm:$0xff]   ;;  %v678_v3 = vld [vmem:[%s251_s24 + $0x8] sm:$0xff]   ;;  %s271_s6 = scalar_lea.vmem %s788_s4, %s750_s21 }
  0x12   : > { %641 = vmatprep.mubr.msk.bf16.mxu0 %vm317_vm0, %v676_v1  ;;  %645 = vmatprep.mubr.msk.bf16.mxu1 %vm317_vm0, %v677_v2  ;;  %v679_v4 = vld [vmem:[%s251_s24 + $0x18] sm:$0xff]   ;;  %v631_v5 = vld [vmem:[%s261_s27 + $0x8] sm:$0xff]   ;;  %v616_v7 = vld [vmem:[%s261_s27] sm:$0xff]  }
  0x13   : > { %642 = vmatmul.mubr.msk.bf16.vlgmr.msra.gmra.mrb[0].mxu0 %vm317_vm0, %v678_v3  ;;  %646 = vmatmul.mubr.msk.bf16.vlgmr.msra.gmra.mrb[0].mxu1 %vm317_vm0, %v679_v4  ;;  %v633_v6 = vld [vmem:[%s261_s27 + $0x18] sm:$0xff]   ;;  %v632_v9 = vld [vmem:[%s261_s27 + $0x10] sm:$0xff]   ;;  %v621_v11 = vunpack.c.l.bf16 %v631_v5  ;;  %v617_v13 = vunpack.c.l.bf16 %v616_v7  ;;  %v622_v18 = vunpack.c.h.bf16 %v631_v5  ;;  %v618_v24 = vunpack.c.h.bf16 %v616_v7 }
  0x14   : > { %v629_v12 = vunpack.c.l.bf16 %v633_v6  ;;  %v625_v17 = vunpack.c.l.bf16 %v632_v9  ;;  %v630_v19 = vunpack.c.h.bf16 %v633_v6  ;;  %v626_v30 = vunpack.c.h.bf16 %v632_v9 }
  0xe6   : > { %v643_v10 = vpop.f32.mrb[0].mxu0  ;;  %v647_v15 = vpop.f32.mrb[0].mxu1 }
  0xe7   : > { %v373_v14 = vadd.f32 %v643_v10, %v584_v8  ;;  %v364_v16 = vpop.f32.mrb[1].mxu0  ;;  %v389_v20 = vadd.f32 %v647_v15, %v584_v8  ;;  %v380_v22 = vpop.f32.mrb[1].mxu1 }
  0xe8   : > { %v365_v21 = vadd.f32 %v584_v8, %v364_v16  ;;  %v644_v23 = vpop.f32.mrb[2].mxu0  ;;  %v381_v26 = vadd.f32 %v584_v8, %v380_v22  ;;  %v648_v28 = vpop.f32.mrb[2].mxu1 }
  0xe9   : > { %v397_v25 = vmax.f32 %v373_v14, 0.0  ;;  %v376_v27 = vadd.f32 %v644_v23, %v584_v8  ;;  %v367_v29 = vpop.f32.mrb[3].mxu0  ;;  %v401_v31 = vmax.f32 %v389_v20, 0.0  ;;  %v392_v33 = vadd.f32 %v648_v28, %v584_v8  ;;  %v383_v35 = vpop.f32.mrb[3].mxu1 }
  0xea   : > { %v395_v32 = vmax.f32 %v365_v21, 0.0  ;;  %v368_v34 = vadd.f32 %v584_v8, %v367_v29  ;;  %v399_v37 = vmax.f32 %v381_v26, 0.0  ;;  %v384_v39 = vadd.f32 %v584_v8, %v383_v35 }
  0xeb   : > { %v421_v36 = vadd.f32 %v621_v11, %v397_v25  ;;  %v398_v38 = vmax.f32 %v376_v27, 0.0  ;;  %v425_v40 = vadd.f32 %v629_v12, %v401_v31  ;;  %v402_v42 = vmax.f32 %v392_v33, 0.0 }
  0xec   : > { %v419_v41 = vadd.f32 %v617_v13, %v395_v32  ;;  %v396_v43 = vmax.f32 %v368_v34, 0.0  ;;  %v423_v45 = vadd.f32 %v625_v17, %v399_v37  ;;  %v400_v47 = vmax.f32 %v384_v39, 0.0 }
  0xed   : > { %v609_v44 = vpack.c.bf16 %v421_v36, %v421_v36  ;;  %v422_v46 = vadd.f32 %v622_v18, %v398_v38  ;;  %v613_v48 = vpack.c.bf16 %v425_v40, %v425_v40  ;;  %v426_v50 = vadd.f32 %v630_v19, %v402_v42 }
  0xee   : > { %v607_v49 = vpack.c.bf16 %v419_v41, %v419_v41  ;;  %v420_v51 = vadd.f32 %v618_v24, %v396_v43  ;;  %v611_v52 = vpack.c.bf16 %v423_v45, %v423_v45  ;;  %v424_v54 = vadd.f32 %v626_v30, %v400_v47 }
  0xef   : > { %462 = vst.msk [vmem:[%s271_s6 + $0x8] sm:$0xf] %vm459_vm1, %v609_v44  ;;  %v610_v53 = vpack.c.bf16 %v422_v46, %v422_v46  ;;  %466 = vst.msk [vmem:[%s271_s6 + $0x18] sm:$0xf] %vm459_vm1, %v613_v48  ;;  %v614_v55 = vpack.c.bf16 %v426_v50, %v426_v50 }
  0xf0   : > { %460 = vst.msk [vmem:[%s271_s6] sm:$0xf] %vm459_vm1, %v607_v49  ;;  %v608_v56 = vpack.c.bf16 %v420_v51, %v420_v51  ;;  %464 = vst.msk [vmem:[%s271_s6 + $0x10] sm:$0xf] %vm459_vm1, %v611_v52  ;;  %v612_v57 = vpack.c.bf16 %v424_v54, %v424_v54 }
  0xf1   : > { %463 = vst.msk [vmem:[%s271_s6 + $0xc] sm:$0xf] %vm459_vm1, %v610_v53  ;;  %467 = vst.msk [vmem:[%s271_s6 + $0x1c] sm:$0xf] %vm459_vm1, %v614_v55 }
  0xf2   : > { %461 = vst.msk [vmem:[%s271_s6 + $0x4] sm:$0xf] %vm459_vm1, %v608_v56  ;;  %465 = vst.msk [vmem:[%s271_s6 + $0x14] sm:$0xf] %vm459_vm1, %v612_v57 }
  0xf3 PF: > { %s14_s17 = sadd.s32 1, %s702_s17   ;;  %s789_s15 = smov %s698_s16 }
  0xf4   : > { %p11_p5 = scmp.ge.s32.totalorder %s14_s17, 4   ;;  %s790_s16 = smov %s792_s18 }
  0xf6   :  { %13 = sbr.rel (!%p11_p5) target bundleno = 2 (0x2), region = 69 }

// kernel: db_head_forward.11
= control target key start
LH: loop header
LB: loop body
LE: loop exit
PB: predicated region body
PF: predicated region fallthrough
CT: control target
= control target key end

     0   :  { %s1338_s15 = smov 0   ;;  %s1340_s16 = smov 0   ;;  %s1663_s0 = inlined_call_operand.vmem [shape: bf16[2,256,8], index: 0, kind: input, shape index: {}]   ;;  %s1664_s1 = inlined_call_operand.vmem [shape: bf16[2,256,32], index: 1, kind: input, shape index: {}]   ;;  %s1665_s2 = inlined_call_operand.vmem [shape: bf16[8,32], index: 2, kind: input, shape index: {}]   ;;  %s1666_s3 = inlined_call_operand.vmem [shape: f32[1,32], index: 3, kind: input, shape index: {}]   ;;  %s1667_s4 = inlined_call_operand.vmem [shape: bf16[2,256,32], index: 4, kind: output, shape index: {}]  }
   0x1   :  { %s1342_s17 = smov 0  }
   0x2 LB: > { %s26_s18 = sadd.s32 1, %s1307_s16  ;;  %p1006_p0 = scmp.ge.s32.totalorder %s1311_s17, 1  ;;  %s1311_s17 = sphi %s1342_s17, %s14_s17   ;;  %s1307_s16 = sphi %s1340_s16, %s1672_s16   ;;  %s1303_s15 = sphi %s1338_s15, %s1671_s15  }
   0x3   : > { %p28_p1 = scmp.ge.s32.totalorder %s26_s18, 2  ;;  %p200_p2 = scmp.lt.s32.totalorder %s1311_s17, 3 }
   0x5   : > { %s1674_s18 = smov (%p28_p1, %s26_s18), 0  ;;  %p201_p3 = pnand %p1006_p0, %p200_p2 }
   0x6   : > { %v306_v0 = vld [vmem:[%s1665_s2] sm:$0xf] (!%p201_p3)  ;;  %vm443_vm0 = vcmask (!%p201_p3), 1043456   ;;  %p244_p4 = scmp.lt.s32.totalorder (!%p201_p3), %s1303_s15, 1  ;;  %vm394_vm1 = vcmask (!%p201_p3), 64512   ;;  %vm864_vm2 = vcmask (!%p201_p3), 257024  }
   0x7   : > { %204 = sbr.rel (%p201_p3) target bundleno = 270 (0x10e), region = 36  ;;  %1247 = vmatprep.subr.msk.bf16.mxu0 (!%p201_p3), %vm443_vm0, %v306_v0  ;;  %1248 = vmatprep.subr.msk.bf16.mxu1 (!%p201_p3), %vm443_vm0, %v306_v0  ;;  %v445_v1 = vsel (!%p201_p3), %vm443_vm0, %v306_v0, 0  ;;  %v1464_v46 = vld [vmem:[%s1666_s3] ss:$0 sm:$0xff] (!%p201_p3) }
   0x8   : > { %1212 = vmatpush3.bf16.msra.mxu0 (!%p201_p3), %v445_v1  ;;  %1246 = vmatpush3.bf16.msra.mxu1 (!%p201_p3), %v445_v1 }
   0xe   : > { %s1676_s15 = smov (!%p244_p4, %s1303_s15), 1 }
   0xf   : > { %s1359_s21 = sshll.u32 %s1676_s15, 7 }
  0x10   : > { %s1365_s24 = scalar_lea.vmem %s1663_s0, %s1359_s21  ;;  %s1403_s27 = scalar_lea.vmem %s1664_s1, %s1359_s21 }
  0x11   : > { %v1273_v2 = vld [vmem:[%s1365_s24] sm:$0xff]   ;;  %v1275_v4 = vld [vmem:[%s1365_s24 + $0x8] sm:$0xff]   ;;  %v1277_v6 = vld [vmem:[%s1365_s24 + $0x10] sm:$0xff]   ;;  %s1502_s6 = scalar_lea.vmem %s1667_s4, %s1359_s21 }
  0x12   : > { %v1274_v3 = vld [vmem:[%s1365_s24 + $0x40] sm:$0xff]   ;;  %1213 = vmatprep.mubr.msk.bf16.mxu0 %vm394_vm1, %v1273_v2  ;;  %v1276_v5 = vld [vmem:[%s1365_s24 + $0x48] sm:$0xff]   ;;  %v1278_v7 = vld [vmem:[%s1365_s24 + $0x50] sm:$0xff]  }
  0x13   : > { %1229 = vmatprep.mubr.msk.bf16.mxu1 %vm394_vm1, %v1274_v3  ;;  %1214 = vmatmul.mubr.msk.bf16.vlgmr.msra.gmra.mrb[0].mxu0 %vm394_vm1, %v1275_v4  ;;  %v1279_v8 = vld [vmem:[%s1365_s24 + $0x18] sm:$0xff]   ;;  %v1281_v10 = vld [vmem:[%s1365_s24 + $0x20] sm:$0xff]   ;;  %v1283_v12 = vld [vmem:[%s1365_s24 + $0x28] sm:$0xff]  }
  0x14   : > { %1230 = vmatmul.mubr.msk.bf16.vlgmr.msra.gmra.mrb[0].mxu1 %vm394_vm1, %v1276_v5  ;;  %1217 = vmatprep.mubr.msk.bf16.mxu0 %vm394_vm1, %v1277_v6  ;;  %v1280_v9 = vld [vmem:[%s1365_s24 + $0x58] sm:$0xff]   ;;  %v1282_v11 = vld [vmem:[%s1365_s24 + $0x60] sm:$0xff]   ;;  %v1284_v13 = vld [vmem:[%s1365_s24 + $0x68] sm:$0xff]  }
  0x15   : > { %1233 = vmatprep.mubr.msk.bf16.mxu1 %vm394_vm1, %v1278_v7  ;;  %v1285_v14 = vld [vmem:[%s1365_s24 + $0x30] sm:$0xff]   ;;  %v1287_v16 = vld [vmem:[%s1365_s24 + $0x38] sm:$0xff]   ;;  %v1406_v18 = vld [vmem:[%s1403_s27 + $0x8] sm:$0xff]  }
  0x16   : > { %v1286_v15 = vld [vmem:[%s1365_s24 + $0x70] sm:$0xff]   ;;  %v1288_v17 = vld [vmem:[%s1365_s24 + $0x78] sm:$0xff]   ;;  %v1409_v19 = vld [vmem:[%s1403_s27 + $0x48] sm:$0xff]   ;;  %v1121_v24 = vunpack.c.l.bf16 %v1406_v18  ;;  %v1122_v30 = vunpack.c.h.bf16 %v1406_v18 }
  0x17   : > { %v1412_v20 = vld [vmem:[%s1403_s27] sm:$0xff]   ;;  %v1418_v22 = vld [vmem:[%s1403_s27 + $0x18] sm:$0xff]   ;;  %v1153_v25 = vunpack.c.l.bf16 %v1409_v19  ;;  %v1426_v26 = vld [vmem:[%s1403_s27 + $0x10] sm:$0xff]   ;;  %v1154_v31 = vunpack.c.h.bf16 %v1409_v19 }
  0x18   : > { %v1415_v21 = vld [vmem:[%s1403_s27 + $0x40] sm:$0xff]   ;;  %v1421_v23 = vld [vmem:[%s1403_s27 + $0x58] sm:$0xff]   ;;  %v1429_v27 = vld [vmem:[%s1403_s27 + $0x50] sm:$0xff]   ;;  %v1117_v28 = vunpack.c.l.bf16 %v1412_v20  ;;  %v1118_v34 = vunpack.c.h.bf16 %v1412_v20  ;;  %v1129_v36 = vunpack.c.l.bf16 %v1418_v22  ;;  %v1125_v40 = vunpack.c.l.bf16 %v1426_v26 }
  0x19   : > { %v1149_v29 = vunpack.c.l.bf16 %v1415_v21  ;;  %v1436_v32 = vld [vmem:[%s1403_s27 + $0x28] sm:$0xff]   ;;  %v1150_v35 = vunpack.c.h.bf16 %v1415_v21  ;;  %v1161_v37 = vunpack.c.l.bf16 %v1421_v23  ;;  %v1446_v38 = vld [vmem:[%s1403_s27 + $0x20] sm:$0xff]   ;;  %v1157_v41 = vunpack.c.l.bf16 %v1429_v27  ;;  %v1456_v44 = vld [vmem:[%s1403_s27 + $0x38] sm:$0xff]  }
  0x1a   : > { %v1439_v33 = vld [vmem:[%s1403_s27 + $0x68] sm:$0xff]   ;;  %v1449_v39 = vld [vmem:[%s1403_s27 + $0x60] sm:$0xff]   ;;  %v1130_v42 = vunpack.c.h.bf16 %v1418_v22  ;;  %v1162_v43 = vunpack.c.h.bf16 %v1421_v23  ;;  %v1459_v45 = vld [vmem:[%s1403_s27 + $0x78] sm:$0xff]   ;;  %v1126_v47 = vunpack.c.h.bf16 %v1426_v26  ;;  %v1158_v48 = vunpack.c.h.bf16 %v1429_v27 }
  0x1b   : > { %1218 = vmatmul.mubr.msk.bf16.gmra.mrb[4].mxu0 %vm394_vm1, %v1279_v8  ;;  %v1137_v49 = vunpack.c.l.bf16 %v1436_v32  ;;  %v1169_v50 = vunpack.c.l.bf16 %v1439_v33  ;;  %v1471_v51 = vld [vmem:[%s1403_s27 + $0x30] sm:$0xff]   ;;  %v1133_v53 = vunpack.c.l.bf16 %v1446_v38  ;;  %v1165_v54 = vunpack.c.l.bf16 %v1449_v39 }
  0x1c   : > { %1234 = vmatmul.mubr.msk.bf16.gmra.mrb[4].mxu1 %vm394_vm1, %v1280_v9  ;;  %1221 = vmatprep.mubr.msk.bf16.mxu0 %vm394_vm1, %v1281_v10  ;;  %v1474_v52 = vld [vmem:[%s1403_s27 + $0x70] sm:$0xff]   ;;  %v1138_v55 = vunpack.c.h.bf16 %v1436_v32  ;;  %v1170_v56 = vunpack.c.h.bf16 %v1439_v33  ;;  %v1134_v58 = vunpack.c.h.bf16 %v1446_v38  ;;  %v1166_v59 = vunpack.c.h.bf16 %v1449_v39 }
  0x1d   : > { %1237 = vmatprep.mubr.msk.bf16.mxu1 %vm394_vm1, %v1282_v11  ;;  %v1145_v60 = vunpack.c.l.bf16 %v1456_v44  ;;  %v1177_v61 = vunpack.c.l.bf16 %v1459_v45  ;;  %v1141_v1 = vunpack.c.l.bf16 %v1471_v51  ;;  %v1173_v2 = vunpack.c.l.bf16 %v1474_v52 }
  0x23   : > { %1222 = vmatmul.mubr.msk.bf16.gmra.mrb[8].mxu0 %vm394_vm1, %v1283_v12 }
  0x24   : > { %1238 = vmatmul.mubr.msk.bf16.gmra.mrb[8].mxu1 %vm394_vm1, %v1284_v13  ;;  %1225 = vmatprep.mubr.msk.bf16.mxu0 %vm394_vm1, %v1285_v14 }
  0x25   : > { %1241 = vmatprep.mubr.msk.bf16.mxu1 %vm394_vm1, %v1286_v15  ;;  %v1174_v15 = vunpack.c.h.bf16 %v1474_v52 }
  0x2b   : > { %1226 = vmatmul.mubr.msk.bf16.gmra.mrb[12].mxu0 %vm394_vm1, %v1287_v16 }
  0x2c   : > { %1242 = vmatmul.mubr.msk.bf16.gmra.mrb[12].mxu1 %vm394_vm1, %v1288_v17 }
  0xe6   : > { %v1215_v57 = vpop.f32.mrb[0].mxu0 }
  0xe7   : > { %v490_v62 = vadd.f32 %v1215_v57, %v1464_v46  ;;  %v1231_v63 = vpop.f32.mrb[0].mxu1  ;;  %v481_v0 = vpop.f32.mrb[1].mxu0 }
  0xe8   : > { %v554_v4 = vadd.f32 %v1231_v63, %v1464_v46  ;;  %v482_v5 = vadd.f32 %v1464_v46, %v481_v0  ;;  %v545_v6 = vpop.f32.mrb[1].mxu1  ;;  %v1216_v7 = vpop.f32.mrb[2].mxu0 }
  0xe9   : > { %v610_v10 = vmax.f32 %v490_v62, 0.0  ;;  %v546_v11 = vadd.f32 %v1464_v46, %v545_v6  ;;  %v493_v12 = vadd.f32 %v1216_v7, %v1464_v46  ;;  %v1232_v13 = vpop.f32.mrb[2].mxu1  ;;  %v484_v14 = vpop.f32.mrb[3].mxu0 }
  0xea   : > { %v626_v16 = vmax.f32 %v554_v4, 0.0  ;;  %v608_v17 = vmax.f32 %v482_v5, 0.0  ;;  %v557_v57 = vadd.f32 %v1232_v13, %v1464_v46  ;;  %v485_v63 = vadd.f32 %v1464_v46, %v484_v14  ;;  %v548_v0 = vpop.f32.mrb[3].mxu1 }
  0xeb   : > { %v706_v8 = vadd.f32 %v1121_v24, %v610_v10  ;;  %v624_v3 = vmax.f32 %v546_v11, 0.0  ;;  %v611_v9 = vmax.f32 %v493_v12, 0.0  ;;  %v549_v62 = vadd.f32 %v1464_v46, %v548_v0 }
  0xec   : > { %v722_v4 = vadd.f32 %v1153_v25, %v626_v16  ;;  %v704_v5 = vadd.f32 %v1117_v28, %v608_v17  ;;  %v627_v6 = vmax.f32 %v557_v57, 0.0  ;;  %v609_v7 = vmax.f32 %v485_v63, 0.0 }
  0xed   : > { %v1085_v13 = vpack.c.bf16 %v706_v8, %v706_v8  ;;  %v720_v24 = vadd.f32 %v1149_v29, %v624_v3  ;;  %v707_v10 = vadd.f32 %v1122_v30, %v611_v9  ;;  %v625_v11 = vmax.f32 %v549_v62, 0.0 }
  0xee   : > { %v1101_v12 = vpack.c.bf16 %v722_v4, %v722_v4  ;;  %v1083_v14 = vpack.c.bf16 %v704_v5, %v704_v5  ;;  %v723_v25 = vadd.f32 %v1154_v31, %v627_v6  ;;  %v705_v28 = vadd.f32 %v1118_v34, %v609_v7  ;;  %v1219_v16 = vpop.f32.mrb[4].mxu0 }
  0xef   : > { %867 = vst.msk [vmem:[%s1502_s6 + $0x8] sm:$0xf] %vm864_vm2, %v1085_v13  ;;  %v1099_v8 = vpack.c.bf16 %v720_v24, %v720_v24  ;;  %v1086_v29 = vpack.c.bf16 %v707_v10, %v707_v10  ;;  %v721_v18 = vadd.f32 %v1150_v35, %v625_v11  ;;  %v506_v30 = vadd.f32 %v1219_v16, %v1464_v46  ;;  %v1235_v3 = vpop.f32.mrb[4].mxu1  ;;  %v497_v9 = vpop.f32.mrb[5].mxu0 }
  0xf0   : > { %883 = vst.msk [vmem:[%s1502_s6 + $0x48] sm:$0xf] %vm864_vm2, %v1101_v12  ;;  %865 = vst.msk [vmem:[%s1502_s6] sm:$0xf] %vm864_vm2, %v1083_v14  ;;  %v1102_v19 = vpack.c.bf16 %v723_v25, %v723_v25  ;;  %v1084_v20 = vpack.c.bf16 %v705_v28, %v705_v28  ;;  %v570_v31 = vadd.f32 %v1235_v3, %v1464_v46  ;;  %v561_v17 = vpop.f32.mrb[5].mxu1  ;;  %v1220_v57 = vpop.f32.mrb[6].mxu0 }
  0xf1   : > { %v498_v34 = vadd.f32 %v1464_v46, %v497_v9  ;;  %881 = vst.msk [vmem:[%s1502_s6 + $0x40] sm:$0xf] %vm864_vm2, %v1099_v8  ;;  %868 = vst.msk [vmem:[%s1502_s6 + $0xc] sm:$0xf] %vm864_vm2, %v1086_v29  ;;  %v1100_v21 = vpack.c.bf16 %v721_v18, %v721_v18  ;;  %v614_v35 = vmax.f32 %v506_v30, 0.0  ;;  %v562_v63 = vadd.f32 %v1464_v46, %v561_v17  ;;  %v1236_v62 = vpop.f32.mrb[6].mxu1 }
  0xf2   : > { %v509_v0 = vadd.f32 %v1220_v57, %v1464_v46  ;;  %v500_v4 = vpop.f32.mrb[7].mxu0  ;;  %884 = vst.msk [vmem:[%s1502_s6 + $0x4c] sm:$0xf] %vm864_vm2, %v1102_v19  ;;  %866 = vst.msk [vmem:[%s1502_s6 + $0x4] sm:$0xf] %vm864_vm2, %v1084_v20  ;;  %v630_v5 = vmax.f32 %v570_v31, 0.0  ;;  %v573_v7 = vadd.f32 %v1236_v62, %v1464_v46 }
  0xf3   : > { %v612_v6 = vmax.f32 %v498_v34, 0.0  ;;  %v501_v13 = vadd.f32 %v1464_v46, %v500_v4  ;;  %v564_v24 = vpop.f32.mrb[7].mxu1  ;;  %882 = vst.msk [vmem:[%s1502_s6 + $0x44] sm:$0xf] %vm864_vm2, %v1100_v21  ;;  %v710_v10 = vadd.f32 %v1129_v36, %v614_v35  ;;  %v628_v11 = vmax.f32 %v562_v63, 0.0 }
  0xf4   : > { %v615_v12 = vmax.f32 %v509_v0, 0.0  ;;  %v565_v14 = vadd.f32 %v1464_v46, %v564_v24  ;;  %v726_v25 = vadd.f32 %v1161_v37, %v630_v5  ;;  %v631_v16 = vmax.f32 %v573_v7, 0.0 }
  0xf5   : > { %v708_v28 = vadd.f32 %v1125_v40, %v612_v6  ;;  %v613_v8 = vmax.f32 %v501_v13, 0.0  ;;  %v1089_v29 = vpack.c.bf16 %v710_v10, %v710_v10  ;;  %v724_v18 = vadd.f32 %v1157_v41, %v628_v11 }
  0xf6   : > { %v711_v36 = vadd.f32 %v1130_v42, %v615_v12  ;;  %v629_v30 = vmax.f32 %v565_v14, 0.0  ;;  %v1105_v3 = vpack.c.bf16 %v726_v25, %v726_v25  ;;  %v727_v37 = vadd.f32 %v1162_v43, %v631_v16  ;;  %v1223_v19 = vpop.f32.mrb[8].mxu0 }
  0xf7   : > { %v1087_v9 = vpack.c.bf16 %v708_v28, %v708_v28  ;;  %v709_v40 = vadd.f32 %v1126_v47, %v613_v8  ;;  %871 = vst.msk [vmem:[%s1502_s6 + $0x18] sm:$0xf] %vm864_vm2, %v1089_v29  ;;  %v1103_v20 = vpack.c.bf16 %v724_v18, %v724_v18  ;;  %v522_v42 = vadd.f32 %v1223_v19, %v1464_v46  ;;  %v1239_v31 = vpop.f32.mrb[8].mxu1  ;;  %v513_v34 = vpop.f32.mrb[9].mxu0 }
  0xf8   : > { %v1090_v41 = vpack.c.bf16 %v711_v36, %v711_v36  ;;  %v725_v22 = vadd.f32 %v1158_v48, %v629_v30  ;;  %887 = vst.msk [vmem:[%s1502_s6 + $0x58] sm:$0xf] %vm864_vm2, %v1105_v3  ;;  %v1106_v23 = vpack.c.bf16 %v727_v37, %v727_v37  ;;  %v586_v43 = vadd.f32 %v1239_v31, %v1464_v46  ;;  %v577_v17 = vpop.f32.mrb[9].mxu1  ;;  %v1224_v57 = vpop.f32.mrb[10].mxu0 }
  0xf9   : > { %869 = vst.msk [vmem:[%s1502_s6 + $0x10] sm:$0xf] %vm864_vm2, %v1087_v9  ;;  %v1088_v26 = vpack.c.bf16 %v709_v40, %v709_v40  ;;  %v514_v47 = vadd.f32 %v1464_v46, %v513_v34  ;;  %885 = vst.msk [vmem:[%s1502_s6 + $0x50] sm:$0xf] %vm864_vm2, %v1103_v20  ;;  %v618_v48 = vmax.f32 %v522_v42, 0.0  ;;  %v578_v21 = vadd.f32 %v1464_v46, %v577_v17  ;;  %v1240_v63 = vpop.f32.mrb[10].mxu1 }
  0xfa   : > { %872 = vst.msk [vmem:[%s1502_s6 + $0x1c] sm:$0xf] %vm864_vm2, %v1090_v41  ;;  %v1104_v27 = vpack.c.bf16 %v725_v22, %v725_v22  ;;  %v525_v35 = vadd.f32 %v1224_v57, %v1464_v46  ;;  %v516_v0 = vpop.f32.mrb[11].mxu0  ;;  %888 = vst.msk [vmem:[%s1502_s6 + $0x5c] sm:$0xf] %vm864_vm2, %v1106_v23  ;;  %v634_v62 = vmax.f32 %v586_v43, 0.0  ;;  %v589_v5 = vadd.f32 %v1240_v63, %v1464_v46 }
  0xfb   : > { %870 = vst.msk [vmem:[%s1502_s6 + $0x14] sm:$0xf] %vm864_vm2, %v1088_v26  ;;  %v616_v4 = vmax.f32 %v514_v47, 0.0  ;;  %v517_v6 = vadd.f32 %v1464_v46, %v516_v0  ;;  %v580_v7 = vpop.f32.mrb[11].mxu1  ;;  %v714_v13 = vadd.f32 %v1137_v49, %v618_v48  ;;  %v632_v24 = vmax.f32 %v578_v21, 0.0 }
  0xfc   : > { %886 = vst.msk [vmem:[%s1502_s6 + $0x54] sm:$0xf] %vm864_vm2, %v1104_v27  ;;  %v619_v10 = vmax.f32 %v525_v35, 0.0  ;;  %v581_v11 = vadd.f32 %v1464_v46, %v580_v7  ;;  %v730_v12 = vadd.f32 %v1169_v50, %v634_v62  ;;  %v635_v25 = vmax.f32 %v589_v5, 0.0 }
  0xfd   : > { %v712_v14 = vadd.f32 %v1133_v53, %v616_v4  ;;  %v617_v28 = vmax.f32 %v517_v6, 0.0  ;;  %v1093_v16 = vpack.c.bf16 %v714_v13, %v714_v13  ;;  %v728_v8 = vadd.f32 %v1165_v54, %v632_v24 }
  0xfe   : > { %v715_v49 = vadd.f32 %v1138_v55, %v619_v10  ;;  %v633_v29 = vmax.f32 %v581_v11, 0.0  ;;  %v1109_v18 = vpack.c.bf16 %v730_v12, %v730_v12  ;;  %v731_v50 = vadd.f32 %v1170_v56, %v635_v25  ;;  %v1227_v30 = vpop.f32.mrb[12].mxu0 }
  0xff   : > { %v1091_v36 = vpack.c.bf16 %v712_v14, %v712_v14  ;;  %v713_v53 = vadd.f32 %v1134_v58, %v617_v28  ;;  %875 = vst.msk [vmem:[%s1502_s6 + $0x28] sm:$0xf] %vm864_vm2, %v1093_v16  ;;  %v1107_v3 = vpack.c.bf16 %v728_v8, %v728_v8  ;;  %v538_v55 = vadd.f32 %v1227_v30, %v1464_v46  ;;  %v1243_v9 = vpop.f32.mrb[12].mxu1  ;;  %v529_v37 = vpop.f32.mrb[13].mxu0 }
 0x100   : > { %v1094_v54 = vpack.c.bf16 %v715_v49, %v715_v49  ;;  %v729_v32 = vadd.f32 %v1166_v59, %v633_v29  ;;  %891 = vst.msk [vmem:[%s1502_s6 + $0x68] sm:$0xf] %vm864_vm2, %v1109_v18  ;;  %v1110_v33 = vpack.c.bf16 %v731_v50, %v731_v50  ;;  %v602_v56 = vadd.f32 %v1243_v9, %v1464_v46  ;;  %v593_v40 = vpop.f32.mrb[13].mxu1  ;;  %v1228_v19 = vpop.f32.mrb[14].mxu0 }
 0x101   : > { %873 = vst.msk [vmem:[%s1502_s6 + $0x20] sm:$0xf] %vm864_vm2, %v1091_v36  ;;  %v1092_v38 = vpack.c.bf16 %v713_v53, %v713_v53  ;;  %v530_v58 = vadd.f32 %v1464_v46, %v529_v37  ;;  %889 = vst.msk [vmem:[%s1502_s6 + $0x60] sm:$0xf] %vm864_vm2, %v1107_v3  ;;  %v622_v59 = vmax.f32 %v538_v55, 0.0  ;;  %v594_v20 = vadd.f32 %v1464_v46, %v593_v40  ;;  %v1244_v22 = vpop.f32.mrb[14].mxu1 }
 0x102   : > { %876 = vst.msk [vmem:[%s1502_s6 + $0x2c] sm:$0xf] %vm864_vm2, %v1094_v54  ;;  %v1108_v39 = vpack.c.bf16 %v729_v32, %v729_v32  ;;  %v541_v41 = vadd.f32 %v1228_v19, %v1464_v46  ;;  %v532_v42 = vpop.f32.mrb[15].mxu0  ;;  %892 = vst.msk [vmem:[%s1502_s6 + $0x6c] sm:$0xf] %vm864_vm2, %v1110_v33  ;;  %v638_v31 = vmax.f32 %v602_v56, 0.0  ;;  %v605_v23 = vadd.f32 %v1244_v22, %v1464_v46 }
 0x103   : > { %874 = vst.msk [vmem:[%s1502_s6 + $0x24] sm:$0xf] %vm864_vm2, %v1092_v38  ;;  %v620_v34 = vmax.f32 %v530_v58, 0.0  ;;  %v533_v26 = vadd.f32 %v1464_v46, %v532_v42  ;;  %v596_v43 = vpop.f32.mrb[15].mxu1  ;;  %v718_v47 = vadd.f32 %v1145_v60, %v622_v59  ;;  %v636_v17 = vmax.f32 %v594_v20, 0.0 }
 0x104   : > { %890 = vst.msk [vmem:[%s1502_s6 + $0x64] sm:$0xf] %vm864_vm2, %v1108_v39  ;;  %v623_v57 = vmax.f32 %v541_v41, 0.0  ;;  %v597_v27 = vadd.f32 %v1464_v46, %v596_v43  ;;  %v734_v48 = vadd.f32 %v1177_v61, %v638_v31  ;;  %v639_v35 = vmax.f32 %v605_v23, 0.0 }
 0x105   : > { %v716_v21 = vadd.f32 %v1141_v1, %v620_v34  ;;  %v621_v63 = vmax.f32 %v533_v26, 0.0  ;;  %v1097_v0 = vpack.c.bf16 %v718_v47, %v718_v47  ;;  %v732_v60 = vadd.f32 %v1173_v2, %v636_v17 }
 0x106   : > { %v1668_v62 = vunpack.c.h.bf16 %v1456_v44  ;;  %v637_v46 = vmax.f32 %v597_v27, 0.0  ;;  %v1113_v5 = vpack.c.bf16 %v734_v48, %v734_v48  ;;  %v1669_v6 = vunpack.c.h.bf16 %v1459_v45 }
 0x107   : > { %v1095_v61 = vpack.c.bf16 %v716_v21, %v716_v21  ;;  %v1670_v7 = vunpack.c.h.bf16 %v1471_v51  ;;  %879 = vst.msk [vmem:[%s1502_s6 + $0x38] sm:$0xf] %vm864_vm2, %v1097_v0  ;;  %v1111_v24 = vpack.c.bf16 %v732_v60, %v732_v60 }
 0x108   : > { %v719_v4 = vadd.f32 %v1668_v62, %v623_v57  ;;  %v735_v1 = vadd.f32 %v1669_v6, %v639_v35  ;;  %v733_v44 = vadd.f32 %v1174_v15, %v637_v46  ;;  %895 = vst.msk [vmem:[%s1502_s6 + $0x78] sm:$0xf] %vm864_vm2, %v1113_v5 }
 0x109   : > { %v717_v13 = vadd.f32 %v1670_v7, %v621_v63  ;;  %877 = vst.msk [vmem:[%s1502_s6 + $0x30] sm:$0xf] %vm864_vm2, %v1095_v61  ;;  %893 = vst.msk [vmem:[%s1502_s6 + $0x70] sm:$0xf] %vm864_vm2, %v1111_v24 }
 0x10a   : > { %v1098_v2 = vpack.c.bf16 %v719_v4, %v719_v4  ;;  %v1114_v10 = vpack.c.bf16 %v735_v1, %v735_v1  ;;  %v1112_v45 = vpack.c.bf16 %v733_v44, %v733_v44 }
 0x10b   : > { %v1096_v11 = vpack.c.bf16 %v717_v13, %v717_v13 }
 0x10c   : > { %880 = vst.msk [vmem:[%s1502_s6 + $0x3c] sm:$0xf] %vm864_vm2, %v1098_v2  ;;  %896 = vst.msk [vmem:[%s1502_s6 + $0x7c] sm:$0xf] %vm864_vm2, %v1114_v10 }
 0x10d   : > { %878 = vst.msk [vmem:[%s1502_s6 + $0x34] sm:$0xf] %vm864_vm2, %v1096_v11  ;;  %894 = vst.msk [vmem:[%s1502_s6 + $0x74] sm:$0xf] %vm864_vm2, %v1112_v45 }
 0x10e PF: > { %s14_s17 = sadd.s32 1, %s1311_s17   ;;  %s1671_s15 = smov %s1307_s16 }
 0x10f   : > { %p11_p5 = scmp.ge.s32.totalorder %s14_s17, 4   ;;  %s1672_s16 = smov %s1674_s18 }
 0x111   :  { %13 = sbr.rel (!%p11_p5) target bundleno = 2 (0x2), region = 69 }

// kernel: db_head_forward.14
= control target key start
LH: loop header
LB: loop body
LE: loop exit
PB: predicated region body
PF: predicated region fallthrough
CT: control target
= control target key end

     0   :  { %s1950_s12 = smov 0   ;;  %s1952_s13 = smov 0   ;;  %s2343_s0 = inlined_call_operand.vmem [shape: bf16[2,1,10,10,32], index: 0, kind: input, shape index: {}]   ;;  %s2344_s1 = inlined_call_operand.vmem [shape: bf16[3,3,32,8], index: 1, kind: input, shape index: {}]   ;;  %s2345_s2 = inlined_call_operand.vmem [shape: f32[1,8], index: 2, kind: input, shape index: {}]   ;;  %s2346_s3 = inlined_call_operand.vmem [shape: f32[2,8,8,8], index: 3, kind: output, shape index: {}]  }
   0x1   :  { %s1954_s14 = smov 0  }
   0x2 LB: > { %s25_s15 = sadd.s32 1, %s1924_s13  ;;  %p1493_p0 = scmp.ge.s32.totalorder %s1928_s14, 1  ;;  %s1928_s14 = sphi %s1954_s14, %s13_s14   ;;  %s1924_s13 = sphi %s1952_s13, %s2352_s13   ;;  %s1920_s12 = sphi %s1950_s12, %s2351_s12  }
   0x3   : > { %p27_p1 = scmp.ge.s32.totalorder %s25_s15, 2  ;;  %p157_p2 = scmp.lt.s32.totalorder %s1928_s14, 3 }
   0x5   : > { %s2354_s15 = smov (%p27_p1, %s25_s15), 0  ;;  %p158_p3 = pnand %p1493_p0, %p157_p2 }
   0x6   : > { %v1879_v0 = vld [vmem:[%s2344_s1 + $0x10] sm:$0xff] (!%p158_p3)   ;;  %p189_p4 = scmp.lt.s32.totalorder (!%p158_p3), %s1920_s12, 1  ;;  %v1974_v1 = vld [vmem:[%s2344_s1 + $0x40] sm:$0xff] (!%p158_p3)   ;;  %v1881_v2 = vld [vmem:[%s2344_s1 + $0x18] sm:$0xff] (!%p158_p3)   ;;  %vm233_vm0 = vsmask.f32 (!%p158_p3), 3328 }
   0x7   : > { %161 = sbr.rel (%p158_p3) target bundleno = 329 (0x149), region = 32  ;;  %1678 = vmatprep.subr.bf16.mxu1 (!%p158_p3), %v1879_v0  ;;  %1726 = vmatprep.subr.bf16.mxu0 (!%p158_p3), %v1974_v1  ;;  %v1985_v3 = vld [vmem:[%s2344_s1 + $0x48] sm:$0xff] (!%p158_p3)   ;;  %v1992_v4 = vld [vmem:[%s2344_s1] sm:$0xff] (!%p158_p3)   ;;  %vm234_vm1 = vsmask.f32 (!%p158_p3), 7440  ;;  %v2003_v5 = vld [vmem:[%s2344_s1 + $0x50] sm:$0xff] (!%p158_p3)  }
   0x8   : > { %1679 = vmatpush3.bf16.msra.mxu1 (!%p158_p3), %v1879_v0  ;;  %1727 = vmatpush3.bf16.msra.mxu0 (!%p158_p3), %v1974_v1  ;;  %vm377_vm2 = vcmask (!%p158_p3), 261120   ;;  %vm2049_vm3 = vmor (!%p158_p3), %vm233_vm0, %vm234_vm1  ;;  %vm572_vm4 = vcmask (!%p158_p3), 1042432   ;;  %vm573_vm5 = vcmask (!%p158_p3), 1046532   ;;  %vm1390_vm7 = vcmask (!%p158_p3), 64512  }
   0x9   : > { %1680 = vmatprep.subr.bf16.mxu1 (!%p158_p3), %v1881_v2  ;;  %1728 = vmatprep.subr.bf16.mxu0 (!%p158_p3), %v1985_v3  ;;  %vm2115_vm6 = vmor (!%p158_p3), %vm572_vm4, %vm573_vm5 }
   0xc   : > { %1681 = vmatpush3.bf16.msra.mxu1 (!%p158_p3), %v1881_v2  ;;  %1729 = vmatpush3.bf16.msra.mxu0 (!%p158_p3), %v1985_v3 }
   0xd   : > { %1690 = vmatprep.subr.bf16.mxu1 (!%p158_p3), %v1992_v4  ;;  %1738 = vmatprep.subr.bf16.mxu0 (!%p158_p3), %v2003_v5 }
   0xe   : > { %s2356_s12 = smov (!%p189_p4, %s1920_s12), 1 }
   0xf   : > { %s1854_s24 = smul.u32 80, %s2356_s12  ;;  %s1623_s8 = sshll.u32 %s2356_s12, 6 }
  0x10   : > { %s2316_s11 = scalar_lea.vmem %s2346_s3, %s1623_s8 }
  0x11   : > { %s1998_s29 = scalar_lea.vmem %s2343_s0, %s1854_s24 }
  0x12   : > { %v2006_v6 = vld [vmem:[%s1998_s29] sm:$0xf]  ;;  %v2009_v7 = vld [vmem:[%s1998_s29 + $0x4] sm:$0x1]  ;;  %v2012_v8 = vld [vmem:[%s1998_s29 + $0x8] sm:$0xf] }
  0x13   : > { %v2016_v9 = vld [vmem:[%s1998_s29 + $0xc] sm:$0x1]  ;;  %v237_v10 = vshrl.u32 %v2006_v6, 16  ;;  %v240_v11 = vshll.u32 %v2006_v6, 16  ;;  %v246_v12 = vshll.u32 %v2009_v7, 16  ;;  %v251_v13 = vshrl.u32 %v2012_v8, 16 }
  0x14   : > { %v254_v14 = vshll.u32 %v2012_v8, 16  ;;  %v260_v15 = vshll.u32 %v2016_v9, 16  ;;  %v581_v16 = vrot.slane %v2016_v9, 5  ;;  %v2027_v17 = vld [vmem:[%s1998_s29 + $0x10] sm:$0xf] }
  0x15   : > { %v239_v18 = vrot.slane %v237_v10, 4  ;;  %v242_v19 = vrot.slane %v240_v11, 5  ;;  %v248_v20 = vrot.slane %v246_v12, 5  ;;  %v253_v21 = vrot.slane %v251_v13, 4  ;;  %v2031_v22 = vld [vmem:[%s1998_s29 + $0x14] sm:$0x1] }
  0x16   : > { %v256_v23 = vrot.slane %v254_v14, 5  ;;  %v262_v24 = vrot.slane %v260_v15, 5  ;;  %v2034_v25 = vld [vmem:[%s1998_s29 + $0x18] sm:$0xf]  ;;  %v2037_v26 = vld [vmem:[%s1998_s29 + $0x1c] sm:$0x1] }
  0x17   : > { %v243_v27 = vor.u32 %v242_v19, %v239_v18  ;;  %v2040_v28 = vld [vmem:[%s1998_s29 + $0x20] sm:$0xf]  ;;  %v2043_v29 = vld [vmem:[%s1998_s29 + $0x24] sm:$0x1]  ;;  %v265_v30 = vshrl.u32 %v2027_v17, 16  ;;  %v268_v31 = vshll.u32 %v2027_v17, 16 }
  0x18   : > { %v257_v33 = vor.u32 %v256_v23, %v253_v21  ;;  %v274_v34 = vshll.u32 %v2031_v22, 16  ;;  %v279_v35 = vshrl.u32 %v2034_v25, 16  ;;  %v282_v36 = vshll.u32 %v2034_v25, 16  ;;  %v2061_v49 = vld [vmem:[%s1998_s29 + $0x28] sm:$0xf] }
  0x19   : > { %v244_v37 = vrot.slane %v243_v27, 4  ;;  %v267_v38 = vrot.slane %v265_v30, 4  ;;  %v270_v39 = vrot.slane %v268_v31, 5  ;;  %v288_v40 = vshll.u32 %v2037_v26, 16  ;;  %v2068_v54 = vld [vmem:[%s1998_s29 + $0x2c] sm:$0x1] }
  0x1a   : > { %v258_v41 = vrot.slane %v257_v33, 4  ;;  %v276_v42 = vrot.slane %v274_v34, 5  ;;  %v281_v43 = vrot.slane %v279_v35, 4  ;;  %v284_v44 = vrot.slane %v282_v36, 5  ;;  %v2072_v59 = vld [vmem:[%s1998_s29 + $0x30] sm:$0xf] }
  0x1b   : > { %v249_v45 = vsel %vm2049_vm3, %v244_v37, %v248_v20  ;;  %v271_v46 = vor.u32 %v270_v39, %v267_v38  ;;  %v290_v47 = vrot.slane %v288_v40, 5  ;;  %v293_v48 = vshrl.u32 %v2040_v28, 16  ;;  %v2076_v0 = vld [vmem:[%s1998_s29 + $0x34] sm:$0x1]  ;;  %v2085_v13 = vld [vmem:[%s1998_s29 + $0x38] sm:$0xf] }
  0x1c   : > { %v263_v50 = vsel %vm2049_vm3, %v258_v41, %v262_v24  ;;  %v285_v51 = vor.u32 %v284_v44, %v281_v43  ;;  %v296_v52 = vshll.u32 %v2040_v28, 16  ;;  %v302_v53 = vshll.u32 %v2043_v29, 16  ;;  %v2091_v20 = vld [vmem:[%s1998_s29 + $0x3c] sm:$0x1]  ;;  %v1886_v24 = vld [vmem:[%s2344_s1 + $0x8] sm:$0xff]  }
  0x1d   : > { %v1501_v55 = vcombine.low %v249_v45, %v263_v50  ;;  %v272_v56 = vrot.slane %v271_v46, 4  ;;  %v295_v57 = vrot.slane %v293_v48, 4  ;;  %v585_v58 = vrot.slane %v2031_v22, 5  ;;  %v1885_v40 = vld [vmem:[%s2344_s1 + $0x58] sm:$0xff]  }
  0x1e   : > { %v286_v60 = vrot.slane %v285_v51, 4  ;;  %v298_v61 = vrot.slane %v296_v52, 5  ;;  %v304_v62 = vrot.slane %v302_v53, 5  ;;  %v589_v63 = vrot.slane %v2037_v26, 5  ;;  %v1897_v48 = vld [vmem:[%s2344_s1 + $0x78] sm:$0xff]  }
  0x1f   : > { %1682 = vmatprep.mubr.msk.bf16.mxu1 %vm377_vm2, %v1501_v55  ;;  %v277_v2 = vsel %vm2049_vm3, %v272_v56, %v276_v42  ;;  %v593_v10 = vrot.slane %v2043_v29, 5  ;;  %v307_v11 = vshrl.u32 %v2061_v49, 16  ;;  %v310_v12 = vshll.u32 %v2061_v49, 16 }
  0x20   : > { %v291_v14 = vsel %vm2049_vm3, %v286_v60, %v290_v47  ;;  %v299_v15 = vor.u32 %v298_v61, %v295_v57  ;;  %v1561_v18 = vcombine.low %v263_v50, %v277_v2  ;;  %v316_v19 = vshll.u32 %v2068_v54, 16 }
  0x21   : > { %v2093_v21 = vcombine.low %v277_v2, %v291_v14  ;;  %v309_v22 = vrot.slane %v307_v11, 4  ;;  %v312_v23 = vrot.slane %v310_v12, 5  ;;  %v321_v27 = vshrl.u32 %v2072_v59, 16 }
  0x22   : > { %v300_v30 = vrot.slane %v299_v15, 4  ;;  %1730 = vmatprep.mubr.msk.bf16.mxu0 %vm377_vm2, %v1561_v18  ;;  %v318_v31 = vrot.slane %v316_v19, 5  ;;  %v324_v33 = vshll.u32 %v2072_v59, 16  ;;  %v330_v34 = vshll.u32 %v2076_v0, 16 }
  0x23   : > { %1683 = vmatmul.mubr.msk.bf16.vlgmr.msra.gmra.mrb[0].mxu1 %vm377_vm2, %v2093_v21  ;;  %v313_v35 = vor.u32 %v312_v23, %v309_v22  ;;  %v323_v36 = vrot.slane %v321_v27, 4  ;;  %v335_v37 = vshrl.u32 %v2085_v13, 16  ;;  %v338_v38 = vshll.u32 %v2085_v13, 16 }
  0x24   : > { %v305_v39 = vsel %vm2049_vm3, %v300_v30, %v304_v62  ;;  %1691 = vmatpush3.bf16.msra.mxu1 %v1992_v4  ;;  %v326_v41 = vrot.slane %v324_v33, 5  ;;  %v332_v42 = vrot.slane %v330_v34, 5  ;;  %v344_v43 = vshll.u32 %v2091_v20, 16  ;;  %v2122_v4 = vld [vmem:[%s2344_s1 + $0x20] sm:$0xff]  }
  0x25   : > { %v1562_v44 = vcombine.low %v291_v14, %v305_v39  ;;  %v314_v45 = vrot.slane %v313_v35, 4  ;;  %1692 = vmatprep.subr.bf16.mxu1 %v1886_v24  ;;  %v337_v46 = vrot.slane %v335_v37, 4  ;;  %v340_v47 = vrot.slane %v338_v38, 5  ;;  %v1887_v14 = vld [vmem:[%s2344_s1 + $0x60] sm:$0xff]   ;;  %v1891_v35 = vld [vmem:[%s2344_s1 + $0x68] sm:$0xff]  }
  0x26   : > { %v327_v50 = vor.u32 %v326_v41, %v323_v36  ;;  %v346_v51 = vrot.slane %v344_v43, 5  ;;  %v1522_v52 = vrot.slane %v2012_v8, 9  ;;  %v1523_v53 = vrot.slane %v2027_v17, 9  ;;  %v227_v41 = vld [vmem:[%s1998_s29 + $0x48] sm:$0xf]  ;;  %v1895_v43 = vld [vmem:[%s2344_s1 + $0x70] sm:$0xff]  }
  0x27   : > { %1731 = vmatmul.mubr.msk.bf16.vlgmr.msra.gmra.mrb[0].mxu0 %vm377_vm2, %v1562_v44  ;;  %v2129_v55 = vsel %vm2049_vm3, %v314_v45, %v318_v31  ;;  %v341_v56 = vor.u32 %v340_v47, %v337_v46  ;;  %v1524_v57 = vrot.slane %v2034_v25, 9  ;;  %v1525_v60 = vrot.slane %v2040_v28, 9  ;;  %v2192_v31 = vld [vmem:[%s1998_s29 + $0x44] sm:$0x1] }
  0x28   : > { %1739 = vmatpush3.bf16.msra.mxu0 %v2003_v5  ;;  %v2135_v61 = vcombine.low %v305_v39, %v2129_v55  ;;  %v328_v62 = vrot.slane %v327_v50, 4  ;;  %1693 = vmatpush3.bf16.msra.mxu1 %v1886_v24  ;;  %v2141_v2 = vsel %vm2115_vm6, %v1522_v52, %v581_v16  ;;  %v2145_v11 = vsel %vm2115_vm6, %v1523_v53, %v585_v58  ;;  %v1896_v50 = vld [vmem:[%s2344_s1 + $0x30] sm:$0xff]  }
  0x29   : > { %1740 = vmatprep.subr.bf16.mxu0 %v1885_v40  ;;  %v342_v12 = vrot.slane %v341_v56, 4  ;;  %v1576_v5 = vcombine.low %v2141_v2, %v2145_v11  ;;  %1702 = vmatprep.subr.bf16.mxu1 %v2122_v4  ;;  %v1511_v16 = vcombine.low %v2006_v6, %v2012_v8  ;;  %v1526_v58 = vrot.slane %v2061_v49, 9 }
  0x2a   : > { %1686 = vmatprep.mubr.msk.bf16.mxu1 %vm377_vm2, %v2135_v61  ;;  %v2157_v9 = vsel %vm2049_vm3, %v328_v62, %v332_v42  ;;  %v597_v18 = vrot.slane %v2068_v54, 5  ;;  %v1527_v19 = vrot.slane %v2072_v59, 9  ;;  %v601_v22 = vrot.slane %v2076_v0, 5  ;;  %v2183_v54 = vld [vmem:[%s1998_s29 + $0x40] sm:$0xf] }
  0x2b   : > { %v2164_v15 = vsel %vm2049_vm3, %v342_v12, %v346_v51  ;;  %1742 = vmatprep.mubr.msk.bf16.mxu0 %vm377_vm2, %v1576_v5  ;;  %v590_v24 = vsel %vm2115_vm6, %v1524_v57, %v589_v63  ;;  %v594_v27 = vsel %vm2115_vm6, %v1525_v60, %v593_v10  ;;  %v1528_v29 = vrot.slane %v2085_v13, 9  ;;  %v228_v42 = vld [vmem:[%s1998_s29 + $0x4c] sm:$0x1]  ;;  %v1899_v60 = vld [vmem:[%s2344_s1 + $0x38] sm:$0xff]  }
  0x2c   : > { %1741 = vmatpush3.bf16.msra.mxu0 %v1885_v40  ;;  %v2172_v23 = vcombine.low %v2157_v9, %v2164_v15  ;;  %v598_v0 = vsel %vm2115_vm6, %v1526_v58, %v597_v18  ;;  %v2189_v30 = vsel %vm2115_vm6, %v1527_v19, %v601_v22  ;;  %v1577_v26 = vcombine.low %v590_v24, %v594_v27  ;;  %v1893_v40 = vld [vmem:[%s2344_s1 + $0x28] sm:$0xff]  }
  0x2d   : > { %1750 = vmatprep.subr.bf16.mxu0 %v1887_v14  ;;  %v1578_v63 = vcombine.low %v598_v0, %v2189_v30  ;;  %v605_v10 = vrot.slane %v2091_v20, 5  ;;  %v1571_v33 = vrot.slane %v2183_v54, 9  ;;  %v953_v34 = vrot.slane %v2192_v31, 5 }
  0x2e   : > { %1687 = vmatmul.mubr.msk.bf16.gmra.mrb[4].mxu1 %vm377_vm2, %v2172_v23  ;;  %v1512_v36 = vcombine.low %v2027_v17, %v2034_v25  ;;  %v577_v37 = vrot.slane %v2009_v7, 5  ;;  %v1513_v38 = vcombine.low %v2040_v28, %v2061_v49  ;;  %v1521_v7 = vrot.slane %v2006_v6, 9 }
  0x2f   : > { %1694 = vmatprep.mubr.msk.bf16.mxu1 %vm377_vm2, %v1511_v16  ;;  %v606_v20 = vsel %vm2115_vm6, %v1528_v29, %v605_v10  ;;  %v2216_v39 = vsel %vm2115_vm6, %v1571_v33, %v953_v34  ;;  %v1608_v44 = vrot.slane %v227_v41, 9  ;;  %v1270_v45 = vrot.slane %v228_v42, 5 }
  0x30   : > { %v1579_v46 = vcombine.low %v606_v20, %v2216_v39  ;;  %v578_v47 = vsel %vm2115_vm6, %v1521_v7, %v577_v37  ;;  %v1534_v52 = vcombine.low %v2145_v11, %v590_v24  ;;  %v1535_v53 = vcombine.low %v594_v27, %v598_v0  ;;  %v1900_v11 = vld [vmem:[%s2344_s1 + $0x80] sm:$0xff]  }
  0x31   : > { %v2233_v6 = vsel %vm2115_vm6, %v1608_v44, %v1270_v45  ;;  %v1533_v51 = vcombine.low %v578_v47, %v2141_v2  ;;  %v1159_v56 = vshrl.u32 %v227_v41, 16  ;;  %v1162_v57 = vshll.u32 %v227_v41, 16 }
  0x32   : > { %v830_v62 = vshrl.u32 %v2183_v54, 16  ;;  %v833_v2 = vshll.u32 %v2183_v54, 16  ;;  %v1590_v12 = vcombine.low %v2183_v54, %v227_v41  ;;  %v1536_v18 = vcombine.low %v2189_v30, %v606_v20 }
  0x33   : > { %1743 = vmatmul.mubr.msk.bf16.vlgmr.msra.gmra.mrb[0].mxu0 %vm377_vm2, %v1577_v26  ;;  %v1161_v16 = vrot.slane %v1159_v56, 4  ;;  %v1164_v58 = vrot.slane %v1162_v57, 5  ;;  %v1547_v19 = vcombine.low %v2012_v8, %v2027_v17  ;;  %v839_v24 = vshll.u32 %v2192_v31, 16  ;;  %v1903_v8 = vld [vmem:[%s2344_s1 + $0x88] sm:$0xff]  }
  0x34   : > { %1751 = vmatpush3.bf16.msra.mxu0 %v1887_v14  ;;  %1746 = vmatprep.mubr.msk.bf16.mxu0 %vm377_vm2, %v1578_v63  ;;  %v832_v5 = vrot.slane %v830_v62, 4  ;;  %v835_v14 = vrot.slane %v833_v2, 5  ;;  %v1168_v0 = vshll.u32 %v228_v42, 16  ;;  %v1548_v17 = vcombine.low %v2034_v25, %v2040_v28 }
  0x35   : > { %1752 = vmatprep.subr.bf16.mxu0 %v1891_v35  ;;  %v1165_v27 = vor.u32 %v1164_v58, %v1161_v16  ;;  %v841_v26 = vrot.slane %v839_v24, 5  ;;  %v1550_v28 = vcombine.low %v2085_v13, %v2183_v54  ;;  %v1563_v32 = vcombine.low %v2129_v55, %v2157_v9  ;;  %v1620_v9 = vld [vmem:[%s2345_s2] ss:$0 sm:$0xff] }
  0x36   : > { %1695 = vmatmul.mubr.msk.bf16.vlgmr.msra.gmra.mrb[0].mxu1 %vm377_vm2, %v1512_v36  ;;  %v836_v22 = vor.u32 %v835_v14, %v832_v5  ;;  %v1170_v63 = vrot.slane %v1168_v0, 5 }
  0x37   : > { %1703 = vmatpush3.bf16.msra.mxu1 %v2122_v4  ;;  %1698 = vmatprep.mubr.msk.bf16.mxu1 %vm377_vm2, %v1513_v38  ;;  %v1514_v4 = vcombine.low %v2072_v59, %v2085_v13  ;;  %v1166_v29 = vrot.slane %v1165_v27, 4 }
  0x38   : > { %1753 = vmatpush3.bf16.msra.mxu0 %v1891_v35  ;;  %1704 = vmatprep.subr.bf16.mxu1 %v1893_v40  ;;  %v837_v30 = vrot.slane %v836_v22, 4 }
  0x39   : > { %1762 = vmatprep.subr.bf16.mxu0 %v1895_v43  ;;  %v1171_v10 = vsel %vm2049_vm3, %v1166_v29, %v1170_v63 }
  0x3a   : > { %v842_v31 = vsel %vm2049_vm3, %v837_v30, %v841_v26 }
  0x3b   : > { %1747 = vmatmul.mubr.msk.bf16.gmra.mrb[4].mxu0 %vm377_vm2, %v1579_v46  ;;  %1705 = vmatpush3.bf16.msra.mxu1 %v1893_v40  ;;  %v1601_v25 = vcombine.low %v842_v31, %v1171_v10 }
  0x3c   : > { %1754 = vmatprep.mubr.msk.bf16.mxu0 %vm377_vm2, %v1512_v36  ;;  %1714 = vmatprep.subr.bf16.mxu1 %v1896_v50 }
  0x3e   : > { %1699 = vmatmul.mubr.msk.bf16.gmra.mrb[4].mxu1 %vm377_vm2, %v1514_v4 }
  0x3f   : > { %1706 = vmatprep.mubr.msk.bf16.mxu1 %vm377_vm2, %v1533_v51 }
  0x43   : > { %1755 = vmatmul.mubr.msk.bf16.vlgmr.msra.gmra.mrb[0].mxu0 %vm377_vm2, %v1513_v38 }
  0x44   : > { %1763 = vmatpush3.bf16.msra.mxu0 %v1895_v43  ;;  %1758 = vmatprep.mubr.msk.bf16.mxu0 %vm377_vm2, %v1514_v4 }
  0x45   : > { %1764 = vmatprep.subr.bf16.mxu0 %v1897_v48 }
  0x46   : > { %1707 = vmatmul.mubr.msk.bf16.vlgmr.msra.gmra.mrb[0].mxu1 %vm377_vm2, %v1534_v52 }
  0x47   : > { %1715 = vmatpush3.bf16.msra.mxu1 %v1896_v50  ;;  %1710 = vmatprep.mubr.msk.bf16.mxu1 %vm377_vm2, %v1535_v53 }
  0x48   : > { %1765 = vmatpush3.bf16.msra.mxu0 %v1897_v48  ;;  %1716 = vmatprep.subr.bf16.mxu1 %v1899_v60 }
  0x49   : > { %1774 = vmatprep.subr.bf16.mxu0 %v1900_v11 }
  0x4b   : > { %1759 = vmatmul.mubr.msk.bf16.gmra.mrb[4].mxu0 %vm377_vm2, %v1590_v12  ;;  %1717 = vmatpush3.bf16.msra.mxu1 %v1899_v60 }
  0x4c   : > { %1766 = vmatprep.mubr.msk.bf16.mxu0 %vm377_vm2, %v2093_v21  ;;  %1786 = vmatprep.subr.bf16.mxu1 %v1974_v1  ;;  %v1549_v21 = vcombine.low %v2061_v49, %v2072_v59  ;;  %v1613_v49 = vcombine.low %v2216_v39, %v2233_v6 }
  0x4e   : > { %1711 = vmatmul.mubr.msk.bf16.gmra.mrb[4].mxu1 %vm377_vm2, %v1536_v18 }
  0x4f   : > { %1718 = vmatprep.mubr.msk.bf16.mxu1 %vm377_vm2, %v1547_v19 }
  0x53   : > { %1767 = vmatmul.mubr.msk.bf16.vlgmr.msra.gmra.mrb[0].mxu0 %vm377_vm2, %v2135_v61 }
  0x54   : > { %1775 = vmatpush3.bf16.msra.mxu0 %v1900_v11  ;;  %1770 = vmatprep.mubr.msk.bf16.mxu0 %vm377_vm2, %v2172_v23 }
  0x55   : > { %1776 = vmatprep.subr.bf16.mxu0 %v1903_v8 }
  0x56   : > { %1719 = vmatmul.mubr.msk.bf16.vlgmr.msra.gmra.mrb[0].mxu1 %vm377_vm2, %v1548_v17 }
  0x57   : > { %1788 = vmatpush3.bf16.msra.mxu1 %v1974_v1  ;;  %1722 = vmatprep.mubr.msk.bf16.mxu1 %vm377_vm2, %v1549_v21  ;;  %v1564_v1 = vcombine.low %v2164_v15, %v842_v31 }
  0x58   : > { %1777 = vmatpush3.bf16.msra.mxu0 %v1903_v8  ;;  %1787 = vmatprep.subr.bf16.mxu1 %v1985_v3 }
  0x5b   : > { %1771 = vmatmul.mubr.msk.bf16.gmra.mrb[4].mxu0 %vm377_vm2, %v1601_v25  ;;  %1789 = vmatpush3.bf16.msra.mxu1 %v1985_v3 }
  0x5c   : > { %1778 = vmatprep.mubr.msk.bf16.mxu0 %vm377_vm2, %v1534_v52 }
  0x5e   : > { %1723 = vmatmul.mubr.msk.bf16.gmra.mrb[4].mxu1 %vm377_vm2, %v1550_v28 }
  0x5f   : > { %1734 = vmatprep.mubr.msk.bf16.mxu1 %vm377_vm2, %v1563_v32 }
  0x63   : > { %1779 = vmatmul.mubr.msk.bf16.vlgmr.msra.gmra.mrb[0].mxu0 %vm377_vm2, %v1535_v53 }
  0x64   : > { %1782 = vmatprep.mubr.msk.bf16.mxu0 %vm377_vm2, %v1536_v18 }
  0x6a   : > { %1735 = vmatmul.mubr.msk.bf16.vlgmr.msra.gmra.mrb[4].mxu1 %vm377_vm2, %v1564_v1 }
  0x6b   : > { %1783 = vmatmul.mubr.msk.bf16.gmra.mrb[4].mxu0 %vm377_vm2, %v1613_v49 }
 0x129   : > { %v1720_v3 = vpop.f32.mrb[0].mxu1 }
 0x12a   : > { %v790_v59 = vpop.f32.mrb[1].mxu1 }
 0x12b   : > { %v1721_v13 = vpop.f32.mrb[2].mxu1 }
 0x12c   : > { %v793_v55 = vpop.f32.mrb[3].mxu1 }
 0x136   : > { %v1780_v61 = vpop.f32.mrb[0].mxu0 }
 0x137   : > { %v1790_v23 = vadd.f32 %v1780_v61, %v1720_v3  ;;  %v1328_v54 = vpop.f32.mrb[1].mxu0 }
 0x138   : > { %v1791_v15 = vadd.f32 %v1328_v54, %v790_v59  ;;  %v1781_v33 = vpop.f32.mrb[2].mxu0 }
 0x139   : > { %v1376_v34 = vadd.f32 %v1790_v23, %v1620_v9  ;;  %v1792_v35 = vadd.f32 %v1781_v33, %v1721_v13  ;;  %v1331_v36 = vpop.f32.mrb[3].mxu0 }
 0x13a   : > { %v1374_v37 = vadd.f32 %v1791_v15, %v1620_v9  ;;  %v1793_v38 = vadd.f32 %v1331_v36, %v793_v55 }
 0x13b   : > { %v1384_v20 = vmax.f32 %v1376_v34, 0.0  ;;  %v1377_v39 = vadd.f32 %v1792_v35, %v1620_v9 }
 0x13c   : > { %v1382_v40 = vmax.f32 %v1374_v37, 0.0  ;;  %v1375_v7 = vadd.f32 %v1793_v38, %v1620_v9 }
 0x13d   : > { %1393 = vst.msk [vmem:[%s2316_s11 + $0x10] sm:$0xff] %vm1390_vm7, %v1384_v20  ;;  %v1385_v41 = vmax.f32 %v1377_v39, 0.0  ;;  %v1736_v42 = vpop.f32.mrb[4].mxu1 }
 0x13e   : > { %1391 = vst.msk [vmem:[%s2316_s11] sm:$0xff] %vm1390_vm7, %v1382_v40  ;;  %v1383_v43 = vmax.f32 %v1375_v7, 0.0  ;;  %v1784_v44 = vpop.f32.mrb[4].mxu0  ;;  %v927_v45 = vpop.f32.mrb[5].mxu1 }
 0x13f   : > { %1394 = vst.msk [vmem:[%s2316_s11 + $0x18] sm:$0xff] %vm1390_vm7, %v1385_v41  ;;  %v1794_v46 = vadd.f32 %v1784_v44, %v1736_v42  ;;  %v1344_v6 = vpop.f32.mrb[5].mxu0  ;;  %v1737_v47 = vpop.f32.mrb[6].mxu1 }
 0x140   : > { %1392 = vst.msk [vmem:[%s2316_s11 + $0x8] sm:$0xff] %vm1390_vm7, %v1383_v43  ;;  %v1795_v50 = vadd.f32 %v1344_v6, %v927_v45  ;;  %v1785_v4 = vpop.f32.mrb[6].mxu0  ;;  %v930_v51 = vpop.f32.mrb[7].mxu1 }
 0x141   : > { %v1380_v48 = vadd.f32 %v1794_v46, %v1620_v9  ;;  %v1796_v52 = vadd.f32 %v1785_v4, %v1737_v47  ;;  %v1347_v53 = vpop.f32.mrb[7].mxu0 }
 0x142   : > { %v1378_v56 = vadd.f32 %v1795_v50, %v1620_v9  ;;  %v1797_v57 = vadd.f32 %v1347_v53, %v930_v51 }
 0x143   : > { %v1388_v60 = vmax.f32 %v1380_v48, 0.0  ;;  %v1381_v62 = vadd.f32 %v1796_v52, %v1620_v9 }
 0x144   : > { %v1386_v2 = vmax.f32 %v1378_v56, 0.0  ;;  %v1379_v11 = vadd.f32 %v1797_v57, %v1620_v9 }
 0x145   : > { %1397 = vst.msk [vmem:[%s2316_s11 + $0x30] sm:$0xff] %vm1390_vm7, %v1388_v60  ;;  %v1389_v12 = vmax.f32 %v1381_v62, 0.0 }
 0x146   : > { %1395 = vst.msk [vmem:[%s2316_s11 + $0x20] sm:$0xff] %vm1390_vm7, %v1386_v2  ;;  %v1387_v5 = vmax.f32 %v1379_v11, 0.0 }
 0x147   : > { %1398 = vst.msk [vmem:[%s2316_s11 + $0x38] sm:$0xff] %vm1390_vm7, %v1389_v12 }
 0x148   : > { %1396 = vst.msk [vmem:[%s2316_s11 + $0x28] sm:$0xff] %vm1390_vm7, %v1387_v5 }
 0x149 PF: > { %s13_s14 = sadd.s32 1, %s1928_s14   ;;  %s2351_s12 = smov %s1924_s13 }
 0x14a   : > { %p10_p5 = scmp.ge.s32.totalorder %s13_s14, 4   ;;  %s2352_s13 = smov %s2354_s15 }
 0x14c   :  { %12 = sbr.rel (!%p10_p5) target bundleno = 2 (0x2), region = 70 }

// kernel: db_head_forward.12
= control target key start
LH: loop header
LB: loop body
LE: loop exit
PB: predicated region body
PF: predicated region fallthrough
CT: control target
= control target key end

     0   :  { %s1368_s12 = smov 0   ;;  %s1370_s13 = smov 0   ;;  %s1569_s0 = inlined_call_operand.vmem [shape: bf16[2,1,4,4,32], index: 0, kind: input, shape index: {}]   ;;  %s1570_s1 = inlined_call_operand.vmem [shape: bf16[3,3,32,8], index: 1, kind: input, shape index: {}]   ;;  %s1571_s2 = inlined_call_operand.vmem [shape: f32[1,8], index: 2, kind: input, shape index: {}]   ;;  %s1572_s3 = inlined_call_operand.vmem [shape: f32[2,2,2,8], index: 3, kind: output, shape index: {}]  }
   0x1   :  { %s1372_s14 = smov 0  }
   0x2 LB: > { %s25_s15 = sadd.s32 1, %s1338_s13  ;;  %p1099_p0 = scmp.ge.s32.totalorder %s1342_s14, 1  ;;  %s1342_s14 = sphi %s1372_s14, %s13_s14   ;;  %s1338_s13 = sphi %s1370_s13, %s1576_s13   ;;  %s1334_s12 = sphi %s1368_s12, %s1575_s12  }
   0x3   : > { %p27_p1 = scmp.ge.s32.totalorder %s25_s15, 2  ;;  %p157_p2 = scmp.lt.s32.totalorder %s1342_s14, 3 }
   0x5   : > { %s1578_s15 = smov (%p27_p1, %s25_s15), 0  ;;  %p158_p3 = pnand %p1099_p0, %p157_p2 }
   0x6   : > { %v1302_v0 = vld [vmem:[%s1570_s1 + $0x10] sm:$0xff] (!%p158_p3)   ;;  %v1344_v1 = vmov (!%p158_p3), 0.0   ;;  %v1303_v2 = vld [vmem:[%s1570_s1] sm:$0xff] (!%p158_p3)   ;;  %v222_v3 = vlaneseq (!%p158_p3)  ;;  %v1304_v4 = vld [vmem:[%s1570_s1 + $0x18] sm:$0xff] (!%p158_p3)   ;;  %vm1345_vm0 = vmmov (!%p158_p3), 0   ;;  %p189_p4 = scmp.lt.s32.totalorder (!%p158_p3), %s1334_s12, 1 }
   0x7   : > { %161 = sbr.rel (%p158_p3) target bundleno = 286 (0x11e), region = 32  ;;  %1202 = vmatprep.subr.bf16.mxu0 (!%p158_p3), %v1344_v1  ;;  %1210 = vmatprep.subr.bf16.mxu1 (!%p158_p3), %v1344_v1  ;;  %v1305_v5 = vld [vmem:[%s1570_s1 + $0x8] sm:$0xff] (!%p158_p3)   ;;  %vm235_vm1 = vsmask.f32 (!%p158_p3), 256  ;;  %v1346_v6 = vmov (!%p158_p3), 1966171168  }
   0x8   : > { %1203 = vmatpush3.bf16.msra.mxu0 (!%p158_p3), %v1302_v0  ;;  %1206 = vmatprep.mubr.msk.bf16.mxu0 (!%p158_p3), %vm1345_vm0, %v1344_v1  ;;  %v220_v7 = vunpack.c.l.s4 (!%p158_p3), %v1346_v6  ;;  %v1408_v8 = vshrl.u32 (!%p158_p3), %v222_v3, 7  ;;  %vm236_vm2 = vsmask.f32 (!%p158_p3), 1284  ;;  %vm238_vm3 = vsmask.f32 (!%p158_p3), 2312  ;;  %v1307_v25 = vld [vmem:[%s1570_s1 + $0x30] sm:$0xff] (!%p158_p3)  }
   0x9   : > { %1211 = vmatpush3.bf16.msra.mxu1 (!%p158_p3), %v1303_v2  ;;  %1204 = vmatprep.subr.bf16.mxu0 (!%p158_p3), %v1344_v1  ;;  %vm237_vm4 = vmor (!%p158_p3), %vm235_vm1, %vm236_vm2  ;;  %vm240_vm5 = vsmask.f32 (!%p158_p3), 3340  ;;  %vm242_vm7 = vsmask.f32 (!%p158_p3), 4368  ;;  %vm244_vm8 = vsmask.f32 (!%p158_p3), 5396 }
   0xa   : > { %1212 = vmatprep.subr.bf16.mxu1 (!%p158_p3), %v1344_v1  ;;  %1214 = vmatprep.mubr.msk.bf16.mxu1 (!%p158_p3), %vm1345_vm0, %v1344_v1  ;;  %v221_v9 = vunpack.c.0.s8 (!%p158_p3), %v220_v7  ;;  %vm239_vm6 = vmor (!%p158_p3), %vm237_vm4, %vm238_vm3  ;;  %vm246_vm10 = vsmask.f32 (!%p158_p3), 6424  ;;  %vm248_vm13 = vsmask.f32 (!%p158_p3), 7452  ;;  %vm300_vm1 = vcmask (!%p158_p3), 261120   ;;  %v1309_v35 = vld [vmem:[%s1570_s1 + $0x38] sm:$0xff] (!%p158_p3)  }
   0xb   : > { %vm241_vm9 = vmor (!%p158_p3), %vm239_vm6, %vm240_vm5  ;;  %v1306_v39 = vld [vmem:[%s1570_s1 + $0x20] sm:$0xff] (!%p158_p3)   ;;  %v1311_v48 = vld [vmem:[%s1570_s1 + $0x50] sm:$0xff] (!%p158_p3)  }
   0xc   : > { %1205 = vmatpush3.bf16.msra.mxu0 (!%p158_p3), %v1304_v4  ;;  %v1419_v13 = vsub.s32 (!%p158_p3), %v221_v9, %v1408_v8  ;;  %vm243_vm11 = vmor (!%p158_p3), %vm241_vm9, %vm242_vm7  ;;  %v1308_v51 = vld [vmem:[%s1570_s1 + $0x28] sm:$0xff] (!%p158_p3)   ;;  %v1313_v54 = vld [vmem:[%s1570_s1 + $0x58] sm:$0xff] (!%p158_p3)  }
   0xd   : > { %1213 = vmatpush3.bf16.msra.mxu1 (!%p158_p3), %v1305_v5  ;;  %1218 = vmatprep.subr.bf16.mxu0 (!%p158_p3), %v1344_v1  ;;  %vm245_vm12 = vmor (!%p158_p3), %vm243_vm11, %vm244_vm8  ;;  %v1310_v57 = vld [vmem:[%s1570_s1 + $0x40] sm:$0xff] (!%p158_p3)   ;;  %v1315_v60 = vld [vmem:[%s1570_s1 + $0x70] sm:$0xff] (!%p158_p3)  }
   0xe   : > { %s1580_s12 = smov (!%p189_p4, %s1334_s12), 1  ;;  %1226 = vmatprep.subr.bf16.mxu1 %v1344_v1  ;;  %vm247_vm14 = vmor %vm245_vm12, %vm246_vm10  ;;  %v1312_v62 = vld [vmem:[%s1570_s1 + $0x48] sm:$0xff]   ;;  %v1317_v0 = vld [vmem:[%s1570_s1 + $0x78] sm:$0xff]  }
   0xf   : > { %s1173_s24 = sshll.u32 %s1580_s12, 3  ;;  %vm1430_vm15 = vmor %vm247_vm14, %vm248_vm13  ;;  %v1314_v4 = vld [vmem:[%s1570_s1 + $0x60] sm:$0xff]   ;;  %v1316_v7 = vld [vmem:[%s1570_s1 + $0x68] sm:$0xff]   ;;  %s1174_s8 = sshll.u32 %s1580_s12, 2 }
  0x10   : > { %s197_s27 = scalar_lea.vmem %s1569_s0, %s1173_s24  ;;  %s206_s11 = scalar_lea.vmem %s1572_s3, %s1174_s8 }
  0x11   : > { %v209_v10 = vld [vmem:[%s197_s27] sm:$0x3]  ;;  %v210_v11 = vld [vmem:[%s197_s27 + $0x2] sm:$0x3]  ;;  %v1416_v12 = vld [vmem:[%s197_s27 + $0x4] sm:$0x3] }
  0x12   : > { %v344_v14 = vcombine.low %v209_v10, %v210_v11  ;;  %v225_v15 = vrot.slane %v209_v10, %v1419_v13  ;;  %v233_v16 = vrot.slane %v210_v11, %v1419_v13  ;;  %v1423_v17 = vld [vmem:[%s197_s27 + $0x6] sm:$0x3]  ;;  %v1427_v18 = vrot.slane %v1416_v12, %v1419_v13 }
  0x13   : > { %v496_v26 = vcombine.low %v210_v11, %v1416_v12  ;;  %v1440_v29 = vrot.slane %v1423_v17, %v1419_v13  ;;  %v742_v3 = vcombine.low %v1416_v12, %v1423_v17  ;;  %v1318_v11 = vld [vmem:[%s1570_s1 + $0x80] sm:$0xff]  }
  0x14   : > { %v351_v19 = vrot.slane %v344_v14, %v1419_v13  ;;  %v226_v20 = vcombine.high %v225_v15, %v225_v15  ;;  %v234_v21 = vcombine.high %v233_v16, %v233_v16  ;;  %v251_v22 = vshrl.u32 %v225_v15, 16  ;;  %v1319_v14 = vld [vmem:[%s1570_s1 + $0x88] sm:$0xff]  }
  0x15   : > { %v260_v23 = vshrl.u32 %v233_v16, 16  ;;  %v574_v33 = vcombine.high %v1427_v18, %v1427_v18  ;;  %v503_v36 = vrot.slane %v496_v26, %v1419_v13  ;;  %v820_v37 = vcombine.high %v1440_v29, %v1440_v29 }
  0x16   : > { %v256_v27 = vshll.u32 %v226_v20, 16  ;;  %v265_v28 = vshll.u32 %v234_v21, 16  ;;  %v358_v30 = vrot.slane %v351_v19, %v1419_v13  ;;  %v1120_v40 = vcombine.high %v225_v15, %v233_v16 }
  0x17   : > { %v576_v41 = vshrl.u32 %v1427_v18, 16  ;;  %v581_v42 = vshll.u32 %v574_v33, 16  ;;  %v822_v44 = vshrl.u32 %v1440_v29, 16  ;;  %v510_v45 = vrot.slane %v503_v36, %v1419_v13 }
  0x18   : > { %v258_v31 = vsel %vm1430_vm15, %v251_v22, %v256_v27  ;;  %v267_v32 = vsel %vm1430_vm15, %v260_v23, %v265_v28  ;;  %1215 = vmatmul.mubr.msk.bf16.vlgmr.msra.gmra.mrb[0].mxu1 %vm300_vm1, %v358_v30  ;;  %v1143_v46 = vcombine.high %v233_v16, %v1427_v18  ;;  %v827_v47 = vshll.u32 %v820_v37, 16 }
  0x19   : > { %v273_v34 = vcombine.low %v258_v31, %v267_v32  ;;  %1227 = vmatpush3.bf16.msra.mxu1 %v1307_v25  ;;  %1230 = vmatprep.mubr.msk.bf16.mxu1 %vm1345_vm0, %v1344_v1  ;;  %v426_v49 = vrot.slane %v1120_v40, %v1419_v13  ;;  %v583_v50 = vsel %vm1430_vm15, %v576_v41, %v581_v42 }
  0x1a   : > { %1228 = vmatprep.subr.bf16.mxu1 %v1344_v1  ;;  %v672_v52 = vrot.slane %v1143_v46, %v1419_v13  ;;  %v829_v53 = vsel %vm1430_vm15, %v822_v44, %v827_v47  ;;  %v589_v55 = vcombine.low %v267_v32, %v583_v50  ;;  %v749_v6 = vrot.slane %v742_v3, %v1419_v13 }
  0x1b   : > { %v280_v38 = vrot.slane %v273_v34, %v1419_v13  ;;  %v433_v56 = vrot.slane %v426_v49, %v1419_v13  ;;  %v835_v58 = vcombine.low %v583_v50, %v829_v53  ;;  %v1166_v10 = vcombine.high %v1427_v18, %v1440_v29 }
  0x1c   : > { %v679_v59 = vrot.slane %v672_v52, %v1419_v13  ;;  %v596_v61 = vrot.slane %v589_v55, %v1419_v13  ;;  %v756_v9 = vrot.slane %v749_v6, %v1419_v13  ;;  %v1347_v53 = vmov 1983009808  }
  0x1d   : > { %v287_v43 = vrot.slane %v280_v38, %v1419_v13  ;;  %1229 = vmatpush3.bf16.msra.mxu1 %v1309_v35  ;;  %v842_v63 = vrot.slane %v835_v58, %v1419_v13  ;;  %v918_v12 = vrot.slane %v1166_v10, %v1419_v13 }
  0x1e   : > { %1242 = vmatprep.subr.bf16.mxu1 %v1344_v1  ;;  %v603_v2 = vrot.slane %v596_v61, %v1419_v13 }
  0x1f   : > { %1207 = vmatmul.mubr.msk.bf16.vlgmr.msra.gmra.mrb[0].mxu0 %vm300_vm1, %v287_v43  ;;  %v849_v5 = vrot.slane %v842_v63, %v1419_v13  ;;  %v925_v15 = vrot.slane %v918_v12, %v1419_v13 }
  0x20   : > { %1219 = vmatpush3.bf16.msra.mxu0 %v1306_v39  ;;  %1222 = vmatprep.mubr.msk.bf16.mxu0 %vm1345_vm0, %v1344_v1 }
  0x21   : > { %1220 = vmatprep.subr.bf16.mxu0 %v1344_v1  ;;  %1231 = vmatmul.mubr.msk.bf16.vlgmr.msra.gmra.mrb[4].mxu1 %vm300_vm1, %v510_v45 }
  0x22   : > { %1243 = vmatpush3.bf16.msra.mxu1 %v1311_v48  ;;  %1246 = vmatprep.mubr.msk.bf16.mxu1 %vm1345_vm0, %v1344_v1 }
  0x23   : > { %1244 = vmatprep.subr.bf16.mxu1 %v1344_v1 }
  0x24   : > { %1221 = vmatpush3.bf16.msra.mxu0 %v1308_v51 }
  0x25   : > { %1234 = vmatprep.subr.bf16.mxu0 %v1344_v1 }
  0x26   : > { %1245 = vmatpush3.bf16.msra.mxu1 %v1313_v54  ;;  %v993_v54 = vunpack.c.l.s4 %v1347_v53 }
  0x27   : > { %1223 = vmatmul.mubr.msk.bf16.vlgmr.msra.gmra.mrb[4].mxu0 %vm300_vm1, %v433_v56  ;;  %1258 = vmatprep.subr.bf16.mxu1 %v1344_v1 }
  0x28   : > { %1235 = vmatpush3.bf16.msra.mxu0 %v1310_v57  ;;  %1238 = vmatprep.mubr.msk.bf16.mxu0 %vm1345_vm0, %v1344_v1  ;;  %v994_v55 = vunpack.c.0.s8 %v993_v54  ;;  %v1170_v57 = vld [vmem:[%s1571_s2] ss:$0 sm:$0xff] }
  0x29   : > { %1236 = vmatprep.subr.bf16.mxu0 %v1344_v1  ;;  %1247 = vmatmul.mubr.msk.bf16.vlgmr.msra.gmra.mrb[8].mxu1 %vm300_vm1, %v679_v59 }
  0x2a   : > { %1259 = vmatpush3.bf16.msra.mxu1 %v1315_v60  ;;  %1262 = vmatprep.mubr.msk.bf16.mxu1 %vm1345_vm0, %v1344_v1 }
  0x2b   : > { %1260 = vmatprep.subr.bf16.mxu1 %v1344_v1 }
  0x2c   : > { %1237 = vmatpush3.bf16.msra.mxu0 %v1312_v62  ;;  %v997_v62 = vsub.s32 %v994_v55, %v1408_v8 }
  0x2d   : > { %1250 = vmatprep.subr.bf16.mxu0 %v1344_v1 }
  0x2e   : > { %1261 = vmatpush3.bf16.msra.mxu1 %v1317_v0 }
  0x2f   : > { %1239 = vmatmul.mubr.msk.bf16.vlgmr.msra.gmra.mrb[8].mxu0 %vm300_vm1, %v603_v2 }
  0x30   : > { %1251 = vmatpush3.bf16.msra.mxu0 %v1314_v4  ;;  %1254 = vmatprep.mubr.msk.bf16.mxu0 %vm1345_vm0, %v1344_v1 }
  0x31   : > { %1252 = vmatprep.subr.bf16.mxu0 %v1344_v1  ;;  %1263 = vmatmul.mubr.msk.bf16.vlgmr.msra.gmra.mrb[12].mxu1 %vm300_vm1, %v849_v5 }
  0x34   : > { %1253 = vmatpush3.bf16.msra.mxu0 %v1316_v7 }
  0x35   : > { %1266 = vmatprep.subr.bf16.mxu0 %v1344_v1 }
  0x37   : > { %1255 = vmatmul.mubr.msk.bf16.vlgmr.msra.gmra.mrb[12].mxu0 %vm300_vm1, %v756_v9 }
  0x38   : > { %1267 = vmatpush3.bf16.msra.mxu0 %v1318_v11  ;;  %1270 = vmatprep.mubr.msk.bf16.mxu0 %vm1345_vm0, %v1344_v1  ;;  %vm1002_vm0 = vcmask 58368  }
  0x39   : > { %1268 = vmatprep.subr.bf16.mxu0 %v1344_v1 }
  0x3c   : > { %1269 = vmatpush3.bf16.msra.mxu0 %v1319_v14 }
  0x3f   : > { %1271 = vmatmul.mubr.msk.bf16.vlgmr.msra.gmra.mrb[16].mxu0 %vm300_vm1, %v925_v15 }
  0xeb   : > { %v408_v16 = vpop.f32.mrb[0].mxu1 }
  0xec   : > { %v1216_v17 = vpop.f32.mrb[1].mxu1 }
  0xed   : > { %v411_v18 = vpop.f32.mrb[2].mxu1 }
  0xee   : > { %v1217_v19 = vpop.f32.mrb[3].mxu1 }
  0xf2   : > { %v338_v20 = vpop.f32.mrb[0].mxu0 }
  0xf3   : > { %v409_v21 = vadd.f32 %v408_v16, %v338_v20  ;;  %v1208_v22 = vpop.f32.mrb[1].mxu0 }
  0xf4   : > { %v341_v23 = vpop.f32.mrb[2].mxu0  ;;  %v560_v24 = vpop.f32.mrb[4].mxu1 }
  0xf5   : > { %v1209_v25 = vpop.f32.mrb[3].mxu0  ;;  %v1232_v26 = vpop.f32.mrb[5].mxu1 }
  0xf6   : > { %v563_v27 = vpop.f32.mrb[6].mxu1 }
  0xf7   : > { %v1233_v28 = vpop.f32.mrb[7].mxu1 }
  0xfa   : > { %v483_v29 = vpop.f32.mrb[4].mxu0 }
  0xfb   : > { %v489_v1 = vadd.f32 %v483_v29, %v409_v21  ;;  %v1224_v30 = vpop.f32.mrb[5].mxu0 }
  0xfc   : > { %v486_v13 = vpop.f32.mrb[6].mxu0  ;;  %v729_v31 = vpop.f32.mrb[8].mxu1 }
  0xfd   : > { %v566_v32 = vadd.f32 %v560_v24, %v489_v1  ;;  %v1225_v33 = vpop.f32.mrb[7].mxu0  ;;  %v1248_v34 = vpop.f32.mrb[9].mxu1 }
  0xfe   : > { %v732_v35 = vpop.f32.mrb[10].mxu1 }
  0xff   : > { %v1249_v36 = vpop.f32.mrb[11].mxu1 }
 0x102   : > { %v653_v37 = vpop.f32.mrb[8].mxu0 }
 0x103   : > { %v659_v38 = vadd.f32 %v653_v37, %v566_v32  ;;  %v1240_v39 = vpop.f32.mrb[9].mxu0 }
 0x104   : > { %v656_v40 = vpop.f32.mrb[10].mxu0  ;;  %v899_v41 = vpop.f32.mrb[12].mxu1 }
 0x105   : > { %v735_v42 = vadd.f32 %v729_v31, %v659_v38  ;;  %v1241_v43 = vpop.f32.mrb[11].mxu0  ;;  %v1264_v44 = vpop.f32.mrb[13].mxu1 }
 0x106   : > { %v902_v45 = vpop.f32.mrb[14].mxu1 }
 0x107   : > { %v1265_v46 = vpop.f32.mrb[15].mxu1 }
 0x10a   : > { %v806_v47 = vpop.f32.mrb[12].mxu0 }
 0x10b   : > { %v812_v48 = vadd.f32 %v806_v47, %v735_v42  ;;  %v1256_v49 = vpop.f32.mrb[13].mxu0 }
 0x10c   : > { %v809_v50 = vpop.f32.mrb[14].mxu0 }
 0x10d   : > { %v905_v51 = vadd.f32 %v899_v41, %v812_v48  ;;  %v1257_v52 = vpop.f32.mrb[15].mxu0 }
 0x112   : > { %v975_v56 = vpop.f32.mrb[16].mxu0 }
 0x113   : > { %v981_v58 = vadd.f32 %v975_v56, %v905_v51  ;;  %v1272_v59 = vpop.f32.mrb[17].mxu0 }
 0x114   : > { %v978_v60 = vpop.f32.mrb[18].mxu0 }
 0x115   : > { %v989_v61 = vadd.f32 %v1170_v57, %v981_v58  ;;  %v1273_v63 = vpop.f32.mrb[19].mxu0 }
 0x117   : > { %v990_v0 = vmax.f32 %v989_v61, 0.0 }
 0x119   : > { %v998_v2 = vrot.slane %v990_v0, %v997_v62 }
 0x11b   : > { %v999_v3 = vcombine.high %v998_v2, %v998_v2  ;;  %1003 = vst.msk [vmem:[%s206_s11] sm:$0x3] %vm1002_vm0, %v998_v2 }
 0x11d   : > { %1004 = vst.msk [vmem:[%s206_s11 + $0x2] sm:$0x3] %vm1002_vm0, %v999_v3 }
 0x11e PF: > { %s13_s14 = sadd.s32 1, %s1342_s14   ;;  %s1575_s12 = smov %s1338_s13 }
 0x11f   : > { %p10_p5 = scmp.ge.s32.totalorder %s13_s14, 4   ;;  %s1576_s13 = smov %s1578_s15 }
 0x121   :  { %12 = sbr.rel (!%p10_p5) target bundleno = 2 (0x2), region = 70 }

// kernel: db_head_forward.13
= control target key start
LH: loop header
LB: loop body
LE: loop exit
PB: predicated region body
PF: predicated region fallthrough
CT: control target
= control target key end

     0   :  { %s1469_s12 = smov 0   ;;  %s1471_s13 = smov 0   ;;  %s1789_s0 = inlined_call_operand.vmem [shape: bf16[2,1,6,6,32], index: 0, kind: input, shape index: {}]   ;;  %s1790_s1 = inlined_call_operand.vmem [shape: bf16[3,3,32,8], index: 1, kind: input, shape index: {}]   ;;  %s1791_s2 = inlined_call_operand.vmem [shape: f32[1,8], index: 2, kind: input, shape index: {}]   ;;  %s1792_s3 = inlined_call_operand.vmem [shape: f32[2,4,4,8], index: 3, kind: output, shape index: {}]  }
   0x1   :  { %s1473_s14 = smov 0  }
   0x2 LB: > { %s25_s15 = sadd.s32 1, %s1440_s13  ;;  %p1199_p0 = scmp.ge.s32.totalorder %s1444_s14, 1  ;;  %s1444_s14 = sphi %s1473_s14, %s13_s14   ;;  %s1440_s13 = sphi %s1471_s13, %s1798_s13   ;;  %s1436_s12 = sphi %s1469_s12, %s1797_s12  }
   0x3   : > { %p27_p1 = scmp.ge.s32.totalorder %s25_s15, 2  ;;  %p157_p2 = scmp.lt.s32.totalorder %s1444_s14, 3 }
   0x5   : > { %s1800_s15 = smov (%p27_p1, %s25_s15), 0  ;;  %p158_p3 = pnand %p1199_p0, %p157_p2 }
   0x6   : > { %v1399_v0 = vld [vmem:[%s1790_s1 + $0x10] sm:$0xff] (!%p158_p3)   ;;  %v1446_v1 = vmov (!%p158_p3), 0.0   ;;  %v1400_v2 = vld [vmem:[%s1790_s1] sm:$0xff] (!%p158_p3)   ;;  %v226_v3 = vlaneseq (!%p158_p3)  ;;  %v1401_v4 = vld [vmem:[%s1790_s1 + $0x18] sm:$0xff] (!%p158_p3)   ;;  %vm1447_vm0 = vmmov (!%p158_p3), 0   ;;  %p189_p4 = scmp.lt.s32.totalorder (!%p158_p3), %s1436_s12, 1 }
   0x7   : > { %161 = sbr.rel (%p158_p3) target bundleno = 297 (0x129), region = 32  ;;  %1299 = vmatprep.subr.bf16.mxu0 (!%p158_p3), %v1446_v1  ;;  %1307 = vmatprep.subr.bf16.mxu1 (!%p158_p3), %v1446_v1  ;;  %v1402_v5 = vld [vmem:[%s1790_s1 + $0x8] sm:$0xff] (!%p158_p3)   ;;  %v1448_v6 = vmov (!%p158_p3), 1983009808   ;;  %vm255_vm1 = vsmask.f32 (!%p158_p3), 1280 }
   0x8   : > { %1300 = vmatpush3.bf16.msra.mxu0 (!%p158_p3), %v1399_v0  ;;  %1303 = vmatprep.mubr.msk.bf16.mxu0 (!%p158_p3), %vm1447_vm0, %v1446_v1  ;;  %v224_v7 = vunpack.c.l.s4 (!%p158_p3), %v1448_v6  ;;  %v227_v8 = vshrl.u32 (!%p158_p3), %v226_v3, 7  ;;  %vm256_vm2 = vsmask.f32 (!%p158_p3), 3336  ;;  %vm258_vm3 = vsmask.f32 (!%p158_p3), 5392 }
   0x9   : > { %1308 = vmatpush3.bf16.msra.mxu1 (!%p158_p3), %v1400_v2  ;;  %1301 = vmatprep.subr.bf16.mxu0 (!%p158_p3), %v1446_v1  ;;  %vm260_vm4 = vsmask.f32 (!%p158_p3), 7448  ;;  %vm470_vm5 = vcmask (!%p158_p3), 1040384   ;;  %vm471_vm6 = vcmask (!%p158_p3), 1042434   ;;  %vm257_vm7 = vmor (!%p158_p3), %vm255_vm1, %vm256_vm2  ;;  %vm473_vm8 = vcmask (!%p158_p3), 1044484  }
   0xa   : > { %1309 = vmatprep.subr.bf16.mxu1 (!%p158_p3), %v1446_v1  ;;  %1311 = vmatprep.mubr.msk.bf16.mxu1 (!%p158_p3), %vm1447_vm0, %v1446_v1  ;;  %v225_v9 = vunpack.c.0.s8 (!%p158_p3), %v224_v7  ;;  %vm259_vm9 = vmor (!%p158_p3), %vm257_vm7, %vm258_vm3  ;;  %vm352_vm11 = vcmask (!%p158_p3), 261120   ;;  %vm475_vm13 = vcmask (!%p158_p3), 1046534  }
   0xb   : > { %vm1581_vm10 = vmor (!%p158_p3), %vm259_vm9, %vm260_vm4 }
   0xc   : > { %1302 = vmatpush3.bf16.msra.mxu0 (!%p158_p3), %v1401_v4  ;;  %v1521_v13 = vsub.s32 (!%p158_p3), %v225_v9, %v227_v8  ;;  %vm472_vm12 = vmor (!%p158_p3), %vm470_vm5, %vm471_vm6 }
   0xd   : > { %1310 = vmatpush3.bf16.msra.mxu1 (!%p158_p3), %v1402_v5  ;;  %1315 = vmatprep.subr.bf16.mxu0 (!%p158_p3), %v1446_v1  ;;  %vm474_vm14 = vmor (!%p158_p3), %vm472_vm12, %vm473_vm8 }
   0xe   : > { %s1802_s12 = smov (!%p189_p4, %s1436_s12), 1  ;;  %1323 = vmatprep.subr.bf16.mxu1 %v1446_v1  ;;  %vm1637_vm15 = vmor %vm474_vm14, %vm475_vm13 }
   0xf   : > { %s1371_s24 = smul.u32 24, %s1802_s12  ;;  %s1271_s8 = sshll.u32 %s1802_s12, 4 }
  0x10   : > { %s206_s11 = scalar_lea.vmem %s1792_s3, %s1271_s8 }
  0x11   : > { %s197_s27 = scalar_lea.vmem %s1789_s0, %s1371_s24 }
  0x12   : > { %v1515_v10 = vld [vmem:[%s197_s27] sm:$0x7]  ;;  %v1517_v11 = vld [vmem:[%s197_s27 + $0x4] sm:$0x7]  ;;  %v1519_v12 = vld [vmem:[%s197_s27 + $0x8] sm:$0x7] }
  0x13   : > { %v1523_v14 = vld [vmem:[%s197_s27 + $0xc] sm:$0x7]  ;;  %v1525_v15 = vld [vmem:[%s197_s27 + $0x10] sm:$0x7]  ;;  %v1529_v16 = vrot.slane %v1515_v10, %v1521_v13  ;;  %v1533_v17 = vrot.slane %v1517_v11, %v1521_v13  ;;  %v1537_v18 = vrot.slane %v1519_v12, %v1521_v13  ;;  %v397_v21 = vcombine.low %v1515_v10, %v1517_v11  ;;  %v1567_v26 = vld [vmem:[%s197_s27 + $0x14] sm:$0x7] }
  0x14   : > { %v1541_v19 = vrot.slane %v1523_v14, %v1521_v13  ;;  %v1545_v20 = vrot.slane %v1525_v15, %v1521_v13  ;;  %v1589_v51 = vrot.slane %v1567_v26, %v1521_v13  ;;  %v398_v55 = vcombine.low %v1519_v12, %v1523_v14 }
  0x15   : > { %v1551_v22 = vcombine.high %v1529_v16, %v1529_v16  ;;  %v1555_v23 = vcombine.high %v1533_v17, %v1533_v17  ;;  %v1559_v24 = vcombine.high %v1537_v18, %v1537_v18  ;;  %v263_v27 = vshrl.u32 %v1529_v16, 16 }
  0x16   : > { %v1563_v25 = vcombine.high %v1541_v19, %v1541_v19  ;;  %v266_v28 = vshll.u32 %v1529_v16, 16  ;;  %v277_v29 = vshrl.u32 %v1533_v17, 16  ;;  %v280_v30 = vshll.u32 %v1533_v17, 16 }
  0x17   : > { %v272_v31 = vshll.u32 %v1551_v22, 16  ;;  %v286_v32 = vshll.u32 %v1555_v23, 16  ;;  %v291_v33 = vshrl.u32 %v1537_v18, 16  ;;  %v294_v34 = vshll.u32 %v1537_v18, 16 }
  0x18   : > { %v265_v35 = vrot.slane %v263_v27, 6  ;;  %v268_v36 = vrot.slane %v266_v28, 7  ;;  %v279_v37 = vrot.slane %v277_v29, 6  ;;  %v282_v38 = vrot.slane %v280_v30, 7 }
  0x19   : > { %v274_v39 = vrot.slane %v272_v31, 7  ;;  %v288_v40 = vrot.slane %v286_v32, 7  ;;  %v293_v41 = vrot.slane %v291_v33, 6  ;;  %v296_v42 = vrot.slane %v294_v34, 7  ;;  %v1407_v33 = vld [vmem:[%s1790_s1 + $0x30] sm:$0xff]  }
  0x1a   : > { %v269_v43 = vor.u32 %v268_v36, %v265_v35  ;;  %v283_v44 = vor.u32 %v282_v38, %v279_v37  ;;  %v300_v45 = vshll.u32 %v1559_v24, 16  ;;  %v305_v46 = vshrl.u32 %v1541_v19, 16 }
  0x1b   : > { %v297_v48 = vor.u32 %v296_v42, %v293_v41  ;;  %v308_v49 = vshll.u32 %v1541_v19, 16  ;;  %v314_v50 = vshll.u32 %v1563_v25, 16  ;;  %v663_v59 = vshrl.u32 %v1545_v20, 16 }
  0x1c   : > { %v270_v52 = vrot.slane %v269_v43, 2  ;;  %v284_v53 = vrot.slane %v283_v44, 2  ;;  %v307_v54 = vrot.slane %v305_v46, 6  ;;  %v302_v57 = vrot.slane %v300_v45, 7 }
  0x1d   : > { %v298_v56 = vrot.slane %v297_v48, 2  ;;  %v310_v58 = vrot.slane %v308_v49, 7  ;;  %v1602_v62 = vcombine.high %v1545_v20, %v1545_v20  ;;  %v666_v63 = vshll.u32 %v1545_v20, 16 }
  0x1e   : > { %v275_v60 = vsel %vm1581_vm10, %v270_v52, %v274_v39  ;;  %v1598_v61 = vsel %vm1581_vm10, %v284_v53, %v288_v40  ;;  %v316_v2 = vrot.slane %v314_v50, 7  ;;  %v665_v3 = vrot.slane %v663_v59, 6 }
  0x1f   : > { %v311_v0 = vor.u32 %v310_v58, %v307_v54  ;;  %v323_v4 = vcombine.low %v275_v60, %v1598_v61  ;;  %v668_v5 = vrot.slane %v666_v63, 7  ;;  %v405_v6 = vrot.slane %v397_v21, %v1521_v13  ;;  %v1413_v63 = vld [vmem:[%s1790_s1 + $0x50] sm:$0xff]  }
  0x20   : > { %v1611_v7 = vsel %vm1581_vm10, %v298_v56, %v302_v57  ;;  %v922_v9 = vshrl.u32 %v1589_v51, 16  ;;  %v925_v10 = vshll.u32 %v1589_v51, 16  ;;  %v672_v28 = vshll.u32 %v1602_v62, 16 }
  0x21   : > { %v312_v8 = vrot.slane %v311_v0, 2  ;;  %v669_v27 = vor.u32 %v668_v5, %v665_v3  ;;  %v1619_v29 = vcombine.high %v1589_v51, %v1589_v51  ;;  %v1622_v21 = vrot.slane %v398_v55, %v1521_v13 }
  0x22   : > { %v924_v31 = vrot.slane %v922_v9, 6  ;;  %v927_v32 = vrot.slane %v925_v10, 7  ;;  %v1213_v34 = vrot.slane %v1529_v16, 9  ;;  %v331_v36 = vrot.slane %v323_v4, %v1521_v13  ;;  %v1415_v10 = vld [vmem:[%s1790_s1 + $0x58] sm:$0xff]  }
  0x23   : > { %v1626_v30 = vsel %vm1581_vm10, %v312_v8, %v316_v2  ;;  %v413_v37 = vcombine.low %v405_v6, %v1622_v21  ;;  %v479_v39 = vrot.slane %v1551_v22, 7  ;;  %v1214_v40 = vrot.slane %v1533_v17, 9  ;;  %v1406_v17 = vld [vmem:[%s1790_s1 + $0x20] sm:$0xff]  }
  0x24   : > { %v324_v35 = vcombine.low %v1611_v7, %v1626_v30  ;;  %v579_v41 = vcombine.low %v1517_v11, %v1519_v12  ;;  %v931_v42 = vshll.u32 %v1619_v29, 16  ;;  %v483_v43 = vrot.slane %v1555_v23, 7 }
  0x25   : > { %1312 = vmatmul.mubr.msk.bf16.vlgmr.msra.gmra.mrb[0].mxu1 %vm352_vm11, %v413_v37  ;;  %v1215_v44 = vrot.slane %v1537_v18, 9  ;;  %v670_v45 = vrot.slane %v669_v27, 2  ;;  %v674_v46 = vrot.slane %v672_v28, 7  ;;  %v928_v48 = vor.u32 %v927_v32, %v924_v31  ;;  %v1409_v18 = vld [vmem:[%s1790_s1 + $0x38] sm:$0xff]   ;;  %v1414_v31 = vld [vmem:[%s1790_s1 + $0x48] sm:$0xff]   ;;  %v1416_v37 = vld [vmem:[%s1790_s1 + $0x60] sm:$0xff]  }
  0x26   : > { %v1646_v16 = vrot.slane %v324_v35, %v1521_v13  ;;  %1324 = vmatpush3.bf16.msra.mxu1 %v1407_v33  ;;  %v480_v11 = vsel %vm1637_vm15, %v1213_v34, %v479_v39  ;;  %1327 = vmatprep.mubr.msk.bf16.mxu1 %vm1447_vm0, %v1446_v1  ;;  %v484_v22 = vsel %vm1637_vm15, %v1214_v40, %v483_v43  ;;  %v487_v23 = vrot.slane %v1559_v24, 7  ;;  %v1417_v33 = vld [vmem:[%s1790_s1 + $0x70] sm:$0xff]  }
  0x27   : > { %1325 = vmatprep.subr.bf16.mxu1 %v1446_v1  ;;  %v1216_v49 = vrot.slane %v1541_v19, 9  ;;  %v491_v50 = vrot.slane %v1563_v25, 7  ;;  %v498_v52 = vcombine.low %v480_v11, %v484_v22  ;;  %v580_v53 = vcombine.low %v1523_v14, %v1525_v15  ;;  %v1408_v19 = vld [vmem:[%s1790_s1 + $0x28] sm:$0xff]  }
  0x28   : > { %v339_v12 = vcombine.low %v331_v36, %v1646_v16  ;;  %v933_v54 = vrot.slane %v931_v42, 7  ;;  %v488_v55 = vsel %vm1637_vm15, %v1215_v44, %v487_v23  ;;  %v587_v56 = vrot.slane %v579_v41, %v1521_v13  ;;  %v1421_v44 = vld [vmem:[%s1790_s1 + $0x88] sm:$0xff]  }
  0x29   : > { %v675_v57 = vsel %vm1581_vm10, %v670_v45, %v674_v46  ;;  %v492_v14 = vsel %vm1637_vm15, %v1216_v49, %v491_v50  ;;  %v594_v24 = vrot.slane %v580_v53, %v1521_v13  ;;  %v1238_v25 = vrot.slane %v1545_v20, 9 }
  0x2a   : > { %1304 = vmatmul.mubr.msk.bf16.vlgmr.msra.gmra.mrb[0].mxu0 %vm352_vm11, %v339_v12  ;;  %v929_v58 = vrot.slane %v928_v48, 2  ;;  %1326 = vmatpush3.bf16.msra.mxu1 %v1409_v18  ;;  %v499_v59 = vcombine.low %v488_v55, %v492_v14  ;;  %v506_v60 = vrot.slane %v498_v52, %v1521_v13  ;;  %v758_v0 = vrot.slane %v1602_v62, 7  ;;  %v1410_v62 = vld [vmem:[%s1790_s1 + $0x40] sm:$0xff]  }
  0x2b   : > { %1316 = vmatpush3.bf16.msra.mxu0 %v1406_v17  ;;  %1319 = vmatprep.mubr.msk.bf16.mxu0 %vm1447_vm0, %v1446_v1  ;;  %v595_v2 = vcombine.low %v587_v56, %v594_v24  ;;  %v765_v3 = vcombine.low %v484_v22, %v488_v55  ;;  %v681_v20 = vcombine.low %v1598_v61, %v1611_v7  ;;  %v1260_v39 = vrot.slane %v1589_v51, 9 }
  0x2c   : > { %1317 = vmatprep.subr.bf16.mxu0 %v1446_v1  ;;  %1339 = vmatprep.subr.bf16.mxu1 %v1446_v1  ;;  %v682_v4 = vcombine.low %v1626_v30, %v675_v57  ;;  %v1697_v5 = vrot.slane %v499_v59, %v1521_v13  ;;  %v759_v6 = vsel %vm1637_vm15, %v1238_v25, %v758_v0  ;;  %v1009_v40 = vrot.slane %v1619_v29, 7  ;;  %v1418_v29 = vld [vmem:[%s1790_s1 + $0x68] sm:$0xff]  }
  0x2d   : > { %1328 = vmatmul.mubr.msk.bf16.vlgmr.msra.gmra.mrb[4].mxu1 %vm352_vm11, %v595_v2  ;;  %v766_v8 = vcombine.low %v492_v14, %v759_v6  ;;  %v773_v9 = vrot.slane %v765_v3, %v1521_v13  ;;  %v934_v61 = vsel %vm1581_vm10, %v929_v58, %v933_v54  ;;  %v689_v47 = vrot.slane %v681_v20, %v1521_v13 }
  0x2e   : > { %v514_v7 = vcombine.low %v506_v60, %v1697_v5  ;;  %1340 = vmatpush3.bf16.msra.mxu1 %v1413_v63  ;;  %1343 = vmatprep.mubr.msk.bf16.mxu1 %vm1447_vm0, %v1446_v1  ;;  %v696_v28 = vrot.slane %v682_v4, %v1521_v13  ;;  %v940_v30 = vcombine.low %v675_v57, %v934_v61 }
  0x2f   : > { %1318 = vmatpush3.bf16.msra.mxu0 %v1408_v19  ;;  %1341 = vmatprep.subr.bf16.mxu1 %v1446_v1  ;;  %v780_v27 = vrot.slane %v766_v8, %v1521_v13  ;;  %v846_v34 = vcombine.low %v1525_v15, %v1567_v26  ;;  %v1419_v15 = vld [vmem:[%s1790_s1 + $0x78] sm:$0xff]   ;;  %v1010_v41 = vsel %vm1637_vm15, %v1260_v39, %v1009_v40 }
  0x30   : > { %1331 = vmatprep.subr.bf16.mxu0 %v1446_v1  ;;  %v697_v35 = vcombine.low %v689_v47, %v696_v28  ;;  %v947_v36 = vrot.slane %v940_v30, %v1521_v13  ;;  %v1016_v43 = vcombine.low %v759_v6, %v1010_v41 }
  0x31   : > { %v781_v32 = vcombine.low %v773_v9, %v780_v27  ;;  %v853_v26 = vrot.slane %v846_v34, %v1521_v13  ;;  %v1268_v34 = vld [vmem:[%s1791_s2] ss:$0 sm:$0xff] }
  0x32   : > { %1320 = vmatmul.mubr.msk.bf16.vlgmr.msra.gmra.mrb[4].mxu0 %vm352_vm11, %v514_v7  ;;  %1342 = vmatpush3.bf16.msra.mxu1 %v1415_v10  ;;  %v948_v51 = vcombine.low %v1646_v16, %v947_v36  ;;  %v1420_v16 = vld [vmem:[%s1790_s1 + $0x80] sm:$0xff]   ;;  %v1023_v38 = vrot.slane %v1016_v43, %v1521_v13 }
  0x33   : > { %1332 = vmatpush3.bf16.msra.mxu0 %v1410_v62  ;;  %1335 = vmatprep.mubr.msk.bf16.mxu0 %vm1447_vm0, %v1446_v1  ;;  %v854_v42 = vcombine.low %v1622_v21, %v853_v26 }
  0x34   : > { %1333 = vmatprep.subr.bf16.mxu0 %v1446_v1  ;;  %1355 = vmatprep.subr.bf16.mxu1 %v1446_v1  ;;  %v1024_v21 = vcombine.low %v1697_v5, %v1023_v38 }
  0x35   : > { %1344 = vmatmul.mubr.msk.bf16.vlgmr.msra.gmra.mrb[8].mxu1 %vm352_vm11, %v781_v32 }
  0x36   : > { %1356 = vmatpush3.bf16.msra.mxu1 %v1417_v33  ;;  %1359 = vmatprep.mubr.msk.bf16.mxu1 %vm1447_vm0, %v1446_v1 }
  0x37   : > { %1334 = vmatpush3.bf16.msra.mxu0 %v1414_v31  ;;  %1357 = vmatprep.subr.bf16.mxu1 %v1446_v1 }
  0x38   : > { %1347 = vmatprep.subr.bf16.mxu0 %v1446_v1 }
  0x3a   : > { %1336 = vmatmul.mubr.msk.bf16.vlgmr.msra.gmra.mrb[8].mxu0 %vm352_vm11, %v697_v35  ;;  %1358 = vmatpush3.bf16.msra.mxu1 %v1419_v15 }
  0x3b   : > { %1348 = vmatpush3.bf16.msra.mxu0 %v1416_v37  ;;  %1351 = vmatprep.mubr.msk.bf16.mxu0 %vm1447_vm0, %v1446_v1 }
  0x3c   : > { %1349 = vmatprep.subr.bf16.mxu0 %v1446_v1 }
  0x3d   : > { %1360 = vmatmul.mubr.msk.bf16.vlgmr.msra.gmra.mrb[12].mxu1 %vm352_vm11, %v948_v51 }
  0x3f   : > { %1350 = vmatpush3.bf16.msra.mxu0 %v1418_v29 }
  0x40   : > { %1363 = vmatprep.subr.bf16.mxu0 %v1446_v1 }
  0x42   : > { %1352 = vmatmul.mubr.msk.bf16.vlgmr.msra.gmra.mrb[12].mxu0 %vm352_vm11, %v854_v42 }
  0x43   : > { %1364 = vmatpush3.bf16.msra.mxu0 %v1420_v16  ;;  %1367 = vmatprep.mubr.msk.bf16.mxu0 %vm1447_vm0, %v1446_v1  ;;  %vm1100_vm0 = vcmask 60416  }
  0x44   : > { %1365 = vmatprep.subr.bf16.mxu0 %v1446_v1 }
  0x47   : > { %1366 = vmatpush3.bf16.msra.mxu0 %v1421_v44 }
  0x4a   : > { %1368 = vmatmul.mubr.msk.bf16.vlgmr.msra.gmra.mrb[16].mxu0 %vm352_vm11, %v1024_v21 }
  0xf8   : > { %v463_v45 = vpop.f32.mrb[0].mxu1 }
  0xf9   : > { %v1313_v46 = vpop.f32.mrb[1].mxu1 }
  0xfa   : > { %v466_v48 = vpop.f32.mrb[2].mxu1 }
  0xfb   : > { %v1314_v17 = vpop.f32.mrb[3].mxu1 }
  0xfd   : > { %v390_v13 = vpop.f32.mrb[0].mxu0 }
  0xfe   : > { %v464_v11 = vadd.f32 %v463_v45, %v390_v13  ;;  %v1305_v12 = vpop.f32.mrb[1].mxu0 }
  0xff   : > { %v393_v18 = vpop.f32.mrb[2].mxu0 }
 0x100   : > { %v467_v22 = vadd.f32 %v466_v48, %v393_v18  ;;  %v1306_v23 = vpop.f32.mrb[3].mxu0  ;;  %v645_v49 = vpop.f32.mrb[4].mxu1 }
 0x101   : > { %v1329_v50 = vpop.f32.mrb[5].mxu1 }
 0x102   : > { %v648_v52 = vpop.f32.mrb[6].mxu1 }
 0x103   : > { %v1330_v1 = vpop.f32.mrb[7].mxu1 }
 0x105   : > { %v564_v53 = vpop.f32.mrb[4].mxu0 }
 0x106   : > { %v571_v54 = vadd.f32 %v564_v53, %v464_v11  ;;  %v1321_v55 = vpop.f32.mrb[5].mxu0 }
 0x107   : > { %v567_v56 = vpop.f32.mrb[6].mxu0 }
 0x108   : > { %v572_v57 = vadd.f32 %v567_v56, %v467_v22  ;;  %v652_v19 = vadd.f32 %v645_v49, %v571_v54  ;;  %v1322_v14 = vpop.f32.mrb[7].mxu0  ;;  %v831_v25 = vpop.f32.mrb[8].mxu1 }
 0x109   : > { %v1345_v58 = vpop.f32.mrb[9].mxu1 }
 0x10a   : > { %v653_v24 = vadd.f32 %v648_v52, %v572_v57  ;;  %v834_v59 = vpop.f32.mrb[10].mxu1 }
 0x10b   : > { %v1346_v63 = vpop.f32.mrb[11].mxu1 }
 0x10d   : > { %v747_v60 = vpop.f32.mrb[8].mxu0 }
 0x10e   : > { %v754_v0 = vadd.f32 %v747_v60, %v652_v19  ;;  %v1337_v2 = vpop.f32.mrb[9].mxu0 }
 0x10f   : > { %v750_v3 = vpop.f32.mrb[10].mxu0 }
 0x110   : > { %v755_v20 = vadd.f32 %v750_v3, %v653_v24  ;;  %v838_v4 = vadd.f32 %v831_v25, %v754_v0  ;;  %v1338_v5 = vpop.f32.mrb[11].mxu0  ;;  %v998_v62 = vpop.f32.mrb[12].mxu1 }
 0x111   : > { %v1361_v8 = vpop.f32.mrb[13].mxu1 }
 0x112   : > { %v839_v6 = vadd.f32 %v834_v59, %v755_v20  ;;  %v1001_v9 = vpop.f32.mrb[14].mxu1 }
 0x113   : > { %v1362_v7 = vpop.f32.mrb[15].mxu1 }
 0x115   : > { %v904_v61 = vpop.f32.mrb[12].mxu0 }
 0x116   : > { %v911_v10 = vadd.f32 %v904_v61, %v838_v4  ;;  %v1353_v27 = vpop.f32.mrb[13].mxu0 }
 0x117   : > { %v907_v47 = vpop.f32.mrb[14].mxu0 }
 0x118   : > { %v912_v28 = vadd.f32 %v907_v47, %v839_v6  ;;  %v1005_v30 = vadd.f32 %v998_v62, %v911_v10  ;;  %v1354_v31 = vpop.f32.mrb[15].mxu0 }
 0x11a   : > { %v1006_v32 = vadd.f32 %v1001_v9, %v912_v28 }
 0x11d   : > { %v1074_v33 = vpop.f32.mrb[16].mxu0 }
 0x11e   : > { %v1081_v35 = vadd.f32 %v1074_v33, %v1005_v30  ;;  %v1369_v36 = vpop.f32.mrb[17].mxu0 }
 0x11f   : > { %v1077_v37 = vpop.f32.mrb[18].mxu0 }
 0x120   : > { %v1090_v39 = vadd.f32 %v1268_v34, %v1081_v35  ;;  %v1082_v40 = vadd.f32 %v1077_v37, %v1006_v32  ;;  %v1370_v15 = vpop.f32.mrb[19].mxu0 }
 0x122   : > { %v1092_v26 = vmax.f32 %v1090_v39, 0.0  ;;  %v1091_v51 = vadd.f32 %v1268_v34, %v1082_v40 }
 0x124   : > { %v1096_v29 = vcombine.high %v1092_v26, %v1092_v26  ;;  %1101 = vst.msk [vmem:[%s206_s11] sm:$0xf] %vm1100_vm0, %v1092_v26  ;;  %v1093_v41 = vmax.f32 %v1091_v51, 0.0 }
 0x126   : > { %1102 = vst.msk [vmem:[%s206_s11 + $0x4] sm:$0xf] %vm1100_vm0, %v1096_v29  ;;  %v1097_v42 = vcombine.high %v1093_v41, %v1093_v41  ;;  %1103 = vst.msk [vmem:[%s206_s11 + $0x8] sm:$0xf] %vm1100_vm0, %v1093_v41 }
 0x128   : > { %1104 = vst.msk [vmem:[%s206_s11 + $0xc] sm:$0xf] %vm1100_vm0, %v1097_v42 }
 0x129 PF: > { %s13_s14 = sadd.s32 1, %s1444_s14   ;;  %s1797_s12 = smov %s1440_s13 }
 0x12a   : > { %p10_p5 = scmp.ge.s32.totalorder %s13_s14, 4   ;;  %s1798_s13 = smov %s1800_s15 }
 0x12c   :  { %12 = sbr.rel (!%p10_p5) target bundleno = 2 (0x2), region = 70 }

// kernel: db_head_forward.15
= control target key start
LH: loop header
LB: loop body
LE: loop exit
PB: predicated region body
PF: predicated region fallthrough
CT: control target
= control target key end

     0   :  { %s4367_s12 = smov 0   ;;  %s4369_s13 = smov 0   ;;  %s5474_s0 = inlined_call_operand.vmem [shape: bf16[2,1,18,18,32], index: 0, kind: input, shape index: {}]   ;;  %s5475_s1 = inlined_call_operand.vmem [shape: bf16[3,3,32,8], index: 1, kind: input, shape index: {}]   ;;  %s5476_s2 = inlined_call_operand.vmem [shape: f32[1,8], index: 2, kind: input, shape index: {}]   ;;  %s5477_s3 = inlined_call_operand.vmem [shape: f32[2,16,16,8], index: 3, kind: output, shape index: {}]  }
   0x1   :  { %s4371_s14 = smov 0  }
   0x2 LB: > { %s25_s15 = sadd.s32 1, %s4341_s13  ;;  %p3237_p0 = scmp.ge.s32.totalorder %s4345_s14, 1  ;;  %s4345_s14 = sphi %s4371_s14, %s13_s14   ;;  %s4341_s13 = sphi %s4369_s13, %s5553_s13   ;;  %s4337_s12 = sphi %s4367_s12, %s5552_s12  }
   0x3   : > { %p27_p1 = scmp.ge.s32.totalorder %s25_s15, 2  ;;  %p157_p2 = scmp.lt.s32.totalorder %s4345_s14, 3 }
   0x5   : > { %s5555_s15 = smov (%p27_p1, %s25_s15), 0  ;;  %p158_p3 = pnand %p3237_p0, %p157_p2 }
   0x7   : > { %161 = sbr.rel (%p158_p3) target bundleno = 554 (0x22a), region = 32 }
   0xe   : > { %v4282_v0 = vld [vmem:[%s5475_s1 + $0x10] sm:$0xff]   ;;  %p190_p4 = scmp.lt.s32.totalorder %s4337_s12, 1  ;;  %v4283_v1 = vld [vmem:[%s5475_s1 + $0x40] sm:$0xff]   ;;  %v4284_v2 = vld [vmem:[%s5475_s1 + $0x18] sm:$0xff]   ;;  %vm269_vm0 = vsmask.f32 3328 }
   0xf   : > { %3673 = vmatprep.subr.bf16.mxu1 %v4282_v0  ;;  %3817 = vmatprep.subr.bf16.mxu0 %v4283_v1  ;;  %v4285_v3 = vld [vmem:[%s5475_s1 + $0x48] sm:$0xff]   ;;  %v4403_v4 = vld [vmem:[%s5475_s1] sm:$0xff]   ;;  %vm270_vm1 = vsmask.f32 7440  ;;  %v4413_v5 = vld [vmem:[%s5475_s1 + $0x50] sm:$0xff]   ;;  %vm721_vm2 = vcmask 261120  }
  0x10   : > { %s5557_s12 = smov (!%p190_p4, %s4337_s12), 1  ;;  %3674 = vmatpush3.bf16.msra.mxu1 %v4282_v0  ;;  %3818 = vmatpush3.bf16.msra.mxu0 %v4283_v1  ;;  %vm4447_vm3 = vmor %vm269_vm0, %vm270_vm1  ;;  %vm1248_vm4 = vcmask 1042432   ;;  %vm1249_vm5 = vcmask 1046532   ;;  %vm3104_vm7 = vcmask 64512  }
  0x11   : > { %3675 = vmatprep.subr.bf16.mxu1 %v4284_v2  ;;  %s4257_s24 = smul.u32 216, %s5557_s12  ;;  %3819 = vmatprep.subr.bf16.mxu0 %v4285_v3  ;;  %vm4637_vm6 = vmor %vm1248_vm4, %vm1249_vm5  ;;  %s3510_s16 = sshll.u32 %s5557_s12, 8 }
  0x12   : > { %s5364_s19 = scalar_lea.vmem %s5477_s3, %s3510_s16 }
  0x13   : > { %s4408_s29 = scalar_lea.vmem %s5474_s0, %s4257_s24 }
  0x14   : > { %3676 = vmatpush3.bf16.msra.mxu1 %v4284_v2  ;;  %v4416_v6 = vld [vmem:[%s4408_s29] sm:$0xf]  ;;  %v4419_v7 = vld [vmem:[%s4408_s29 + $0x4] sm:$0xf]  ;;  %v213_v8 = vld [vmem:[%s4408_s29 + $0x8] sm:$0x1]  ;;  %3820 = vmatpush3.bf16.msra.mxu0 %v4285_v3 }
  0x15   : > { %v273_v9 = vshrl.u32 %v4416_v6, 16  ;;  %v276_v10 = vshll.u32 %v4416_v6, 16  ;;  %v282_v11 = vshll.u32 %v4419_v7, 16  ;;  %v286_v12 = vshrl.u32 %v4419_v7, 16  ;;  %3709 = vmatprep.subr.bf16.mxu1 %v4403_v4  ;;  %v4428_v13 = vld [vmem:[%s4408_s29 + $0xc] sm:$0xf]  ;;  %3853 = vmatprep.subr.bf16.mxu0 %v4413_v5 }
  0x16   : > { %v292_v14 = vshll.u32 %v213_v8, 16  ;;  %v4431_v15 = vld [vmem:[%s4408_s29 + $0x10] sm:$0xf]  ;;  %v4434_v16 = vld [vmem:[%s4408_s29 + $0x14] sm:$0x1]  ;;  %v297_v22 = vshrl.u32 %v4428_v13, 16 }
  0x17   : > { %v275_v17 = vrot.slane %v273_v9, 4  ;;  %v278_v18 = vrot.slane %v276_v10, 5  ;;  %v284_v19 = vrot.slane %v282_v11, 5  ;;  %v288_v20 = vrot.slane %v286_v12, 4  ;;  %v4443_v29 = vld [vmem:[%s4408_s29 + $0x18] sm:$0xf] }
  0x18   : > { %v294_v21 = vrot.slane %v292_v14, 5  ;;  %v300_v23 = vshll.u32 %v4428_v13, 16  ;;  %v306_v24 = vshll.u32 %v4431_v15, 16  ;;  %v310_v27 = vshrl.u32 %v4431_v15, 16  ;;  %v4456_v35 = vld [vmem:[%s4408_s29 + $0x1c] sm:$0xf] }
  0x19   : > { %v279_v25 = vor.u32 %v278_v18, %v275_v17  ;;  %v289_v26 = vor.u32 %v288_v20, %v284_v19  ;;  %v316_v28 = vshll.u32 %v4434_v16, 16  ;;  %v299_v31 = vrot.slane %v297_v22, 4  ;;  %v4460_v42 = vld [vmem:[%s4408_s29 + $0x20] sm:$0x1]  ;;  %v4470_v49 = vld [vmem:[%s4408_s29 + $0x24] sm:$0xf] }
  0x1a   : > { %v302_v32 = vrot.slane %v300_v23, 5  ;;  %v308_v33 = vrot.slane %v306_v24, 5  ;;  %v4453_v34 = vcombine.low %v4428_v13, %v4431_v15  ;;  %v312_v38 = vrot.slane %v310_v27, 4  ;;  %v4473_v54 = vld [vmem:[%s4408_s29 + $0x28] sm:$0xf] }
  0x1b   : > { %v280_v36 = vrot.slane %v279_v25, 4  ;;  %v290_v37 = vrot.slane %v289_v26, 4  ;;  %v318_v39 = vrot.slane %v316_v28, 5  ;;  %v1263_v41 = vrot.slane %v4434_v16, 5  ;;  %v4478_v59 = vld [vmem:[%s4408_s29 + $0x2c] sm:$0x1] }
  0x1c   : > { %v303_v40 = vor.u32 %v302_v32, %v299_v31  ;;  %v321_v43 = vshrl.u32 %v4443_v29, 16  ;;  %v324_v44 = vshll.u32 %v4443_v29, 16  ;;  %v313_v47 = vor.u32 %v312_v38, %v308_v33  ;;  %v4486_v0 = vld [vmem:[%s4408_s29 + $0x30] sm:$0xf]  ;;  %v4290_v14 = vld [vmem:[%s5475_s1 + $0x8] sm:$0xff]  }
  0x1d   : > { %v285_v45 = vsel %vm4447_vm3, %v280_v36, %v284_v19  ;;  %v295_v46 = vsel %vm4447_vm3, %v290_v37, %v294_v21  ;;  %v330_v48 = vshll.u32 %v4456_v35, 16  ;;  %v334_v57 = vshrl.u32 %v4456_v35, 16  ;;  %v4499_v21 = vld [vmem:[%s4408_s29 + $0x34] sm:$0xf]  ;;  %v4506_v25 = vld [vmem:[%s4408_s29 + $0x38] sm:$0x1] }
  0x1e   : > { %v3245_v50 = vcombine.low %v285_v45, %v295_v46  ;;  %v304_v51 = vrot.slane %v303_v40, 4  ;;  %v323_v52 = vrot.slane %v321_v43, 4  ;;  %v326_v53 = vrot.slane %v324_v44, 5  ;;  %v4520_v45 = vld [vmem:[%s4408_s29 + $0x40] sm:$0xf] }
  0x1f   : > { %v314_v55 = vrot.slane %v313_v47, 4  ;;  %v332_v56 = vrot.slane %v330_v48, 5  ;;  %v340_v58 = vshll.u32 %v4460_v42, 16  ;;  %v1267_v62 = vrot.slane %v4456_v35, 5  ;;  %v4525_v46 = vld [vmem:[%s5475_s1 + $0x20] sm:$0xff]  }
  0x20   : > { %3677 = vmatprep.mubr.msk.bf16.mxu1 %vm721_vm2, %v3245_v50  ;;  %v309_v60 = vsel %vm4447_vm3, %v304_v51, %v308_v33  ;;  %v327_v61 = vor.u32 %v326_v53, %v323_v52  ;;  %v1270_v63 = vrot.slane %v4460_v42, 5  ;;  %v336_v2 = vrot.slane %v334_v57, 4  ;;  %v4530_v52 = vld [vmem:[%s4408_s29 + $0x44] sm:$0x1]  ;;  %v4289_v53 = vld [vmem:[%s5475_s1 + $0x58] sm:$0xff]  }
  0x21   : > { %v319_v1 = vsel %vm4447_vm3, %v314_v55, %v318_v39  ;;  %v342_v3 = vrot.slane %v340_v58, 5  ;;  %v345_v8 = vshrl.u32 %v4470_v49, 16  ;;  %v348_v11 = vshll.u32 %v4470_v49, 16  ;;  %v4514_v39 = vld [vmem:[%s4408_s29 + $0x3c] sm:$0xf] }
  0x22   : > { %v3246_v9 = vcombine.low %v309_v60, %v319_v1  ;;  %v328_v10 = vrot.slane %v327_v61, 4  ;;  %v354_v12 = vshll.u32 %v4473_v54, 16  ;;  %v337_v17 = vor.u32 %v336_v2, %v332_v56  ;;  %v4536_v55 = vld [vmem:[%s4408_s29 + $0x48] sm:$0xf]  ;;  %v4540_v61 = vld [vmem:[%s4408_s29 + $0x4c] sm:$0xf] }
  0x23   : > { %v347_v18 = vrot.slane %v345_v8, 4  ;;  %v358_v19 = vshrl.u32 %v4473_v54, 16  ;;  %v364_v20 = vshll.u32 %v4478_v59, 16  ;;  %v350_v23 = vrot.slane %v348_v11, 5 }
  0x24   : > { %3821 = vmatprep.mubr.msk.bf16.mxu0 %vm721_vm2, %v3246_v9  ;;  %3678 = vmatmul.mubr.msk.bf16.vlgmr.msra.gmra.mrb[0].mxu1 %vm721_vm2, %v3246_v9  ;;  %v333_v22 = vsel %vm4447_vm3, %v328_v10, %v332_v56  ;;  %v356_v24 = vrot.slane %v354_v12, 5  ;;  %v369_v26 = vshrl.u32 %v4486_v0, 16  ;;  %v338_v27 = vrot.slane %v337_v17, 4 }
  0x25   : > { %3710 = vmatpush3.bf16.msra.mxu1 %v4403_v4  ;;  %v360_v28 = vrot.slane %v358_v19, 4  ;;  %v366_v31 = vrot.slane %v364_v20, 5  ;;  %v372_v32 = vshll.u32 %v4486_v0, 16  ;;  %v351_v33 = vor.u32 %v350_v23, %v347_v18 }
  0x26   : > { %v371_v36 = vrot.slane %v369_v26, 4  ;;  %v378_v37 = vshll.u32 %v4499_v21, 16  ;;  %v382_v38 = vshrl.u32 %v4499_v21, 16  ;;  %3711 = vmatprep.subr.bf16.mxu1 %v4290_v14  ;;  %v343_v40 = vsel %vm4447_vm3, %v338_v27, %v342_v3 }
  0x27   : > { %v361_v4 = vor.u32 %v360_v28, %v356_v24  ;;  %v374_v43 = vrot.slane %v372_v32, 5  ;;  %v388_v44 = vshll.u32 %v4506_v25, 16  ;;  %v4527_v47 = vcombine.low %v333_v22, %v343_v40  ;;  %v4573_v28 = vld [vmem:[%s4408_s29 + $0x50] sm:$0x1] }
  0x28   : > { %v352_v48 = vrot.slane %v351_v33, 4  ;;  %v380_v50 = vrot.slane %v378_v37, 5  ;;  %v384_v51 = vrot.slane %v382_v38, 4  ;;  %v393_v60 = vshrl.u32 %v4514_v39, 16  ;;  %v4578_v33 = vld [vmem:[%s4408_s29 + $0x54] sm:$0xf] }
  0x29   : > { %5510 = vst [vmem:[#allocation2_spill] sm:$0xff] %v4527_v47  ;;  %v362_v56 = vrot.slane %v361_v4, 4  ;;  %v375_v57 = vor.u32 %v374_v43, %v371_v36  ;;  %v390_v58 = vrot.slane %v388_v44, 5  ;;  %3712 = vmatpush3.bf16.msra.mxu1 %v4290_v14  ;;  %3822 = vmatmul.mubr.msk.bf16.vlgmr.msra.gmra.mrb[0].mxu0 %vm721_vm2, %v4527_v47  ;;  %v396_v3 = vshll.u32 %v4514_v39, 16  ;;  %5512 = vst [vmem:[#allocation4_spill] sm:$0xff] %v4578_v33 }
  0x2a   : > { %3681 = vmatprep.mubr.msk.bf16.mxu1 %vm721_vm2, %v4527_v47  ;;  %v357_v1 = vsel %vm4447_vm3, %v352_v48, %v356_v24  ;;  %v385_v2 = vor.u32 %v384_v51, %v380_v50  ;;  %v402_v8 = vshll.u32 %v4520_v45, 16  ;;  %3854 = vmatpush3.bf16.msra.mxu0 %v4413_v5  ;;  %v395_v11 = vrot.slane %v393_v60, 4  ;;  %v4560_v5 = vld [vmem:[%s5475_s1 + $0x60] sm:$0xff]   ;;  %v4583_v4 = vld [vmem:[%s4408_s29 + $0x58] sm:$0xf] }
  0x2b   : > { %v367_v9 = vsel %vm4447_vm3, %v362_v56, %v366_v31  ;;  %v376_v10 = vrot.slane %v375_v57, 4  ;;  %v406_v12 = vshrl.u32 %v4520_v45, 16  ;;  %3745 = vmatprep.subr.bf16.mxu1 %v4525_v46  ;;  %v398_v18 = vrot.slane %v396_v3, 5  ;;  %3855 = vmatprep.subr.bf16.mxu0 %v4289_v53 }
  0x2c   : > { %v4555_v14 = vcombine.low %v357_v1, %v367_v9  ;;  %v386_v17 = vrot.slane %v385_v2, 4  ;;  %v404_v19 = vrot.slane %v402_v8, 5  ;;  %v412_v23 = vshll.u32 %v4530_v52, 16  ;;  %v4597_v2 = vld [vmem:[%s4408_s29 + $0x5c] sm:$0x1] }
  0x2d   : > { %v381_v20 = vsel %vm4447_vm3, %v376_v10, %v380_v50  ;;  %v408_v22 = vrot.slane %v406_v12, 4  ;;  %v417_v24 = vshrl.u32 %v4536_v55, 16  ;;  %v399_v27 = vor.u32 %v398_v18, %v395_v11  ;;  %v4601_v8 = vld [vmem:[%s4408_s29 + $0x60] sm:$0xf] }
  0x2e   : > { %5511 = vst [vmem:[#allocation3_spill] sm:$0xff] %v4555_v14  ;;  %3825 = vmatprep.mubr.msk.bf16.mxu0 %vm721_vm2, %v4555_v14  ;;  %3682 = vmatmul.mubr.msk.bf16.gmra.mrb[4].mxu1 %vm721_vm2, %v4555_v14  ;;  %v391_v26 = vsel %vm4447_vm3, %v386_v17, %v390_v58  ;;  %v420_v31 = vshll.u32 %v4536_v55, 16  ;;  %v426_v32 = vshll.u32 %v4540_v61, 16  ;;  %v414_v38 = vrot.slane %v412_v23, 5  ;;  %v4606_v17 = vld [vmem:[%s4408_s29 + $0x64] sm:$0xf] }
  0x2f   : > { %v4580_v36 = vcombine.low %v381_v20, %v391_v26  ;;  %v409_v37 = vor.u32 %v408_v22, %v404_v19  ;;  %v419_v40 = vrot.slane %v417_v24, 4  ;;  %3856 = vmatpush3.bf16.msra.mxu0 %v4289_v53  ;;  %v400_v43 = vrot.slane %v399_v27, 4  ;;  %v4820_v14 = vld [vmem:[%s4408_s29 + $0xa8] sm:$0xf] }
  0x30   : > { %v422_v44 = vrot.slane %v420_v31, 5  ;;  %v428_v48 = vrot.slane %v426_v32, 5  ;;  %v430_v50 = vshrl.u32 %v4540_v61, 16  ;;  %3889 = vmatprep.subr.bf16.mxu0 %v4560_v5  ;;  %v436_v56 = vshll.u32 %v4573_v28, 16 }
  0x31   : > { %5513 = vst [vmem:[#allocation5_spill] sm:$0xff] %v4580_v36  ;;  %3685 = vmatprep.mubr.msk.bf16.mxu1 %vm721_vm2, %v4580_v36  ;;  %v410_v51 = vrot.slane %v409_v37, 4  ;;  %v441_v53 = vshrl.u32 %v4578_v33, 16  ;;  %v444_v57 = vshll.u32 %v4578_v33, 16  ;;  %3826 = vmatmul.mubr.msk.bf16.gmra.mrb[4].mxu0 %vm721_vm2, %v4580_v36  ;;  %v405_v58 = vsel %vm4447_vm3, %v400_v43, %v404_v19  ;;  %v4620_v37 = vld [vmem:[%s4408_s29 + $0x68] sm:$0x1] }
  0x32   : > { %v423_v60 = vor.u32 %v422_v44, %v419_v40  ;;  %v432_v1 = vrot.slane %v430_v50, 4  ;;  %v450_v3 = vshll.u32 %v4583_v4, 16  ;;  %v438_v10 = vrot.slane %v436_v56, 5  ;;  %v4796_v36 = vld [vmem:[%s4408_s29 + $0xa0] sm:$0xf] }
  0x33   : > { %v415_v9 = vsel %vm4447_vm3, %v410_v51, %v414_v38  ;;  %v443_v11 = vrot.slane %v441_v53, 4  ;;  %v446_v12 = vrot.slane %v444_v57, 5  ;;  %v454_v24 = vshrl.u32 %v4583_v4, 16 }
  0x34   : > { %v4608_v18 = vcombine.low %v405_v58, %v415_v9  ;;  %v424_v19 = vrot.slane %v423_v60, 4  ;;  %v433_v20 = vor.u32 %v432_v1, %v428_v48  ;;  %v452_v22 = vrot.slane %v450_v3, 5 }
  0x35   : > { %v447_v23 = vor.u32 %v446_v12, %v443_v11  ;;  %v460_v26 = vshll.u32 %v4597_v2, 16  ;;  %v465_v27 = vshrl.u32 %v4601_v8, 16  ;;  %v468_v38 = vshll.u32 %v4601_v8, 16 }
  0x36   : > { %5514 = vst [vmem:[#allocation6_spill] sm:$0xff] %v4608_v18  ;;  %3829 = vmatprep.mubr.msk.bf16.mxu0 %vm721_vm2, %v4608_v18  ;;  %3686 = vmatmul.mubr.msk.bf16.gmra.mrb[8].mxu1 %vm721_vm2, %v4608_v18  ;;  %v429_v31 = vsel %vm4447_vm3, %v424_v19, %v428_v48  ;;  %v434_v32 = vrot.slane %v433_v20, 4  ;;  %v474_v40 = vshll.u32 %v4606_v17, 16  ;;  %v456_v44 = vrot.slane %v454_v24, 4  ;;  %v4628_v48 = vld [vmem:[%s4408_s29 + $0x6c] sm:$0xf] }
  0x37   : > { %v448_v43 = vrot.slane %v447_v23, 4  ;;  %v462_v50 = vrot.slane %v460_v26, 5  ;;  %v467_v51 = vrot.slane %v465_v27, 4  ;;  %v470_v53 = vrot.slane %v468_v38, 5  ;;  %v4644_v23 = vld [vmem:[%s4408_s29 + $0x70] sm:$0xf] }
  0x38   : > { %v439_v56 = vsel %vm4447_vm3, %v434_v32, %v438_v10  ;;  %v476_v57 = vrot.slane %v474_v40, 5  ;;  %v478_v58 = vshrl.u32 %v4606_v17, 16  ;;  %v457_v3 = vor.u32 %v456_v44, %v452_v22  ;;  %v4651_v26 = vld [vmem:[%s4408_s29 + $0x74] sm:$0x1]  ;;  %v4658_v40 = vld [vmem:[%s4408_s29 + $0x78] sm:$0xf] }
  0x39   : > { %v4630_v60 = vcombine.low %v429_v31, %v439_v56  ;;  %v453_v1 = vsel %vm4447_vm3, %v448_v43, %v452_v22  ;;  %v484_v9 = vshll.u32 %v4620_v37, 16  ;;  %v471_v10 = vor.u32 %v470_v53, %v467_v51 }
  0x3a   : > { %v480_v12 = vrot.slane %v478_v58, 4  ;;  %v3314_v19 = vrot.slane %v4428_v13, 9  ;;  %v1260_v20 = vrot.slane %v4431_v15, 5  ;;  %v458_v22 = vrot.slane %v457_v3, 4 }
  0x3b   : > { %5515 = vst [vmem:[#allocation7_spill] sm:$0xff] %v4630_v60  ;;  %3830 = vmatmul.mubr.msk.bf16.gmra.mrb[8].mxu0 %vm721_vm2, %v4630_v60  ;;  %3689 = vmatprep.mubr.msk.bf16.mxu1 %vm721_vm2, %v4630_v60  ;;  %v486_v24 = vrot.slane %v484_v9, 5  ;;  %v489_v27 = vshrl.u32 %v4628_v48, 16  ;;  %v492_v31 = vshll.u32 %v4628_v48, 16  ;;  %v472_v32 = vrot.slane %v471_v10, 4 }
  0x3c   : > { %v481_v13 = vor.u32 %v480_v12, %v476_v57  ;;  %v1261_v15 = vsel %vm4637_vm6, %v3314_v19, %v1260_v20  ;;  %v1262_v38 = vrot.slane %v1260_v20, 4  ;;  %v463_v43 = vsel %vm4447_vm3, %v458_v22, %v462_v50  ;;  %v4675_v20 = vld [vmem:[%s4408_s29 + $0x7c] sm:$0xf]  ;;  %v4688_v22 = vld [vmem:[%s4408_s29 + $0x80] sm:$0x1] }
  0x3d   : > { %v491_v44 = vrot.slane %v489_v27, 4  ;;  %v494_v51 = vrot.slane %v492_v31, 5  ;;  %v498_v56 = vshll.u32 %v4644_v23, 16  ;;  %v4663_v53 = vcombine.low %v453_v1, %v463_v43  ;;  %v4789_v60 = vld [vmem:[%s4408_s29 + $0x9c] sm:$0xf] }
  0x3e   : > { %v477_v58 = vsel %vm4447_vm3, %v472_v32, %v476_v57  ;;  %v482_v3 = vrot.slane %v481_v13, 4  ;;  %v1264_v9 = vsel %vm4637_vm6, %v1262_v38, %v1263_v41  ;;  %v502_v19 = vshrl.u32 %v4644_v23, 16 }
  0x3f   : > { %5518 = vst [vmem:[#allocation8_spill] sm:$0xff] %v4663_v53  ;;  %v4671_v10 = vcombine.low %v1261_v15, %v1264_v9  ;;  %v495_v12 = vor.u32 %v494_v51, %v491_v44  ;;  %v500_v50 = vrot.slane %v498_v56, 5  ;;  %3833 = vmatprep.mubr.msk.bf16.mxu0 %vm721_vm2, %v4663_v53  ;;  %3690 = vmatmul.mubr.msk.bf16.gmra.mrb[12].mxu1 %vm721_vm2, %v4663_v53  ;;  %v508_v41 = vshll.u32 %v4651_v26, 16  ;;  %v4703_v44 = vld [vmem:[%s4408_s29 + $0x84] sm:$0xf] }
  0x40   : > { %v487_v16 = vsel %vm4447_vm3, %v482_v3, %v486_v24  ;;  %v3315_v57 = vrot.slane %v4443_v29, 9  ;;  %v1269_v1 = vrot.slane %v1267_v62, 4  ;;  %v504_v32 = vrot.slane %v502_v19, 4 }
  0x41   : > { %5519 = vst [vmem:[#allocation9_spill] sm:$0xff] %v4671_v10  ;;  %v4690_v27 = vcombine.low %v477_v58, %v487_v16  ;;  %v496_v31 = vrot.slane %v495_v12, 4  ;;  %v513_v13 = vshrl.u32 %v4658_v40, 16  ;;  %v510_v15 = vrot.slane %v508_v41, 5  ;;  %v4719_v12 = vld [vmem:[%s4408_s29 + $0x88] sm:$0xf] }
  0x42   : > { %v1268_v24 = vsel %vm4637_vm6, %v3315_v57, %v1267_v62  ;;  %v1271_v38 = vsel %vm4637_vm6, %v1269_v1, %v1270_v63  ;;  %v516_v43 = vshll.u32 %v4658_v40, 16  ;;  %v505_v56 = vor.u32 %v504_v32, %v500_v50 }
  0x43   : > { %5520 = vst [vmem:[#allocation10_spill] sm:$0xff] %v4690_v27  ;;  %3834 = vmatmul.mubr.msk.bf16.gmra.mrb[12].mxu0 %vm721_vm2, %v4690_v27  ;;  %3693 = vmatprep.mubr.msk.bf16.mxu1 %vm721_vm2, %v4690_v27  ;;  %v501_v51 = vsel %vm4447_vm3, %v496_v31, %v500_v50  ;;  %v4711_v62 = vcombine.low %v1268_v24, %v1271_v38  ;;  %v515_v42 = vrot.slane %v513_v13, 4  ;;  %v522_v58 = vshll.u32 %v4675_v20, 16  ;;  %v4725_v13 = vld [vmem:[%s4408_s29 + $0x8c] sm:$0x1] }
  0x44   : > { %3857 = vmatprep.mubr.msk.bf16.mxu0 %vm721_vm2, %v4671_v10  ;;  %v518_v63 = vrot.slane %v516_v43, 5  ;;  %v526_v3 = vshrl.u32 %v4675_v20, 16  ;;  %v532_v9 = vshll.u32 %v4688_v22, 16  ;;  %v506_v19 = vrot.slane %v505_v56, 4 }
  0x45   : > { %5521 = vst [vmem:[#allocation11_spill] sm:$0xff] %v4711_v62  ;;  %v3316_v16 = vrot.slane %v4470_v49, 9  ;;  %v1274_v50 = vrot.slane %v4473_v54, 5  ;;  %v1277_v41 = vrot.slane %v4478_v59, 5  ;;  %v524_v1 = vrot.slane %v522_v58, 5 }
  0x46   : > { %v519_v57 = vor.u32 %v518_v63, %v515_v42  ;;  %v528_v31 = vrot.slane %v526_v3, 4  ;;  %v534_v32 = vrot.slane %v532_v9, 5  ;;  %v511_v24 = vsel %vm4447_vm3, %v506_v19, %v510_v15  ;;  %v4294_v9 = vld [vmem:[%s5475_s1 + $0x68] sm:$0xff]  }
  0x47   : > { %v1275_v38 = vsel %vm4637_vm6, %v3316_v16, %v1274_v50  ;;  %v1276_v43 = vrot.slane %v1274_v50, 4  ;;  %v537_v56 = vshrl.u32 %v4703_v44, 16  ;;  %v4732_v27 = vcombine.low %v501_v51, %v511_v24 }
  0x48   : > { %v520_v53 = vrot.slane %v519_v57, 4  ;;  %v529_v59 = vor.u32 %v528_v31, %v524_v1  ;;  %v540_v42 = vshll.u32 %v4703_v44, 16  ;;  %v546_v3 = vshll.u32 %v4719_v12, 16 }
  0x49   : > { %5522 = vst [vmem:[#allocation12_spill] sm:$0xff] %v4732_v27  ;;  %v1278_v63 = vsel %vm4637_vm6, %v1276_v43, %v1277_v41  ;;  %v539_v58 = vrot.slane %v537_v56, 4  ;;  %v550_v15 = vshrl.u32 %v4719_v12, 16  ;;  %3694 = vmatmul.mubr.msk.bf16.gmra.mrb[16].mxu1 %vm721_vm2, %v4732_v27  ;;  %v4749_v41 = vld [vmem:[%s4408_s29 + $0x90] sm:$0xf]  ;;  %v556_v24 = vshll.u32 %v4725_v13, 16 }
  0x4a   : > { %v525_v51 = vsel %vm4447_vm3, %v520_v53, %v524_v1  ;;  %v530_v19 = vrot.slane %v529_v59, 4  ;;  %v4746_v16 = vcombine.low %v1275_v38, %v1278_v63  ;;  %v542_v50 = vrot.slane %v540_v42, 5  ;;  %v4763_v59 = vld [vmem:[%s4408_s29 + $0x94] sm:$0xf] }
  0x4b   : > { %3858 = vmatmul.mubr.msk.bf16.vlgmr.msra.gmra.mrb[0].mxu0 %vm721_vm2, %v4711_v62  ;;  %v548_v57 = vrot.slane %v546_v3, 5  ;;  %v552_v31 = vrot.slane %v550_v15, 4  ;;  %v3317_v43 = vrot.slane %v4486_v0, 9  ;;  %v1281_v38 = vrot.slane %v4499_v21, 5  ;;  %v4768_v15 = vld [vmem:[%s4408_s29 + $0x98] sm:$0x1] }
  0x4c   : > { %5523 = vst [vmem:[#allocation13_spill] sm:$0xff] %v4746_v16  ;;  %3890 = vmatpush3.bf16.msra.mxu0 %v4560_v5  ;;  %v535_v53 = vsel %vm4447_vm3, %v530_v19, %v534_v32  ;;  %3861 = vmatprep.mubr.msk.bf16.mxu0 %vm721_vm2, %v4746_v16  ;;  %v543_v1 = vor.u32 %v542_v50, %v539_v58  ;;  %v1284_v56 = vrot.slane %v4506_v25, 5  ;;  %v558_v3 = vrot.slane %v556_v24, 5  ;;  %v4774_v32 = vld [vmem:[%s5475_s1 + $0x70] sm:$0xff]  }
  0x4d   : > { %v4765_v42 = vcombine.low %v525_v51, %v535_v53  ;;  %v553_v63 = vor.u32 %v552_v31, %v548_v57  ;;  %v561_v5 = vshrl.u32 %v4749_v41, 16  ;;  %3891 = vmatprep.subr.bf16.mxu0 %v4294_v9  ;;  %5525 = vst [vmem:[#allocation15_spill] sm:$0xff] %v4774_v32  ;;  %v1282_v25 = vsel %vm4637_vm6, %v3317_v43, %v1281_v38 }
  0x4e   : > { %v544_v58 = vrot.slane %v543_v1, 4  ;;  %v1283_v19 = vrot.slane %v1281_v38, 4  ;;  %v564_v51 = vshll.u32 %v4749_v41, 16  ;;  %v570_v24 = vshll.u32 %v4763_v59, 16 }
  0x4f   : > { %5524 = vst [vmem:[#allocation14_spill] sm:$0xff] %v4765_v42  ;;  %3697 = vmatprep.mubr.msk.bf16.mxu1 %vm721_vm2, %v4765_v42  ;;  %v554_v50 = vrot.slane %v553_v63, 4  ;;  %v563_v31 = vrot.slane %v561_v5, 4  ;;  %v574_v53 = vshrl.u32 %v4763_v59, 16  ;;  %v580_v38 = vshll.u32 %v4768_v15, 16 }
  0x50   : > { %v549_v27 = vsel %vm4447_vm3, %v544_v58, %v548_v57  ;;  %v1285_v1 = vsel %vm4637_vm6, %v1283_v19, %v1284_v56  ;;  %v566_v43 = vrot.slane %v564_v51, 5  ;;  %3892 = vmatpush3.bf16.msra.mxu0 %v4294_v9  ;;  %v572_v42 = vrot.slane %v570_v24, 5 }
  0x51   : > { %v559_v63 = vsel %vm4447_vm3, %v554_v50, %v558_v3  ;;  %v4793_v5 = vcombine.low %v1282_v25, %v1285_v1  ;;  %v576_v18 = vrot.slane %v574_v53, 4  ;;  %3925 = vmatprep.subr.bf16.mxu0 %v4774_v32  ;;  %v582_v58 = vrot.slane %v580_v38, 5  ;;  %v4810_v50 = vld [vmem:[%s4408_s29 + $0xa4] sm:$0x1] }
  0x52   : > { %v4799_v57 = vcombine.low %v549_v27, %v559_v63  ;;  %v567_v56 = vor.u32 %v566_v43, %v563_v31  ;;  %v3318_v19 = vrot.slane %v4514_v39, 9  ;;  %v1288_v3 = vrot.slane %v4520_v45, 5 }
  0x53   : > { %5526 = vst [vmem:[#allocation16_spill] sm:$0xff] %v4793_v5  ;;  %3862 = vmatmul.mubr.msk.bf16.gmra.mrb[4].mxu0 %vm721_vm2, %v4793_v5  ;;  %v577_v9 = vor.u32 %v576_v18, %v572_v42  ;;  %v1291_v25 = vrot.slane %v4530_v52, 5  ;;  %v585_v51 = vshrl.u32 %v4789_v60, 16  ;;  %v588_v31 = vshll.u32 %v4789_v60, 16 }
  0x54   : > { %5527 = vst [vmem:[#allocation17_spill] sm:$0xff] %v4799_v57  ;;  %3698 = vmatmul.mubr.msk.bf16.gmra.mrb[20].mxu1 %vm721_vm2, %v4799_v57  ;;  %v568_v27 = vrot.slane %v567_v56, 4  ;;  %v594_v24 = vshll.u32 %v4796_v36, 16  ;;  %v598_v18 = vshrl.u32 %v4796_v36, 16  ;;  %v1289_v52 = vsel %vm4637_vm6, %v3318_v19, %v1288_v3 }
  0x55   : > { %v578_v53 = vrot.slane %v577_v9, 4  ;;  %v1290_v1 = vrot.slane %v1288_v3, 4  ;;  %v587_v43 = vrot.slane %v585_v51, 4  ;;  %v590_v63 = vrot.slane %v588_v31, 5  ;;  %v4829_v3 = vld [vmem:[%s4408_s29 + $0xac] sm:$0xf] }
  0x56   : > { %v573_v38 = vsel %vm4447_vm3, %v568_v27, %v572_v42  ;;  %v596_v56 = vrot.slane %v594_v24, 5  ;;  %v600_v57 = vrot.slane %v598_v18, 4  ;;  %v604_v9 = vshll.u32 %v4810_v50, 16 }
  0x57   : > { %v583_v47 = vsel %vm4447_vm3, %v578_v53, %v582_v58  ;;  %v1292_v5 = vsel %vm4637_vm6, %v1290_v1, %v1291_v25  ;;  %v3319_v19 = vrot.slane %v4536_v55, 9  ;;  %v591_v27 = vor.u32 %v590_v63, %v587_v43 }
  0x58   : > { %v4831_v51 = vcombine.low %v573_v38, %v583_v47  ;;  %v4833_v42 = vcombine.low %v1289_v52, %v1292_v5  ;;  %v601_v31 = vor.u32 %v600_v57, %v596_v56  ;;  %v606_v24 = vrot.slane %v604_v9, 5  ;;  %v4843_v5 = vld [vmem:[%s4408_s29 + $0xb0] sm:$0x1] }
  0x59   : > { %v1295_v18 = vrot.slane %v4540_v61, 5  ;;  %v1298_v58 = vrot.slane %v4573_v28, 5  ;;  %v609_v25 = vshrl.u32 %v4820_v14, 16  ;;  %v592_v47 = vrot.slane %v591_v27, 4 }
  0x5a   : > { %5528 = vst [vmem:[#allocation18_spill] sm:$0xff] %v4831_v51  ;;  %5529 = vst [vmem:[#allocation19_spill] sm:$0xff] %v4833_v42  ;;  %3701 = vmatprep.mubr.msk.bf16.mxu1 %vm721_vm2, %v4831_v51  ;;  %3865 = vmatprep.mubr.msk.bf16.mxu0 %vm721_vm2, %v4833_v42  ;;  %v602_v53 = vrot.slane %v601_v31, 4  ;;  %v612_v57 = vshll.u32 %v4820_v14, 16  ;;  %v618_v52 = vshll.u32 %v4829_v3, 16  ;;  %v622_v38 = vshrl.u32 %v4829_v3, 16 }
  0x5b   : > { %v1296_v28 = vsel %vm4637_vm6, %v3319_v19, %v1295_v18  ;;  %v1297_v1 = vrot.slane %v1295_v18, 4  ;;  %v611_v43 = vrot.slane %v609_v25, 4  ;;  %v597_v63 = vsel %vm4447_vm3, %v592_v47, %v596_v56  ;;  %v4855_v51 = vld [vmem:[%s4408_s29 + $0xb4] sm:$0xf]  ;;  %v4867_v47 = vld [vmem:[%s4408_s29 + $0xb8] sm:$0xf] }
  0x5c   : > { %v607_v9 = vsel %vm4447_vm3, %v602_v53, %v606_v24  ;;  %v614_v27 = vrot.slane %v612_v57, 5  ;;  %v620_v31 = vrot.slane %v618_v52, 5  ;;  %v624_v18 = vrot.slane %v622_v38, 4 }
  0x5d   : > { %v4857_v42 = vcombine.low %v597_v63, %v607_v9  ;;  %v1299_v19 = vsel %vm4637_vm6, %v1297_v1, %v1298_v58  ;;  %v628_v25 = vshll.u32 %v4843_v5, 16  ;;  %v3320_v56 = vrot.slane %v4578_v33, 9  ;;  %v4873_v58 = vld [vmem:[%s4408_s29 + $0xbc] sm:$0x1] }
  0x5e   : > { %v4862_v16 = vcombine.low %v1296_v28, %v1299_v19  ;;  %v615_v62 = vor.u32 %v614_v27, %v611_v43  ;;  %v1302_v24 = vrot.slane %v4583_v4, 5  ;;  %v625_v53 = vor.u32 %v624_v18, %v620_v31 }
  0x5f   : > { %5530 = vst [vmem:[#allocation20_spill] sm:$0xff] %v4857_v42  ;;  %3702 = vmatmul.mubr.msk.bf16.gmra.mrb[24].mxu1 %vm721_vm2, %v4857_v42  ;;  %v630_v57 = vrot.slane %v628_v25, 5  ;;  %v1305_v52 = vrot.slane %v4597_v2, 5  ;;  %v633_v1 = vshrl.u32 %v4855_v51, 16  ;;  %v636_v63 = vshll.u32 %v4855_v51, 16 }
  0x60   : > { %5531 = vst [vmem:[#allocation21_spill] sm:$0xff] %v4862_v16  ;;  %3866 = vmatmul.mubr.msk.bf16.gmra.mrb[8].mxu0 %vm721_vm2, %v4862_v16  ;;  %v616_v28 = vrot.slane %v615_v62, 4  ;;  %v1303_v43 = vsel %vm4637_vm6, %v3320_v56, %v1302_v24  ;;  %v1304_v38 = vrot.slane %v1302_v24, 4  ;;  %v626_v9 = vrot.slane %v625_v53, 4 }
  0x61   : > { %v635_v27 = vrot.slane %v633_v1, 4  ;;  %v642_v19 = vshll.u32 %v4867_v47, 16  ;;  %v646_v2 = vshrl.u32 %v4867_v47, 16  ;;  %v638_v42 = vrot.slane %v636_v63, 5 }
  0x62   : > { %v621_v18 = vsel %vm4447_vm3, %v616_v28, %v620_v31  ;;  %v1306_v25 = vsel %vm4637_vm6, %v1304_v38, %v1305_v52  ;;  %v652_v62 = vshll.u32 %v4873_v58, 16  ;;  %v631_v56 = vsel %vm4447_vm3, %v626_v9, %v630_v57 }
  0x63   : > { %v4890_v24 = vcombine.low %v1303_v43, %v1306_v25  ;;  %v644_v53 = vrot.slane %v642_v19, 5  ;;  %v648_v1 = vrot.slane %v646_v2, 4  ;;  %v4892_v16 = vcombine.low %v621_v18, %v631_v56 }
  0x64   : > { %v639_v10 = vor.u32 %v638_v42, %v635_v27  ;;  %v654_v32 = vrot.slane %v652_v62, 5  ;;  %v3321_v33 = vrot.slane %v4601_v8, 9  ;;  %v1309_v52 = vrot.slane %v4606_v17, 5 }
  0x65   : > { %3869 = vmatprep.mubr.msk.bf16.mxu0 %vm721_vm2, %v4890_v24  ;;  %v649_v31 = vor.u32 %v648_v1, %v644_v53  ;;  %v1312_v28 = vrot.slane %v4620_v37, 5  ;;  %v3322_v57 = vrot.slane %v4628_v48, 9  ;;  %3705 = vmatprep.mubr.msk.bf16.mxu1 %vm721_vm2, %v4892_v16  ;;  %v3279_v42 = vcombine.low %v4416_v6, %v4419_v7 }
  0x66   : > { %v640_v43 = vrot.slane %v639_v10, 4  ;;  %v1316_v38 = vrot.slane %v4644_v23, 5  ;;  %v1319_v63 = vrot.slane %v4651_v26, 5  ;;  %v1310_v27 = vsel %vm4637_vm6, %v3321_v33, %v1309_v52 }
  0x67   : > { %v650_v9 = vrot.slane %v649_v31, 4  ;;  %v1311_v19 = vrot.slane %v1309_v52, 4  ;;  %v1323_v37 = vrot.slane %v4675_v20, 5  ;;  %v3323_v6 = vrot.slane %v4658_v40, 9 }
  0x68   : > { %v645_v2 = vsel %vm4447_vm3, %v640_v43, %v644_v53  ;;  %v1317_v10 = vsel %vm4637_vm6, %v3322_v57, %v1316_v38  ;;  %v1318_v18 = vrot.slane %v1316_v38, 4  ;;  %v1326_v33 = vrot.slane %v4688_v22, 5 }
  0x69   : > { %v655_v7 = vsel %vm4447_vm3, %v650_v9, %v654_v32  ;;  %v1313_v26 = vsel %vm4637_vm6, %v1311_v19, %v1312_v28  ;;  %v1325_v25 = vrot.slane %v1323_v37, 4  ;;  %v3324_v31 = vrot.slane %v4703_v44, 9 }
  0x6a   : > { %v4919_v62 = vcombine.low %v645_v2, %v655_v7  ;;  %v4921_v56 = vcombine.low %v1310_v27, %v1313_v26  ;;  %v1320_v53 = vsel %vm4637_vm6, %v1318_v18, %v1319_v63  ;;  %v1330_v52 = vrot.slane %v4719_v12, 5  ;;  %v4302_v7 = vld [vmem:[%s5475_s1 + $0x28] sm:$0xff]  }
  0x6b   : > { %v4925_v1 = vcombine.low %v1317_v10, %v1320_v53  ;;  %v1333_v22 = vrot.slane %v4725_v13, 5  ;;  %v1324_v32 = vsel %vm4637_vm6, %v3323_v6, %v1323_v37  ;;  %v1327_v28 = vsel %vm4637_vm6, %v1325_v25, %v1326_v33 }
  0x6c   : > { %3706 = vmatmul.mubr.msk.bf16.gmra.mrb[28].mxu1 %vm721_vm2, %v4919_v62  ;;  %3870 = vmatmul.mubr.msk.bf16.gmra.mrb[12].mxu0 %vm721_vm2, %v4921_v56  ;;  %v1332_v57 = vrot.slane %v1330_v52, 4  ;;  %v1337_v43 = vrot.slane %v4763_v59, 5  ;;  %v1344_v38 = vrot.slane %v4796_v36, 5  ;;  %v1331_v63 = vsel %vm4637_vm6, %v3324_v31, %v1330_v52 }
  0x6d   : > { %3713 = vmatprep.mubr.msk.bf16.mxu1 %vm721_vm2, %v3279_v42  ;;  %3873 = vmatprep.mubr.msk.bf16.mxu0 %vm721_vm2, %v4925_v1  ;;  %v4947_v42 = vcombine.low %v1324_v32, %v1327_v28  ;;  %v3325_v9 = vrot.slane %v4749_v41, 9  ;;  %v1340_v19 = vrot.slane %v4768_v15, 5  ;;  %v4953_v37 = vcombine.low %v4443_v29, %v4456_v35 }
  0x6e   : > { %v1334_v13 = vsel %vm4637_vm6, %v1332_v57, %v1333_v22  ;;  %v1339_v27 = vrot.slane %v1337_v43, 4  ;;  %v3326_v2 = vrot.slane %v4789_v60, 9  ;;  %v1346_v18 = vrot.slane %v1344_v38, 4 }
  0x6f   : > { %v4956_v10 = vcombine.low %v1331_v63, %v1334_v13  ;;  %v1347_v6 = vrot.slane %v4810_v50, 5  ;;  %v1351_v26 = vrot.slane %v4829_v3, 5  ;;  %v1338_v29 = vsel %vm4637_vm6, %v3325_v9, %v1337_v43 }
  0x70   : > { %v1341_v35 = vsel %vm4637_vm6, %v1339_v27, %v1340_v19  ;;  %v4976_v15 = vcombine.low %v4470_v49, %v4473_v54  ;;  %v1345_v50 = vsel %vm4637_vm6, %v3326_v2, %v1344_v38  ;;  %v4982_v25 = vcombine.low %v4601_v8, %v4606_v17  ;;  %v4997_v54 = vld [vmem:[%s5475_s1 + $0x30] sm:$0xff]  }
  0x71   : > { %v3327_v33 = vrot.slane %v4820_v14, 9  ;;  %v1358_v53 = vrot.slane %v4867_v47, 5  ;;  %v4992_v49 = vcombine.low %v4628_v48, %v4644_v23  ;;  %v4999_v8 = vcombine.low %v1338_v29, %v1341_v35 }
  0x72   : > { %v1353_v17 = vrot.slane %v1351_v26, 4  ;;  %v1354_v31 = vrot.slane %v4843_v5, 5  ;;  %v5004_v52 = vcombine.low %v4658_v40, %v4675_v20  ;;  %v5008_v22 = vcombine.low %v4703_v44, %v4719_v12  ;;  %v261_v5 = vld [vmem:[%s4408_s29 + $0xc8] sm:$0x1] }
  0x73   : > { %v5012_v48 = vcombine.low %v4749_v41, %v4763_v59  ;;  %v5016_v23 = vcombine.low %v4789_v60, %v4796_v36  ;;  %v5020_v32 = vcombine.low %v4820_v14, %v4829_v3  ;;  %v5024_v40 = vcombine.low %v4486_v0, %v4499_v21  ;;  %v5035_v14 = vld [vmem:[%s4408_s29 + $0xc4] sm:$0xf] }
  0x74   : > { %3714 = vmatmul.mubr.msk.bf16.vlgmr.msra.gmra.mrb[0].mxu1 %vm721_vm2, %v4453_v34  ;;  %3874 = vmatmul.mubr.msk.bf16.gmra.mrb[16].mxu0 %vm721_vm2, %v4947_v42  ;;  %v5030_v44 = vcombine.low %v4855_v51, %v4867_v47  ;;  %v3328_v36 = vrot.slane %v4855_v51, 9  ;;  %v1360_v60 = vrot.slane %v1358_v53, 4  ;;  %v1361_v12 = vrot.slane %v4873_v58, 5  ;;  %v5056_v51 = vld [vmem:[%s4408_s29 + $0xc0] sm:$0xf] }
  0x75   : > { %3746 = vmatpush3.bf16.msra.mxu1 %v4525_v46  ;;  %3717 = vmatprep.mubr.msk.bf16.mxu1 %vm721_vm2, %v4953_v37  ;;  %v1348_v46 = vsel %vm4637_vm6, %v1346_v18, %v1347_v6  ;;  %v1352_v0 = vsel %vm4637_vm6, %v3327_v33, %v1351_v26  ;;  %v1355_v21 = vsel %vm4637_vm6, %v1353_v17, %v1354_v31  ;;  %v2130_v41 = vrot.slane %v5035_v14, 5 }
  0x76   : > { %3877 = vmatprep.mubr.msk.bf16.mxu0 %vm721_vm2, %v4956_v10  ;;  %3747 = vmatprep.subr.bf16.mxu1 %v4302_v7  ;;  %v5026_v20 = vcombine.low %v1345_v50, %v1348_v46  ;;  %v1359_v59 = vsel %vm4637_vm6, %v3328_v36, %v1358_v53  ;;  %v1362_v3 = vsel %vm4637_vm6, %v1360_v60, %v1361_v12  ;;  %v1888_v57 = vshrl.u32 %v5056_v51, 16  ;;  %v5532_v46 = vld [vmem:[#allocation4_spill] sm:$0xff]  ;;  %v5533_v60 = vld [vmem:[#allocation15_spill] sm:$0xff]  ;;  %v4316_v12 = vld [vmem:[%s5475_s1 + $0x80] sm:$0xff]  }
  0x77   : > { %v5061_v47 = vcombine.low %v4514_v39, %v4520_v45  ;;  %v5063_v58 = vcombine.low %v1352_v0, %v1355_v21  ;;  %v5067_v28 = vcombine.low %v4536_v55, %v4540_v61  ;;  %v1891_v43 = vshll.u32 %v5056_v51, 16  ;;  %v4318_v0 = vld [vmem:[%s4408_s29 + $0x4] sm:$0xf] }
  0x78   : > { %v1897_v38 = vshll.u32 %v5035_v14, 16  ;;  %v1901_v63 = vshrl.u32 %v5035_v14, 16  ;;  %v5073_v13 = vcombine.low %v1359_v59, %v1362_v3  ;;  %v3413_v9 = vrot.slane %v5056_v51, 9  ;;  %v4320_v3 = vld [vmem:[%s4408_s29] sm:$0xf] }
  0x79   : > { %3748 = vmatpush3.bf16.msra.mxu1 %v4302_v7  ;;  %v2132_v39 = vrot.slane %v2130_v41, 4  ;;  %v2133_v45 = vrot.slane %v261_v5, 5  ;;  %v1890_v27 = vrot.slane %v1888_v57, 4  ;;  %v1893_v19 = vrot.slane %v1891_v43, 5 }
  0x7a   : > { %3781 = vmatprep.subr.bf16.mxu1 %v4997_v54  ;;  %v1899_v2 = vrot.slane %v1897_v38, 5  ;;  %v1903_v18 = vrot.slane %v1901_v63, 4  ;;  %v1907_v6 = vshll.u32 %v261_v5, 16  ;;  %v2131_v7 = vsel %vm4637_vm6, %v3413_v9, %v2130_v41  ;;  %v4319_v41 = vld [vmem:[%s4408_s29 + $0x8] sm:$0x1]  ;;  %v4315_v9 = vld [vmem:[%s5475_s1 + $0x38] sm:$0xff]  }
  0x7b   : > { %v1894_v55 = vor.u32 %v1893_v19, %v1890_v27  ;;  %v2134_v26 = vsel %vm4637_vm6, %v2132_v39, %v2133_v45  ;;  %v5090_v33 = vcombine.low %v5532_v46, %v4583_v4  ;;  %v4312_v4 = vld [vmem:[%s5475_s1 + $0x78] sm:$0xff]   ;;  %v1253_v21 = vrot.slane %v4318_v0, 5  ;;  %v5535_v45 = vld [vmem:[#allocation11_spill] sm:$0xff]  ;;  %v4321_v27 = vld [vmem:[%s5475_s1 + $0x40] sm:$0xff]  }
  0x7c   : > { %3718 = vmatmul.mubr.msk.bf16.gmra.mrb[4].mxu1 %vm721_vm2, %v4976_v15  ;;  %3878 = vmatmul.mubr.msk.bf16.gmra.mrb[20].mxu0 %vm721_vm2, %v4999_v8  ;;  %v1904_v61 = vor.u32 %v1903_v18, %v1899_v2  ;;  %v1909_v50 = vrot.slane %v1907_v6, 5  ;;  %v5092_v53 = vcombine.low %v2131_v7, %v2134_v26  ;;  %v1256_v59 = vrot.slane %v4319_v41, 5  ;;  %v5534_v39 = vld [vmem:[#allocation9_spill] sm:$0xff]  ;;  %v5538_v18 = vld [vmem:[#allocation19_spill] sm:$0xff]  ;;  %v5192_v6 = vld [vmem:[%s4408_s29 + $0xd0] sm:$0xf] }
  0x7d   : > { %3721 = vmatprep.mubr.msk.bf16.mxu1 %vm721_vm2, %v5024_v40  ;;  %3881 = vmatprep.mubr.msk.bf16.mxu0 %vm721_vm2, %v5026_v20  ;;  %v1895_v29 = vrot.slane %v1894_v55, 4  ;;  %v3313_v5 = vrot.slane %v4320_v3, 9  ;;  %v1255_v57 = vrot.slane %v1253_v21, 4  ;;  %v5536_v19 = vld [vmem:[#allocation13_spill] sm:$0xff]  ;;  %v4317_v7 = vld [vmem:[%s5475_s1 + $0x88] sm:$0xff]   ;;  %v5545_v46 = vld [vmem:[#allocation8_spill] sm:$0xff] }
  0x7e   : > { %v1905_v35 = vrot.slane %v1904_v61, 4  ;;  %v5539_v55 = vld [vmem:[#allocation21_spill] sm:$0xff]  ;;  %v5189_v61 = vld [vmem:[%s4408_s29 + $0xcc] sm:$0xf]  ;;  %v5550_v41 = vld [vmem:[#allocation18_spill] sm:$0xff]  ;;  %v2812_v30 = vrot.slane %v5192_v6, 5 }
  0x7f   : > { %v1900_v17 = vsel %vm4447_vm3, %v1895_v29, %v1899_v2  ;;  %v1254_v43 = vsel %vm4637_vm6, %v3313_v5, %v1253_v21  ;;  %v1257_v38 = vsel %vm4637_vm6, %v1255_v57, %v1256_v59  ;;  %v5178_v2 = vcombine.low %v5056_v51, %v5035_v14  ;;  %v5540_v51 = vld [vmem:[#allocation2_spill] sm:$0xff]  ;;  %v5541_v26 = vld [vmem:[#allocation3_spill] sm:$0xff]  ;;  %v5542_v29 = vld [vmem:[#allocation5_spill] sm:$0xff] }
  0x80   : > { %v1910_v31 = vsel %vm4447_vm3, %v1905_v35, %v1909_v50  ;;  %v3333_v63 = vcombine.low %v1254_v43, %v1257_v38  ;;  %v3441_v14 = vcombine.low %v5189_v61, %v5192_v6  ;;  %v5543_v35 = vld [vmem:[#allocation6_spill] sm:$0xff]  ;;  %v5544_v50 = vld [vmem:[#allocation7_spill] sm:$0xff]  ;;  %v2573_v0 = vshll.u32 %v5189_v61, 16  ;;  %v264_v43 = vld [vmem:[%s4408_s29 + $0xd4] sm:$0x1] }
  0x81   : > { %v5098_v36 = vcombine.low %v1900_v17, %v1910_v31  ;;  %v5546_v17 = vld [vmem:[#allocation10_spill] sm:$0xff]  ;;  %v5547_v31 = vld [vmem:[#allocation12_spill] sm:$0xff]  ;;  %v2583_v21 = vshrl.u32 %v5192_v6, 16 }
  0x82   : > { %v2575_v3 = vrot.slane %v2573_v0, 5 }
  0x83   : > { %v2585_v57 = vrot.slane %v2583_v21, 4 }
  0x84   : > { %3722 = vmatmul.mubr.msk.bf16.gmra.mrb[8].mxu1 %vm721_vm2, %v5061_v47  ;;  %3882 = vmatmul.mubr.msk.bf16.gmra.mrb[24].mxu0 %vm721_vm2, %v5063_v58 }
  0x85   : > { %3725 = vmatprep.mubr.msk.bf16.mxu1 %vm721_vm2, %v5067_v28  ;;  %3885 = vmatprep.mubr.msk.bf16.mxu0 %vm721_vm2, %v5073_v13 }
  0x8c   : > { %3726 = vmatmul.mubr.msk.bf16.gmra.mrb[12].mxu1 %vm721_vm2, %v5090_v33  ;;  %3886 = vmatmul.mubr.msk.bf16.gmra.mrb[28].mxu0 %vm721_vm2, %v5092_v53 }
  0x8d   : > { %3729 = vmatprep.mubr.msk.bf16.mxu1 %vm721_vm2, %v4982_v25  ;;  %3893 = vmatprep.mubr.msk.bf16.mxu0 %vm721_vm2, %v4953_v37 }
  0x94   : > { %3730 = vmatmul.mubr.msk.bf16.gmra.mrb[16].mxu1 %vm721_vm2, %v4992_v49  ;;  %3894 = vmatmul.mubr.msk.bf16.vlgmr.msra.gmra.mrb[0].mxu0 %vm721_vm2, %v4976_v15 }
  0x95   : > { %3926 = vmatpush3.bf16.msra.mxu0 %v5533_v60  ;;  %3733 = vmatprep.mubr.msk.bf16.mxu1 %vm721_vm2, %v5004_v52  ;;  %v5549_v60 = vld [vmem:[#allocation17_spill] sm:$0xff] }
  0x96   : > { %3897 = vmatprep.mubr.msk.bf16.mxu0 %vm721_vm2, %v5024_v40  ;;  %3927 = vmatprep.subr.bf16.mxu0 %v4312_v4 }
  0x99   : > { %3928 = vmatpush3.bf16.msra.mxu0 %v4312_v4  ;;  %v5548_v4 = vld [vmem:[#allocation14_spill] sm:$0xff] }
  0x9a   : > { %3961 = vmatprep.subr.bf16.mxu0 %v4316_v12 }
  0x9c   : > { %3734 = vmatmul.mubr.msk.bf16.gmra.mrb[20].mxu1 %vm721_vm2, %v5008_v22  ;;  %3898 = vmatmul.mubr.msk.bf16.gmra.mrb[4].mxu0 %vm721_vm2, %v5061_v47 }
  0x9d   : > { %3737 = vmatprep.mubr.msk.bf16.mxu1 %vm721_vm2, %v5012_v48  ;;  %3901 = vmatprep.mubr.msk.bf16.mxu0 %vm721_vm2, %v5067_v28 }
  0xa4   : > { %3738 = vmatmul.mubr.msk.bf16.gmra.mrb[24].mxu1 %vm721_vm2, %v5016_v23  ;;  %3902 = vmatmul.mubr.msk.bf16.gmra.mrb[8].mxu0 %vm721_vm2, %v5090_v33 }
  0xa5   : > { %3741 = vmatprep.mubr.msk.bf16.mxu1 %vm721_vm2, %v5020_v32  ;;  %3905 = vmatprep.mubr.msk.bf16.mxu0 %vm721_vm2, %v4982_v25 }
  0xac   : > { %3742 = vmatmul.mubr.msk.bf16.gmra.mrb[28].mxu1 %vm721_vm2, %v5030_v44  ;;  %3906 = vmatmul.mubr.msk.bf16.gmra.mrb[12].mxu0 %vm721_vm2, %v4992_v49 }
  0xad   : > { %3749 = vmatprep.mubr.msk.bf16.mxu1 %vm721_vm2, %v3333_v63  ;;  %3909 = vmatprep.mubr.msk.bf16.mxu0 %vm721_vm2, %v5004_v52 }
  0xb4   : > { %3750 = vmatmul.mubr.msk.bf16.vlgmr.msra.gmra.mrb[0].mxu1 %vm721_vm2, %v5534_v39  ;;  %3910 = vmatmul.mubr.msk.bf16.gmra.mrb[16].mxu0 %vm721_vm2, %v5008_v22 }
  0xb5   : > { %3782 = vmatpush3.bf16.msra.mxu1 %v4997_v54  ;;  %3753 = vmatprep.mubr.msk.bf16.mxu1 %vm721_vm2, %v5535_v45  ;;  %v5537_v54 = vld [vmem:[#allocation16_spill] sm:$0xff] }
  0xb6   : > { %3913 = vmatprep.mubr.msk.bf16.mxu0 %vm721_vm2, %v5012_v48  ;;  %3783 = vmatprep.subr.bf16.mxu1 %v4315_v9 }
  0xb9   : > { %3784 = vmatpush3.bf16.msra.mxu1 %v4315_v9  ;;  %v2589_v9 = vshll.u32 %v264_v43, 16 }
  0xba   : > { %3997 = vmatprep.subr.bf16.mxu1 %v4321_v27 }
  0xbc   : > { %3754 = vmatmul.mubr.msk.bf16.gmra.mrb[4].mxu1 %vm721_vm2, %v5536_v19  ;;  %3914 = vmatmul.mubr.msk.bf16.gmra.mrb[20].mxu0 %vm721_vm2, %v5016_v23 }
  0xbd   : > { %3757 = vmatprep.mubr.msk.bf16.mxu1 %vm721_vm2, %v5537_v54  ;;  %3917 = vmatprep.mubr.msk.bf16.mxu0 %vm721_vm2, %v5020_v32 }
  0xc4   : > { %3758 = vmatmul.mubr.msk.bf16.gmra.mrb[8].mxu1 %vm721_vm2, %v5538_v18  ;;  %3918 = vmatmul.mubr.msk.bf16.gmra.mrb[24].mxu0 %vm721_vm2, %v5030_v44 }
  0xc5   : > { %3761 = vmatprep.mubr.msk.bf16.mxu1 %vm721_vm2, %v5539_v55  ;;  %3921 = vmatprep.mubr.msk.bf16.mxu0 %vm721_vm2, %v5178_v2 }
  0xcc   : > { %3762 = vmatmul.mubr.msk.bf16.gmra.mrb[12].mxu1 %vm721_vm2, %v4890_v24  ;;  %3922 = vmatmul.mubr.msk.bf16.gmra.mrb[28].mxu0 %vm721_vm2, %v3441_v14  ;;  %v2591_v14 = vrot.slane %v2589_v9, 5 }
  0xcd   : > { %3765 = vmatprep.mubr.msk.bf16.mxu1 %vm721_vm2, %v4921_v56  ;;  %3929 = vmatprep.mubr.msk.bf16.mxu0 %vm721_vm2, %v5540_v51 }
  0xd4   : > { %3766 = vmatmul.mubr.msk.bf16.gmra.mrb[16].mxu1 %vm721_vm2, %v4925_v1  ;;  %3930 = vmatmul.mubr.msk.bf16.vlgmr.msra.gmra.mrb[0].mxu0 %vm721_vm2, %v5541_v26 }
  0xd5   : > { %3962 = vmatpush3.bf16.msra.mxu0 %v4316_v12  ;;  %3769 = vmatprep.mubr.msk.bf16.mxu1 %vm721_vm2, %v4947_v42  ;;  %v2570_v12 = vshrl.u32 %v5189_v61, 16 }
  0xd6   : > { %3933 = vmatprep.mubr.msk.bf16.mxu0 %vm721_vm2, %v5542_v29  ;;  %3963 = vmatprep.subr.bf16.mxu0 %v4317_v7 }
  0xd7   : > { %v2572_v59 = vrot.slane %v2570_v12, 4 }
  0xd9   : > { %3964 = vmatpush3.bf16.msra.mxu0 %v4317_v7  ;;  %v2576_v38 = vor.u32 %v2575_v3, %v2572_v59 }
  0xdb   : > { %v2577_v39 = vrot.slane %v2576_v38, 4 }
  0xdc   : > { %3770 = vmatmul.mubr.msk.bf16.gmra.mrb[20].mxu1 %vm721_vm2, %v4956_v10  ;;  %3934 = vmatmul.mubr.msk.bf16.gmra.mrb[4].mxu0 %vm721_vm2, %v5543_v35 }
  0xdd   : > { %3773 = vmatprep.mubr.msk.bf16.mxu1 %vm721_vm2, %v4999_v8  ;;  %3937 = vmatprep.mubr.msk.bf16.mxu0 %vm721_vm2, %v5544_v50 }
  0xe4   : > { %3774 = vmatmul.mubr.msk.bf16.gmra.mrb[24].mxu1 %vm721_vm2, %v5026_v20  ;;  %3938 = vmatmul.mubr.msk.bf16.gmra.mrb[8].mxu0 %vm721_vm2, %v5545_v46 }
  0xe5   : > { %3777 = vmatprep.mubr.msk.bf16.mxu1 %vm721_vm2, %v5063_v58  ;;  %3941 = vmatprep.mubr.msk.bf16.mxu0 %vm721_vm2, %v5546_v17 }
  0xec   : > { %3778 = vmatmul.mubr.msk.bf16.gmra.mrb[28].mxu1 %vm721_vm2, %v5073_v13  ;;  %3942 = vmatmul.mubr.msk.bf16.gmra.mrb[12].mxu0 %vm721_vm2, %v5547_v31 }
  0xed   : > { %3785 = vmatprep.mubr.msk.bf16.mxu1 %vm721_vm2, %v4453_v34  ;;  %3945 = vmatprep.mubr.msk.bf16.mxu0 %vm721_vm2, %v5548_v4  ;;  %v2579_v34 = vshll.u32 %v5192_v6, 16 }
  0xef   : > { %v2581_v5 = vrot.slane %v2579_v34, 5 }
  0xf1   : > { %v2586_v63 = vor.u32 %v2585_v57, %v2581_v5 }
  0xf4   : > { %3786 = vmatmul.mubr.msk.bf16.vlgmr.msra.gmra.mrb[0].mxu1 %vm721_vm2, %v4953_v37  ;;  %3946 = vmatmul.mubr.msk.bf16.gmra.mrb[16].mxu0 %vm721_vm2, %v5549_v60  ;;  %v4322_v37 = vld [vmem:[%s5475_s1 + $0x48] sm:$0xff]  }
  0xf5   : > { %3999 = vmatpush3.bf16.msra.mxu1 %v4321_v27  ;;  %3789 = vmatprep.mubr.msk.bf16.mxu1 %vm721_vm2, %v4976_v15  ;;  %v5551_v15 = vld [vmem:[#allocation20_spill] sm:$0xff]  ;;  %v2587_v27 = vrot.slane %v2586_v63, 4 }
  0xf6   : > { %3949 = vmatprep.mubr.msk.bf16.mxu0 %vm721_vm2, %v5550_v41  ;;  %3998 = vmatprep.subr.bf16.mxu1 %v4322_v37 }
  0xf9   : > { %4000 = vmatpush3.bf16.msra.mxu1 %v4322_v37 }
  0xfc   : > { %3790 = vmatmul.mubr.msk.bf16.gmra.mrb[4].mxu1 %vm721_vm2, %v5024_v40  ;;  %3950 = vmatmul.mubr.msk.bf16.gmra.mrb[20].mxu0 %vm721_vm2, %v5551_v15  ;;  %v2582_v40 = vsel %vm4447_vm3, %v2577_v39, %v2581_v5 }
  0xfd   : > { %3793 = vmatprep.mubr.msk.bf16.mxu1 %vm721_vm2, %v5061_v47  ;;  %3953 = vmatprep.mubr.msk.bf16.mxu0 %vm721_vm2, %v4892_v16  ;;  %v2592_v47 = vsel %vm4447_vm3, %v2587_v27, %v2591_v14 }
  0xfe   : > { %v3464_v51 = vcombine.low %v2582_v40, %v2592_v47 }
 0x104   : > { %3794 = vmatmul.mubr.msk.bf16.gmra.mrb[8].mxu1 %vm721_vm2, %v5067_v28  ;;  %3954 = vmatmul.mubr.msk.bf16.gmra.mrb[24].mxu0 %vm721_vm2, %v4919_v62 }
 0x105   : > { %3797 = vmatprep.mubr.msk.bf16.mxu1 %vm721_vm2, %v5090_v33  ;;  %3957 = vmatprep.mubr.msk.bf16.mxu0 %vm721_vm2, %v5098_v36 }
 0x10c   : > { %3798 = vmatmul.mubr.msk.bf16.gmra.mrb[12].mxu1 %vm721_vm2, %v4982_v25  ;;  %3958 = vmatmul.mubr.msk.bf16.gmra.mrb[28].mxu0 %vm721_vm2, %v3464_v51 }
 0x10d   : > { %3801 = vmatprep.mubr.msk.bf16.mxu1 %vm721_vm2, %v4992_v49  ;;  %3965 = vmatprep.mubr.msk.bf16.mxu0 %vm721_vm2, %v5535_v45 }
 0x114   : > { %3802 = vmatmul.mubr.msk.bf16.gmra.mrb[16].mxu1 %vm721_vm2, %v5004_v52  ;;  %3966 = vmatmul.mubr.msk.bf16.vlgmr.msra.gmra.mrb[0].mxu0 %vm721_vm2, %v5536_v19 }
 0x115   : > { %3805 = vmatprep.mubr.msk.bf16.mxu1 %vm721_vm2, %v5008_v22  ;;  %3969 = vmatprep.mubr.msk.bf16.mxu0 %vm721_vm2, %v5537_v54 }
 0x11c   : > { %3806 = vmatmul.mubr.msk.bf16.gmra.mrb[20].mxu1 %vm721_vm2, %v5012_v48  ;;  %3970 = vmatmul.mubr.msk.bf16.gmra.mrb[4].mxu0 %vm721_vm2, %v5538_v18 }
 0x11d   : > { %3809 = vmatprep.mubr.msk.bf16.mxu1 %vm721_vm2, %v5016_v23  ;;  %3973 = vmatprep.mubr.msk.bf16.mxu0 %vm721_vm2, %v5539_v55 }
 0x124   : > { %3810 = vmatmul.mubr.msk.bf16.gmra.mrb[24].mxu1 %vm721_vm2, %v5020_v32  ;;  %3974 = vmatmul.mubr.msk.bf16.gmra.mrb[8].mxu0 %vm721_vm2, %v4890_v24  ;;  %v3483_v24 = vrot.slane %v5189_v61, 9 }
 0x125   : > { %3813 = vmatprep.mubr.msk.bf16.mxu1 %vm721_vm2, %v5030_v44  ;;  %3977 = vmatprep.mubr.msk.bf16.mxu0 %vm721_vm2, %v4921_v56  ;;  %v2814_v56 = vrot.slane %v2812_v30, 4 }
 0x12c   : > { %3814 = vmatmul.mubr.msk.bf16.gmra.mrb[28].mxu1 %vm721_vm2, %v5178_v2  ;;  %3978 = vmatmul.mubr.msk.bf16.gmra.mrb[12].mxu0 %vm721_vm2, %v4925_v1  ;;  %v2815_v1 = vrot.slane %v264_v43, 5 }
 0x12d   : > { %3837 = vmatprep.mubr.msk.bf16.mxu1 %vm721_vm2, %v5547_v31  ;;  %3981 = vmatprep.mubr.msk.bf16.mxu0 %vm721_vm2, %v4947_v42  ;;  %v2813_v42 = vsel %vm4637_vm6, %v3483_v24, %v2812_v30 }
 0x134   : > { %3838 = vmatmul.mubr.msk.bf16.vlgmr.msra.gmra.mrb[16].mxu1 %vm721_vm2, %v5548_v4  ;;  %3982 = vmatmul.mubr.msk.bf16.gmra.mrb[16].mxu0 %vm721_vm2, %v4956_v10  ;;  %v2816_v10 = vsel %vm4637_vm6, %v2814_v56, %v2815_v1 }
 0x135   : > { %3841 = vmatprep.mubr.msk.bf16.mxu1 %vm721_vm2, %v5549_v60  ;;  %3985 = vmatprep.mubr.msk.bf16.mxu0 %vm721_vm2, %v4999_v8  ;;  %v3488_v25 = vcombine.low %v2813_v42, %v2816_v10 }
 0x13c   : > { %3842 = vmatmul.mubr.msk.bf16.gmra.mrb[20].mxu1 %vm721_vm2, %v5550_v41  ;;  %3986 = vmatmul.mubr.msk.bf16.gmra.mrb[20].mxu0 %vm721_vm2, %v5026_v20 }
 0x13d   : > { %3845 = vmatprep.mubr.msk.bf16.mxu1 %vm721_vm2, %v5551_v15  ;;  %3989 = vmatprep.mubr.msk.bf16.mxu0 %vm721_vm2, %v5063_v58 }
 0x144   : > { %3846 = vmatmul.mubr.msk.bf16.gmra.mrb[24].mxu1 %vm721_vm2, %v4892_v16  ;;  %3990 = vmatmul.mubr.msk.bf16.gmra.mrb[24].mxu0 %vm721_vm2, %v5073_v13 }
 0x145   : > { %3849 = vmatprep.mubr.msk.bf16.mxu1 %vm721_vm2, %v4919_v62  ;;  %3993 = vmatprep.mubr.msk.bf16.mxu0 %vm721_vm2, %v5092_v53 }
 0x14c   : > { %3850 = vmatmul.mubr.msk.bf16.gmra.mrb[28].mxu1 %vm721_vm2, %v5098_v36  ;;  %3994 = vmatmul.mubr.msk.bf16.gmra.mrb[28].mxu0 %vm721_vm2, %v3488_v25  ;;  %v5357_v36 = vld [vmem:[%s5476_s2] ss:$0 sm:$0xff] }
 0x1c7   : > { %v3787_v16 = vpop.f32.mrb[0].mxu1 }
 0x1c8   : > { %v1728_v49 = vpop.f32.mrb[1].mxu1 }
 0x1c9   : > { %v3788_v8 = vpop.f32.mrb[2].mxu1 }
 0x1ca   : > { %v1731_v62 = vpop.f32.mrb[3].mxu1 }
 0x1cf   : > { %v3791_v52 = vpop.f32.mrb[4].mxu1 }
 0x1d0   : > { %v1744_v22 = vpop.f32.mrb[5].mxu1 }
 0x1d1   : > { %v3792_v48 = vpop.f32.mrb[6].mxu1 }
 0x1d2   : > { %v1747_v23 = vpop.f32.mrb[7].mxu1 }
 0x1d7   : > { %v3795_v32 = vpop.f32.mrb[8].mxu1 }
 0x1d8   : > { %v1760_v20 = vpop.f32.mrb[9].mxu1 }
 0x1d9   : > { %v3796_v44 = vpop.f32.mrb[10].mxu1 }
 0x1da   : > { %v1763_v11 = vpop.f32.mrb[11].mxu1 }
 0x1df   : > { %v5346_v58 = vpop.f32.mrb[12].mxu1 }
 0x1e0   : > { %v5348_v28 = vpop.f32.mrb[13].mxu1 }
 0x1e1   : > { %v5350_v13 = vpop.f32.mrb[14].mxu1 }
 0x1e2   : > { %v5352_v33 = vpop.f32.mrb[15].mxu1 }
 0x1e7   : > { %v3967_v53 = vpop.f32.mrb[0].mxu0 }
 0x1e8   : > { %v4001_v45 = vadd.f32 %v3967_v53, %v3787_v16  ;;  %v2874_v19 = vpop.f32.mrb[1].mxu0 }
 0x1e9   : > { %v4002_v54 = vadd.f32 %v2874_v19, %v1728_v49  ;;  %v3968_v2 = vpop.f32.mrb[2].mxu0 }
 0x1ea   : > { %v3042_v18 = vadd.f32 %v4001_v45, %v5357_v36  ;;  %v4003_v55 = vadd.f32 %v3968_v2, %v3788_v8  ;;  %v2877_v61 = vpop.f32.mrb[3].mxu0 }
 0x1eb   : > { %v3040_v6 = vadd.f32 %v4002_v54, %v5357_v36  ;;  %v4004_v7 = vadd.f32 %v2877_v61, %v1731_v62 }
 0x1ec   : > { %v3074_v26 = vmax.f32 %v3042_v18, 0.0  ;;  %v3043_v29 = vadd.f32 %v4003_v55, %v5357_v36 }
 0x1ed   : > { %v3072_v35 = vmax.f32 %v3040_v6, 0.0  ;;  %v3041_v50 = vadd.f32 %v4004_v7, %v5357_v36 }
 0x1ee   : > { %3107 = vst.msk [vmem:[%s5364_s19 + $0x10] sm:$0xff] %vm3104_vm7, %v3074_v26  ;;  %v3075_v46 = vmax.f32 %v3043_v29, 0.0 }
 0x1ef   : > { %3105 = vst.msk [vmem:[%s5364_s19] sm:$0xff] %vm3104_vm7, %v3072_v35  ;;  %v3073_v17 = vmax.f32 %v3041_v50, 0.0  ;;  %v3971_v31 = vpop.f32.mrb[4].mxu0 }
 0x1f0   : > { %3108 = vst.msk [vmem:[%s5364_s19 + $0x18] sm:$0xff] %vm3104_vm7, %v3075_v46  ;;  %v4005_v4 = vadd.f32 %v3971_v31, %v3791_v52  ;;  %v2890_v60 = vpop.f32.mrb[5].mxu0 }
 0x1f1   : > { %3106 = vst.msk [vmem:[%s5364_s19 + $0x8] sm:$0xff] %vm3104_vm7, %v3073_v17  ;;  %v4006_v12 = vadd.f32 %v2890_v60, %v1744_v22  ;;  %v3972_v0 = vpop.f32.mrb[6].mxu0 }
 0x1f2   : > { %v3046_v21 = vadd.f32 %v4005_v4, %v5357_v36  ;;  %v4007_v34 = vadd.f32 %v3972_v0, %v3792_v48  ;;  %v2893_v41 = vpop.f32.mrb[7].mxu0 }
 0x1f3   : > { %v3044_v37 = vadd.f32 %v4006_v12, %v5357_v36  ;;  %v4008_v59 = vadd.f32 %v2893_v41, %v1747_v23 }
 0x1f4   : > { %v3078_v3 = vmax.f32 %v3046_v21, 0.0  ;;  %v3047_v5 = vadd.f32 %v4007_v34, %v5357_v36 }
 0x1f5   : > { %v3076_v57 = vmax.f32 %v3044_v37, 0.0  ;;  %v3045_v43 = vadd.f32 %v4008_v59, %v5357_v36 }
 0x1f6   : > { %3111 = vst.msk [vmem:[%s5364_s19 + $0x30] sm:$0xff] %vm3104_vm7, %v3078_v3  ;;  %v3079_v15 = vmax.f32 %v3047_v5, 0.0 }
 0x1f7   : > { %3109 = vst.msk [vmem:[%s5364_s19 + $0x20] sm:$0xff] %vm3104_vm7, %v3076_v57  ;;  %v3077_v38 = vmax.f32 %v3045_v43, 0.0  ;;  %v3975_v63 = vpop.f32.mrb[8].mxu0 }
 0x1f8   : > { %3112 = vst.msk [vmem:[%s5364_s19 + $0x38] sm:$0xff] %vm3104_vm7, %v3079_v15  ;;  %v4009_v9 = vadd.f32 %v3975_v63, %v3795_v32  ;;  %v2906_v39 = vpop.f32.mrb[9].mxu0 }
 0x1f9   : > { %3110 = vst.msk [vmem:[%s5364_s19 + $0x28] sm:$0xff] %vm3104_vm7, %v3077_v38  ;;  %v4010_v27 = vadd.f32 %v2906_v39, %v1760_v20  ;;  %v3976_v14 = vpop.f32.mrb[10].mxu0 }
 0x1fa   : > { %v3050_v40 = vadd.f32 %v4009_v9, %v5357_v36  ;;  %v4011_v47 = vadd.f32 %v3976_v14, %v3796_v44  ;;  %v2909_v51 = vpop.f32.mrb[11].mxu0 }
 0x1fb   : > { %v3048_v30 = vadd.f32 %v4010_v27, %v5357_v36  ;;  %v4012_v24 = vadd.f32 %v2909_v51, %v1763_v11 }
 0x1fc   : > { %v3082_v56 = vmax.f32 %v3050_v40, 0.0  ;;  %v3051_v1 = vadd.f32 %v4011_v47, %v5357_v36 }
 0x1fd   : > { %v3080_v42 = vmax.f32 %v3048_v30, 0.0  ;;  %v3049_v10 = vadd.f32 %v4012_v24, %v5357_v36 }
 0x1fe   : > { %3115 = vst.msk [vmem:[%s5364_s19 + $0x50] sm:$0xff] %vm3104_vm7, %v3082_v56  ;;  %v3083_v25 = vmax.f32 %v3051_v1, 0.0 }
 0x1ff   : > { %3113 = vst.msk [vmem:[%s5364_s19 + $0x40] sm:$0xff] %vm3104_vm7, %v3080_v42  ;;  %v3081_v16 = vmax.f32 %v3049_v10, 0.0  ;;  %v3979_v49 = vpop.f32.mrb[12].mxu0 }
 0x200   : > { %3116 = vst.msk [vmem:[%s5364_s19 + $0x58] sm:$0xff] %vm3104_vm7, %v3083_v25  ;;  %v4013_v8 = vadd.f32 %v3979_v49, %v5346_v58  ;;  %v2922_v62 = vpop.f32.mrb[13].mxu0 }
 0x201   : > { %3114 = vst.msk [vmem:[%s5364_s19 + $0x48] sm:$0xff] %vm3104_vm7, %v3081_v16  ;;  %v4014_v52 = vadd.f32 %v2922_v62, %v5348_v28  ;;  %v3980_v22 = vpop.f32.mrb[14].mxu0 }
 0x202   : > { %v3054_v48 = vadd.f32 %v4013_v8, %v5357_v36  ;;  %v4015_v23 = vadd.f32 %v3980_v22, %v5350_v13  ;;  %v2925_v32 = vpop.f32.mrb[15].mxu0 }
 0x203   : > { %v3052_v20 = vadd.f32 %v4014_v52, %v5357_v36  ;;  %v4016_v44 = vadd.f32 %v2925_v32, %v5352_v33 }
 0x204   : > { %v3086_v11 = vmax.f32 %v3054_v48, 0.0  ;;  %v3055_v58 = vadd.f32 %v4015_v23, %v5357_v36 }
 0x205   : > { %v3084_v53 = vmax.f32 %v3052_v20, 0.0  ;;  %v3053_v45 = vadd.f32 %v4016_v44, %v5357_v36 }
 0x206   : > { %3119 = vst.msk [vmem:[%s5364_s19 + $0x70] sm:$0xff] %vm3104_vm7, %v3086_v11  ;;  %v3087_v28 = vmax.f32 %v3055_v58, 0.0 }
 0x207   : > { %3117 = vst.msk [vmem:[%s5364_s19 + $0x60] sm:$0xff] %vm3104_vm7, %v3084_v53  ;;  %v3085_v19 = vmax.f32 %v3053_v45, 0.0  ;;  %v3839_v54 = vpop.f32.mrb[16].mxu1  ;;  %v3983_v13 = vpop.f32.mrb[16].mxu0 }
 0x208   : > { %3120 = vst.msk [vmem:[%s5364_s19 + $0x78] sm:$0xff] %vm3104_vm7, %v3087_v28  ;;  %v4017_v2 = vadd.f32 %v3983_v13, %v3839_v54  ;;  %v2032_v18 = vpop.f32.mrb[17].mxu1  ;;  %v2938_v33 = vpop.f32.mrb[17].mxu0 }
 0x209   : > { %3118 = vst.msk [vmem:[%s5364_s19 + $0x68] sm:$0xff] %vm3104_vm7, %v3085_v19  ;;  %v4018_v55 = vadd.f32 %v2938_v33, %v2032_v18  ;;  %v3840_v61 = vpop.f32.mrb[18].mxu1  ;;  %v3984_v6 = vpop.f32.mrb[18].mxu0 }
 0x20a   : > { %v3058_v7 = vadd.f32 %v4017_v2, %v5357_v36  ;;  %v4019_v26 = vadd.f32 %v3984_v6, %v3840_v61  ;;  %v2035_v29 = vpop.f32.mrb[19].mxu1  ;;  %v2941_v35 = vpop.f32.mrb[19].mxu0 }
 0x20b   : > { %v3056_v50 = vadd.f32 %v4018_v55, %v5357_v36  ;;  %v4020_v46 = vadd.f32 %v2941_v35, %v2035_v29 }
 0x20c   : > { %v3090_v17 = vmax.f32 %v3058_v7, 0.0  ;;  %v3059_v31 = vadd.f32 %v4019_v26, %v5357_v36 }
 0x20d   : > { %v3088_v4 = vmax.f32 %v3056_v50, 0.0  ;;  %v3057_v60 = vadd.f32 %v4020_v46, %v5357_v36 }
 0x20e   : > { %3123 = vst.msk [vmem:[%s5364_s19 + $0x90] sm:$0xff] %vm3104_vm7, %v3090_v17  ;;  %v3091_v12 = vmax.f32 %v3059_v31, 0.0 }
 0x20f   : > { %3121 = vst.msk [vmem:[%s5364_s19 + $0x80] sm:$0xff] %vm3104_vm7, %v3088_v4  ;;  %v3089_v0 = vmax.f32 %v3057_v60, 0.0  ;;  %v3843_v21 = vpop.f32.mrb[20].mxu1  ;;  %v3987_v34 = vpop.f32.mrb[20].mxu0 }
 0x210   : > { %3124 = vst.msk [vmem:[%s5364_s19 + $0x98] sm:$0xff] %vm3104_vm7, %v3091_v12  ;;  %v4021_v41 = vadd.f32 %v3987_v34, %v3843_v21  ;;  %v2048_v37 = vpop.f32.mrb[21].mxu1  ;;  %v2954_v59 = vpop.f32.mrb[21].mxu0 }
 0x211   : > { %3122 = vst.msk [vmem:[%s5364_s19 + $0x88] sm:$0xff] %vm3104_vm7, %v3089_v0  ;;  %v4022_v3 = vadd.f32 %v2954_v59, %v2048_v37  ;;  %v3844_v5 = vpop.f32.mrb[22].mxu1  ;;  %v3988_v57 = vpop.f32.mrb[22].mxu0 }
 0x212   : > { %v3062_v43 = vadd.f32 %v4021_v41, %v5357_v36  ;;  %v4023_v15 = vadd.f32 %v3988_v57, %v3844_v5  ;;  %v2051_v38 = vpop.f32.mrb[23].mxu1  ;;  %v2957_v63 = vpop.f32.mrb[23].mxu0 }
 0x213   : > { %v3060_v9 = vadd.f32 %v4022_v3, %v5357_v36  ;;  %v4024_v39 = vadd.f32 %v2957_v63, %v2051_v38 }
 0x214   : > { %v3094_v27 = vmax.f32 %v3062_v43, 0.0  ;;  %v3063_v14 = vadd.f32 %v4023_v15, %v5357_v36 }
 0x215   : > { %v3092_v40 = vmax.f32 %v3060_v9, 0.0  ;;  %v3061_v47 = vadd.f32 %v4024_v39, %v5357_v36 }
 0x216   : > { %3127 = vst.msk [vmem:[%s5364_s19 + $0xb0] sm:$0xff] %vm3104_vm7, %v3094_v27  ;;  %v3095_v51 = vmax.f32 %v3063_v14, 0.0 }
 0x217   : > { %3125 = vst.msk [vmem:[%s5364_s19 + $0xa0] sm:$0xff] %vm3104_vm7, %v3092_v40  ;;  %v3093_v30 = vmax.f32 %v3061_v47, 0.0  ;;  %v3847_v24 = vpop.f32.mrb[24].mxu1  ;;  %v3991_v56 = vpop.f32.mrb[24].mxu0 }
 0x218   : > { %3128 = vst.msk [vmem:[%s5364_s19 + $0xb8] sm:$0xff] %vm3104_vm7, %v3095_v51  ;;  %v4025_v1 = vadd.f32 %v3991_v56, %v3847_v24  ;;  %v2064_v42 = vpop.f32.mrb[25].mxu1  ;;  %v2970_v10 = vpop.f32.mrb[25].mxu0 }
 0x219   : > { %3126 = vst.msk [vmem:[%s5364_s19 + $0xa8] sm:$0xff] %vm3104_vm7, %v3093_v30  ;;  %v4026_v25 = vadd.f32 %v2970_v10, %v2064_v42  ;;  %v3848_v16 = vpop.f32.mrb[26].mxu1  ;;  %v3992_v49 = vpop.f32.mrb[26].mxu0 }
 0x21a   : > { %v3066_v8 = vadd.f32 %v4025_v1, %v5357_v36  ;;  %v4027_v62 = vadd.f32 %v3992_v49, %v3848_v16  ;;  %v2067_v52 = vpop.f32.mrb[27].mxu1  ;;  %v2973_v22 = vpop.f32.mrb[27].mxu0 }
 0x21b   : > { %v3064_v48 = vadd.f32 %v4026_v25, %v5357_v36  ;;  %v4028_v23 = vadd.f32 %v2973_v22, %v2067_v52 }
 0x21c   : > { %v3098_v32 = vmax.f32 %v3066_v8, 0.0  ;;  %v3067_v20 = vadd.f32 %v4027_v62, %v5357_v36 }
 0x21d   : > { %v3096_v44 = vmax.f32 %v3064_v48, 0.0  ;;  %v3065_v11 = vadd.f32 %v4028_v23, %v5357_v36 }
 0x21e   : > { %3131 = vst.msk [vmem:[%s5364_s19 + $0xd0] sm:$0xff] %vm3104_vm7, %v3098_v32  ;;  %v3099_v58 = vmax.f32 %v3067_v20, 0.0 }
 0x21f   : > { %3129 = vst.msk [vmem:[%s5364_s19 + $0xc0] sm:$0xff] %vm3104_vm7, %v3096_v44  ;;  %v3097_v53 = vmax.f32 %v3065_v11, 0.0  ;;  %v3851_v45 = vpop.f32.mrb[28].mxu1  ;;  %v3995_v28 = vpop.f32.mrb[28].mxu0 }
 0x220   : > { %3132 = vst.msk [vmem:[%s5364_s19 + $0xd8] sm:$0xff] %vm3104_vm7, %v3099_v58  ;;  %v4029_v19 = vadd.f32 %v3995_v28, %v3851_v45  ;;  %v2080_v54 = vpop.f32.mrb[29].mxu1  ;;  %v2986_v13 = vpop.f32.mrb[29].mxu0 }
 0x221   : > { %3130 = vst.msk [vmem:[%s5364_s19 + $0xc8] sm:$0xff] %vm3104_vm7, %v3097_v53  ;;  %v4030_v2 = vadd.f32 %v2986_v13, %v2080_v54  ;;  %v3852_v18 = vpop.f32.mrb[30].mxu1  ;;  %v3996_v33 = vpop.f32.mrb[30].mxu0 }
 0x222   : > { %v3070_v55 = vadd.f32 %v4029_v19, %v5357_v36  ;;  %v4031_v61 = vadd.f32 %v3996_v33, %v3852_v18  ;;  %v2083_v6 = vpop.f32.mrb[31].mxu1  ;;  %v2989_v7 = vpop.f32.mrb[31].mxu0 }
 0x223   : > { %v3068_v26 = vadd.f32 %v4030_v2, %v5357_v36  ;;  %v4032_v29 = vadd.f32 %v2989_v7, %v2083_v6 }
 0x224   : > { %v3102_v35 = vmax.f32 %v3070_v55, 0.0  ;;  %v3071_v50 = vadd.f32 %v4031_v61, %v5357_v36 }
 0x225   : > { %v3100_v46 = vmax.f32 %v3068_v26, 0.0  ;;  %v3069_v17 = vadd.f32 %v4032_v29, %v5357_v36 }
 0x226   : > { %3135 = vst.msk [vmem:[%s5364_s19 + $0xf0] sm:$0xff] %vm3104_vm7, %v3102_v35  ;;  %v3103_v31 = vmax.f32 %v3071_v50, 0.0 }
 0x227   : > { %3133 = vst.msk [vmem:[%s5364_s19 + $0xe0] sm:$0xff] %vm3104_vm7, %v3100_v46  ;;  %v3101_v4 = vmax.f32 %v3069_v17, 0.0 }
 0x228   : > { %3136 = vst.msk [vmem:[%s5364_s19 + $0xf8] sm:$0xff] %vm3104_vm7, %v3103_v31 }
 0x229   : > { %3134 = vst.msk [vmem:[%s5364_s19 + $0xe8] sm:$0xff] %vm3104_vm7, %v3101_v4 }
 0x22a PF: > { %s13_s14 = sadd.s32 1, %s4345_s14   ;;  %s5552_s12 = smov %s4341_s13 }
 0x22b   : > { %p10_p5 = scmp.ge.s32.totalorder %s13_s14, 4   ;;  %s5553_s13 = smov %s5555_s15 }
 0x22d   :  { %12 = sbr.rel (!%p10_p5) target bundleno = 2 (0x2), region = 70 }

</bundles_post_ra>
